<compile_context>
chip_gen: v7x
topology: tpu7x:2x2x1
jax: 0.10.0
libtpu: 0.0.40
codegen_flags: <defaults>
</compile_context>

<pallas_src>
import functools

import numpy as np
import jax
import jax.numpy as jnp
from jax.experimental import pallas as pl
from jax.experimental.pallas import tpu as pltpu

_BN_EPS = 1e-5
_LANES = 128
_SUBLANES = 8
_VMEM_LIMIT = 32 * 1024 * 1024      # safe on v5e/v6e (128 MiB) and v7x (64 MiB)


def _round_up(x, m):
    return (x + m - 1) // m * m


# ------------------------------ kernels -------------------------------------


def _im2col(pad_ref, b, H, W, C, k_pad):
    """Padded slab (image b of pad_ref) -> (H*W, k_pad) im2col patch rows."""
    taps = [pad_ref[b, kh:kh + H, kw:kw + W, :].reshape(H * W, C)
            for kh in range(3) for kw in range(3)]
    if k_pad > 9 * C:
        taps.append(jnp.zeros((H * W, k_pad - 9 * C), pad_ref.dtype))
    return jnp.concatenate(taps, axis=-1)


def _block_stats(acc):
    """f32 accumulator (M, Cp) -> (1, 8, Cp) rows [sum; centered M2; zeros]."""
    m, cp = acc.shape
    s = jnp.sum(acc, axis=0, keepdims=True)
    mu = s * (1.0 / m)
    m2 = jnp.sum(jnp.square(acc - mu), axis=0, keepdims=True)
    pad = jnp.zeros((_SUBLANES - 2, cp), jnp.float32)
    return jnp.concatenate([s, m2, pad], axis=0).reshape(1, _SUBLANES, cp)


def _conv1_stats_kernel(x_ref, w_ref, y_ref, stats_ref, xpad_ref):
    """3x3 conv (stride 1, pad 1) as ONE im2col matmul + per-block BN stats.

    x_ref:     (B, H, W, Cinp)   input images (compute dtype, channel padded)
    w_ref:     (Kp1, C1p)        im2col weight matrix (resident)
    y_ref:     (B*H*W, C1p)      raw conv output (compute dtype)
    stats_ref: (1, 8, C1p)       per-block [sum; centered M2]
    xpad_ref:  VMEM scratch (B, H+2, Wp, Cinp) for the zero ring
    """
    B, H, W, Cinp = x_ref.shape
    Kp, _ = w_ref.shape

    # Ring rebuilt every step (valid under a "parallel" grid).
    # TODO(synk): zero only the ring instead of the full slab.
    xpad_ref[...] = jnp.zeros(xpad_ref.shape, xpad_ref.dtype)
    for b in range(B):
        xpad_ref[b, 1:1 + H, 1:1 + W, :] = x_ref[b]

    cols = [_im2col(xpad_ref, b, H, W, Cinp, Kp) for b in range(B)]
    col = cols[0] if B == 1 else jnp.concatenate(cols, axis=0)   # (B*HW, Kp)
    acc = jnp.dot(col, w_ref[...], preferred_element_type=jnp.float32)
    y_ref[...] = acc.astype(y_ref.dtype)
    stats_ref[...] = _block_stats(acc)


def _bnrelu_conv2_stats_kernel(y1_ref, bn1_ref, w_ref, y2_ref, stats_ref, apad_ref):
    """BN(conv1 stats)+ReLU fused with conv2 (one im2col matmul) + BN2 stats.

    y1_ref:    (B*H*W, C1p)  raw conv1 output (compute dtype)
    bn1_ref:   (8, C1p)      rows 0/1 = mean / inv_std for conv1 (resident)
    w_ref:     (Kp2, C2p)    conv2 im2col weight matrix (resident)
    y2_ref:    (B*H*W, C2p)  raw conv2 output (compute dtype)
    stats_ref: (1, 8, C2p)   per-block [sum; centered M2]
    apad_ref:  VMEM scratch (B, H+2, Wp, C1p) for the zero ring
    """
    B, Hp, _, C1p = apad_ref.shape
    H = Hp - 2
    HW = y1_ref.shape[0] // B
    W = HW // H
    Kp, _ = w_ref.shape

    mean = bn1_ref[0:1, :]
    inv_std = bn1_ref[1:2, :]
    a1 = jnp.maximum((y1_ref[...].astype(jnp.float32) - mean) * inv_std, 0.0)

    # TODO(synk): row-block the halo write (8-aligned ring) so BN+ReLU of block
    # i+1 overlaps the matmul of block i at large H*W.
    apad_ref[...] = jnp.zeros(apad_ref.shape, apad_ref.dtype)
    for b in range(B):
        apad_ref[b, 1:1 + H, 1:1 + W, :] = (
            a1[b * HW:(b + 1) * HW, :].reshape(H, W, C1p).astype(apad_ref.dtype))

    cols = [_im2col(apad_ref, b, H, W, C1p, Kp) for b in range(B)]
    col = cols[0] if B == 1 else jnp.concatenate(cols, axis=0)
    acc = jnp.dot(col, w_ref[...], preferred_element_type=jnp.float32)
    y2_ref[...] = acc.astype(y2_ref.dtype)
    stats_ref[...] = _block_stats(acc)


def _bnrelu_pool_kernel(y2_ref, bn2_ref, out_ref, *, B, H, W, ph, pw):
    """Final BN(conv2 stats) + ReLU fused with the (ph, pw) average pool."""
    C2p = y2_ref.shape[-1]
    Ho, Wo = H // ph, W // pw
    mean = bn2_ref[0:1, :]
    inv_std = bn2_ref[1:2, :]
    a2 = jnp.maximum((y2_ref[...].astype(jnp.float32) - mean) * inv_std, 0.0)

    # Pool along W: rows of a2 are (b, h, w) with w minor.
    p = a2.reshape(B * H * Wo, pw, C2p)
    acc = p[:, 0, :]
    for j in range(1, pw):
        acc = acc + p[:, j, :]
    # Pool along H: rows of acc are (b, h, wo).
    q = acc.reshape(B * Ho, ph, Wo, C2p)
    acc2 = q[:, 0, :, :]
    for j in range(1, ph):
        acc2 = acc2 + q[:, j, :, :]
    out_ref[...] = (acc2.reshape(B * Ho * Wo, C2p)
                    * (1.0 / (ph * pw))).astype(out_ref.dtype)


# ----------------------------- JAX glue ------------------------------------


def _weight_matrix(w_oihw, cin_pad, cout_pad, k_pad, dtype):
    """Torch (Cout, Cin, 3, 3) -> (k_pad, cout_pad) im2col weight matrix."""
    cout, cin, kh, kw = w_oihw.shape
    wt = jnp.transpose(w_oihw, (2, 3, 1, 0)).astype(jnp.float32)   # (3,3,Cin,Cout)
    wt = jnp.pad(wt, ((0, 0), (0, 0), (0, cin_pad - cin), (0, cout_pad - cout)))
    wt = wt.reshape(kh * kw * cin_pad, cout_pad)
    wt = jnp.pad(wt, ((0, k_pad - kh * kw * cin_pad), (0, 0)))
    return wt.astype(dtype)


def _bn_vectors(stats_blocks, n_per_block):
    """Per-block [sum; centered M2] -> (8, Cp) rows [mean; inv_std] (biased var)."""
    nblk, _, cp = stats_blocks.shape
    n_total = nblk * n_per_block
    s = stats_blocks[:, 0, :]
    m2 = stats_blocks[:, 1, :]
    mu = jnp.sum(s, axis=0) / n_total
    mu_b = s / n_per_block
    var = (jnp.sum(m2, axis=0)
           + n_per_block * jnp.sum(jnp.square(mu_b - mu), axis=0)) / n_total
    inv_std = jax.lax.rsqrt(jnp.maximum(var, 0.0) + _BN_EPS)
    out = jnp.zeros((_SUBLANES, cp), jnp.float32)
    return out.at[0].set(mu).at[1].set(inv_std)


def _pick_b_tile(n_images, per_image_bytes, budget_bytes=8 << 20):
    b = int(max(1, min(n_images, budget_bytes // max(per_image_bytes, 1))))
    while n_images % b:
        b -= 1
    return b


def conv_block_forward(x_nchw, w1, w2, pool_size=(2, 2), pool_type="avg",
                       compute_dtype=jnp.bfloat16, b_tile=None):
    """Pallas ConvBlock forward: conv3x3 -> BN -> ReLU (x2) -> avg pool.

    compute_dtype: dtype of the MXU matmul inputs and inter-stage HBM
    activations.  bfloat16 is recommended on all generations (v5e/v6e/v7x MXUs
    are bf16-native); accumulation and all BN / ReLU / pool math stay float32.
    """
    if pool_type != "avg":
        # TODO(synk): 'max' / 'avg+max' pooling variants not implemented here.
        raise NotImplementedError("only pool_type='avg' is implemented")

    N, Cin, H, W = x_nchw.shape
    Cout1, Cout2 = w1.shape[0], w2.shape[0]
    ph, pw = pool_size
    assert H % ph == 0 and W % pw == 0, "pool size must divide spatial dims"
    Ho, Wo = H // ph, W // pw
    HW = H * W

    Cinp = _round_up(Cin, _SUBLANES)
    C1p = _round_up(Cout1, _LANES)
    C2p = _round_up(Cout2, _LANES)
    Kp1 = _round_up(9 * Cinp, _LANES)
    Kp2 = _round_up(9 * C1p, _LANES)
    Wp2 = _round_up(W + 2, _SUBLANES)        # padded slab width (VMEM scratch)

    itemsize = jnp.dtype(compute_dtype).itemsize
    if b_tile is None:
        per_image = (HW * (Kp2 * itemsize + (C1p + C2p) * (itemsize + 4))
                     + (H + 2) * Wp2 * (Cinp + C1p) * itemsize)
        b_tile = _pick_b_tile(N, per_image)
    assert N % b_tile == 0
    nblk = N // b_tile
    n_per_block = b_tile * HW

    # NCHW -> NHWC + channel pad + cast; the 3x3 zero ring is built in VMEM.
    x_nhwc = jnp.transpose(x_nchw, (0, 2, 3, 1))
    x_nhwc = jnp.pad(x_nhwc, ((0, 0), (0, 0), (0, 0), (0, Cinp - Cin)))
    x_nhwc = x_nhwc.astype(compute_dtype)

    w1m = _weight_matrix(w1, Cinp, C1p, Kp1, compute_dtype)    # (Kp1, C1p)
    w2m = _weight_matrix(w2, C1p, C2p, Kp2, compute_dtype)     # (Kp2, C2p)

    cparams = pltpu.CompilerParams(dimension_semantics=("parallel",),
                                   vmem_limit_bytes=_VMEM_LIMIT)

    # ---- stage 1: conv1 (one im2col matmul / step) + per-block BN1 stats ----
    # TODO(synk): single-buffer the resident weight block (pl.Buffered(1)) at
    # large channel widths to save VMEM on v7x.
    y1, stats1 = pl.pallas_call(
        _conv1_stats_kernel,
        out_shape=(jax.ShapeDtypeStruct((N * HW, C1p), compute_dtype),
                   jax.ShapeDtypeStruct((nblk, _SUBLANES, C1p), jnp.float32)),
        grid=(nblk,),
        in_specs=[
            pl.BlockSpec((b_tile, H, W, Cinp), lambda n: (n, 0, 0, 0)),
            pl.BlockSpec((Kp1, C1p), lambda n: (0, 0)),        # resident weights
        ],
        out_specs=(
            pl.BlockSpec((n_per_block, C1p), lambda n: (n, 0)),
            pl.BlockSpec((1, _SUBLANES, C1p), lambda n: (n, 0, 0)),
        ),
        scratch_shapes=[pltpu.VMEM((b_tile, H + 2, Wp2, Cinp), compute_dtype)],
        compiler_params=cparams,
    )(x_nhwc, w1m)
    bn1 = _bn_vectors(stats1, n_per_block)

    # ---- stage 2: BN1+ReLU fused with conv2 + per-block BN2 stats -----------
    y2, stats2 = pl.pallas_call(
        _bnrelu_conv2_stats_kernel,
        out_shape=(jax.ShapeDtypeStruct((N * HW, C2p), compute_dtype),
                   jax.ShapeDtypeStruct((nblk, _SUBLANES, C2p), jnp.float32)),
        grid=(nblk,),
        in_specs=[
            pl.BlockSpec((n_per_block, C1p), lambda n: (n, 0)),
            pl.BlockSpec((_SUBLANES, C1p), lambda n: (0, 0)),
            pl.BlockSpec((Kp2, C2p), lambda n: (0, 0)),        # resident weights
        ],
        out_specs=(
            pl.BlockSpec((n_per_block, C2p), lambda n: (n, 0)),
            pl.BlockSpec((1, _SUBLANES, C2p), lambda n: (n, 0, 0)),
        ),
        scratch_shapes=[pltpu.VMEM((b_tile, H + 2, Wp2, C1p), compute_dtype)],
        compiler_params=cparams,
    )(y1, bn1, w2m)
    bn2 = _bn_vectors(stats2, n_per_block)

    # ---- stage 3: BN2 + ReLU fused with the average pool (lane-dense out) ---
    pooled = pl.pallas_call(
        functools.partial(_bnrelu_pool_kernel, B=b_tile, H=H, W=W, ph=ph, pw=pw),
        out_shape=jax.ShapeDtypeStruct((N * Ho * Wo, C2p), compute_dtype),
        grid=(nblk,),
        in_specs=[
            pl.BlockSpec((n_per_block, C2p), lambda n: (n, 0)),
            pl.BlockSpec((_SUBLANES, C2p), lambda n: (0, 0)),
        ],
        out_specs=pl.BlockSpec((b_tile * Ho * Wo, C2p), lambda n: (n, 0)),
        compiler_params=cparams,
    )(y2, bn2)

    out = pooled.reshape(N, Ho, Wo, C2p)[..., :Cout2]
    return jnp.transpose(out, (0, 3, 1, 2)).astype(jnp.float32)    # NCHW, f32


# ------------------------- parameter init & reference -----------------------


def _xavier_uniform_conv(key, cout, cin, kh, kw):
    fan_in = cin * kh * kw
    fan_out = cout * kh * kw
    bound = float(np.sqrt(6.0 / (fan_in + fan_out)))
    return jax.random.uniform(key, (cout, cin, kh, kw), jnp.float32, -bound, bound)


def _reference_forward(x, w1, w2):
    """Pure-JAX reference mirroring the PyTorch forward (training-mode BN, avg pool)."""
    dn = ("NCHW", "OIHW", "NCHW")

    def conv(x, w):
        return jax.lax.conv_general_dilated(
            x, w, window_strides=(1, 1), padding=((1, 1), (1, 1)),
            dimension_numbers=dn)

    def bn_relu(x):
        mean = jnp.mean(x, axis=(0, 2, 3), keepdims=True)
        var = jnp.mean(jnp.square(x - mean), axis=(0, 2, 3), keepdims=True)
        return jnp.maximum((x - mean) / jnp.sqrt(var + _BN_EPS), 0.0)

    y = bn_relu(conv(x, w1))
    y = bn_relu(conv(y, w2))
    N, C, H, W = y.shape
    return y.reshape(N, C, H // 2, 2, W // 2, 2).mean(axis=(3, 5))


if __name__ == "__main__":
    key = jax.random.PRNGKey(0)
    kx, kw1, kw2 = jax.random.split(key, 3)

    N, Cin, Cout, H, W = 2, 4, 8, 16, 16
    x = jax.random.normal(kx, (N, Cin, H, W), jnp.float32)
    w1 = _xavier_uniform_conv(kw1, Cout, Cin, 3, 3)    # conv1.weight (no bias)
    w2 = _xavier_uniform_conv(kw2, Cout, Cout, 3, 3)   # conv2.weight (no bias)

    ref = jax.block_until_ready(_reference_forward(x, w1, w2))

    # Exact-semantics path (f32 matmul inputs / f32 inter-stage activations).
    out_f32 = conv_block_forward(x, w1, w2, pool_size=(2, 2), pool_type="avg",
                                 compute_dtype=jnp.float32)
    out_f32 = jax.block_until_ready(out_f32)
    assert out_f32.shape == (N, Cout, H // 2, W // 2), out_f32.shape
    np.testing.assert_allclose(np.asarray(out_f32), np.asarray(ref),
                               rtol=2e-3, atol=2e-3)

    # bf16 fast path (recommended on v5e / v6e / v7x); looser tolerance.
    out_bf16 = conv_block_forward(x, w1, w2, pool_size=(2, 2), pool_type="avg",
                                  compute_dtype=jnp.bfloat16)
    out_bf16 = jax.block_until_ready(out_bf16)
    np.testing.assert_allclose(np.asarray(out_bf16), np.asarray(ref),
                               rtol=5e-2, atol=5e-2)

    print("KERNEL_OK")
</pallas_src>

<mosaic_0001>
module attributes {stable_mosaic.version = 11 : i64} {
  func.func @_conv1_stats_kernel(%arg0: i32, %arg1: memref<2x16x16x8xf32, #tpu.memory_space<vmem>>, %arg2: memref<128x128xf32, #tpu.memory_space<vmem>>, %arg3: memref<512x128xf32, #tpu.memory_space<vmem>>, %arg4: memref<1x8x128xf32, #tpu.memory_space<vmem>>, %arg5: memref<2x18x24x8xf32, #tpu.memory_space<vmem>>) attributes {dimension_semantics = [#tpu.dimension_semantics<parallel>], iteration_bounds = array<i64: 1>, scalar_prefetch = 0 : i64, scratch_operands = 1 : i64, tpu.core_type = #tpu.core_type<tc>, window_params = [{transform_indices = @transform_0, window_bounds = array<i64: 2, 16, 16, 8>}, {pipeline_mode = #tpu.pipeline_mode<synchronous>, transform_indices = @transform_1, window_bounds = array<i64: 128, 128>}, {transform_indices = @transform_2, window_bounds = array<i64: 512, 128>}, {transform_indices = @transform_3, window_bounds = array<i64: 1, 8, 128>}]} {
    %cst = arith.constant 0.000000e+00 : f32
    %0 = vector.broadcast %cst : f32 to vector<2x18x24x8xf32>
    %c0 = arith.constant 0 : index
    %c0_0 = arith.constant 0 : index
    %c0_1 = arith.constant 0 : index
    %c0_2 = arith.constant 0 : index
    %1 = vector.load %arg5[%c0, %c0_0, %c0_1, %c0_2] : memref<2x18x24x8xf32, #tpu.memory_space<vmem>>, vector<2x18x24x8xf32>
    tpu.vector_store %arg5[%c0, %c0_0, %c0_1, %c0_2], %0 {strides = array<i32>} : memref<2x18x24x8xf32, #tpu.memory_space<vmem>>, vector<2x18x24x8xf32>,
    %c0_3 = arith.constant 0 : index
    %c0_4 = arith.constant 0 : index
    %c0_5 = arith.constant 0 : index
    %c0_6 = arith.constant 0 : index
    %2 = vector.load %arg1[%c0_3, %c0_4, %c0_5, %c0_6] : memref<2x16x16x8xf32, #tpu.memory_space<vmem>>, vector<1x16x16x8xf32>
    %3 = vector.shape_cast %2 : vector<1x16x16x8xf32> to vector<16x16x8xf32>
    %c0_7 = arith.constant 0 : index
    %c1 = arith.constant 1 : index
    %c1_8 = arith.constant 1 : index
    %c0_9 = arith.constant 0 : index
    %4 = vector.load %arg5[%c0_7, %c1, %c1_8, %c0_9] : memref<2x18x24x8xf32, #tpu.memory_space<vmem>>, vector<1x16x16x8xf32>
    %5 = vector.shape_cast %4 : vector<1x16x16x8xf32> to vector<16x16x8xf32>
    %6 = vector.shape_cast %3 : vector<16x16x8xf32> to vector<1x16x16x8xf32>
    tpu.vector_store %arg5[%c0_7, %c1, %c1_8, %c0_9], %6 {strides = array<i32>} : memref<2x18x24x8xf32, #tpu.memory_space<vmem>>, vector<1x16x16x8xf32>,
    %c1_10 = arith.constant 1 : index
    %c0_11 = arith.constant 0 : index
    %c0_12 = arith.constant 0 : index
    %c0_13 = arith.constant 0 : index
    %7 = vector.load %arg1[%c1_10, %c0_11, %c0_12, %c0_13] : memref<2x16x16x8xf32, #tpu.memory_space<vmem>>, vector<1x16x16x8xf32>
    %8 = vector.shape_cast %7 : vector<1x16x16x8xf32> to vector<16x16x8xf32>
    %c1_14 = arith.constant 1 : index
    %c1_15 = arith.constant 1 : index
    %c1_16 = arith.constant 1 : index
    %c0_17 = arith.constant 0 : index
    %9 = vector.load %arg5[%c1_14, %c1_15, %c1_16, %c0_17] : memref<2x18x24x8xf32, #tpu.memory_space<vmem>>, vector<1x16x16x8xf32>
    %10 = vector.shape_cast %9 : vector<1x16x16x8xf32> to vector<16x16x8xf32>
    %11 = vector.shape_cast %8 : vector<16x16x8xf32> to vector<1x16x16x8xf32>
    tpu.vector_store %arg5[%c1_14, %c1_15, %c1_16, %c0_17], %11 {strides = array<i32>} : memref<2x18x24x8xf32, #tpu.memory_space<vmem>>, vector<1x16x16x8xf32>,
    %c0_18 = arith.constant 0 : index
    %c0_19 = arith.constant 0 : index
    %c0_20 = arith.constant 0 : index
    %c0_21 = arith.constant 0 : index
    %12 = vector.load %arg5[%c0_18, %c0_19, %c0_20, %c0_21] : memref<2x18x24x8xf32, #tpu.memory_space<vmem>>, vector<1x16x16x8xf32>
    %13 = vector.shape_cast %12 : vector<1x16x16x8xf32> to vector<16x16x8xf32>
    %14 = vector.shape_cast %13 : vector<16x16x8xf32> to vector<256x8xf32>
    %c0_22 = arith.constant 0 : index
    %c0_23 = arith.constant 0 : index
    %c1_24 = arith.constant 1 : index
    %c0_25 = arith.constant 0 : index
    %15 = vector.load %arg5[%c0_22, %c0_23, %c1_24, %c0_25] : memref<2x18x24x8xf32, #tpu.memory_space<vmem>>, vector<1x16x16x8xf32>
    %16 = vector.shape_cast %15 : vector<1x16x16x8xf32> to vector<16x16x8xf32>
    %17 = vector.shape_cast %16 : vector<16x16x8xf32> to vector<256x8xf32>
    %c0_26 = arith.constant 0 : index
    %c0_27 = arith.constant 0 : index
    %c2 = arith.constant 2 : index
    %c0_28 = arith.constant 0 : index
    %18 = vector.load %arg5[%c0_26, %c0_27, %c2, %c0_28] : memref<2x18x24x8xf32, #tpu.memory_space<vmem>>, vector<1x16x16x8xf32>
    %19 = vector.shape_cast %18 : vector<1x16x16x8xf32> to vector<16x16x8xf32>
    %20 = vector.shape_cast %19 : vector<16x16x8xf32> to vector<256x8xf32>
    %c0_29 = arith.constant 0 : index
    %c1_30 = arith.constant 1 : index
    %c0_31 = arith.constant 0 : index
    %c0_32 = arith.constant 0 : index
    %21 = vector.load %arg5[%c0_29, %c1_30, %c0_31, %c0_32] : memref<2x18x24x8xf32, #tpu.memory_space<vmem>>, vector<1x16x16x8xf32>
    %22 = vector.shape_cast %21 : vector<1x16x16x8xf32> to vector<16x16x8xf32>
    %23 = vector.shape_cast %22 : vector<16x16x8xf32> to vector<256x8xf32>
    %c0_33 = arith.constant 0 : index
    %c1_34 = arith.constant 1 : index
    %c1_35 = arith.constant 1 : index
    %c0_36 = arith.constant 0 : index
    %24 = vector.load %arg5[%c0_33, %c1_34, %c1_35, %c0_36] : memref<2x18x24x8xf32, #tpu.memory_space<vmem>>, vector<1x16x16x8xf32>
    %25 = vector.shape_cast %24 : vector<1x16x16x8xf32> to vector<16x16x8xf32>
    %26 = vector.shape_cast %25 : vector<16x16x8xf32> to vector<256x8xf32>
    %c0_37 = arith.constant 0 : index
    %c1_38 = arith.constant 1 : index
    %c2_39 = arith.constant 2 : index
    %c0_40 = arith.constant 0 : index
    %27 = vector.load %arg5[%c0_37, %c1_38, %c2_39, %c0_40] : memref<2x18x24x8xf32, #tpu.memory_space<vmem>>, vector<1x16x16x8xf32>
    %28 = vector.shape_cast %27 : vector<1x16x16x8xf32> to vector<16x16x8xf32>
    %29 = vector.shape_cast %28 : vector<16x16x8xf32> to vector<256x8xf32>
    %c0_41 = arith.constant 0 : index
    %c2_42 = arith.constant 2 : index
    %c0_43 = arith.constant 0 : index
    %c0_44 = arith.constant 0 : index
    %30 = vector.load %arg5[%c0_41, %c2_42, %c0_43, %c0_44] : memref<2x18x24x8xf32, #tpu.memory_space<vmem>>, vector<1x16x16x8xf32>
    %31 = vector.shape_cast %30 : vector<1x16x16x8xf32> to vector<16x16x8xf32>
    %32 = vector.shape_cast %31 : vector<16x16x8xf32> to vector<256x8xf32>
    %c0_45 = arith.constant 0 : index
    %c2_46 = arith.constant 2 : index
    %c1_47 = arith.constant 1 : index
    %c0_48 = arith.constant 0 : index
    %33 = vector.load %arg5[%c0_45, %c2_46, %c1_47, %c0_48] : memref<2x18x24x8xf32, #tpu.memory_space<vmem>>, vector<1x16x16x8xf32>
    %34 = vector.shape_cast %33 : vector<1x16x16x8xf32> to vector<16x16x8xf32>
    %35 = vector.shape_cast %34 : vector<16x16x8xf32> to vector<256x8xf32>
    %c0_49 = arith.constant 0 : index
    %c2_50 = arith.constant 2 : index
    %c2_51 = arith.constant 2 : index
    %c0_52 = arith.constant 0 : index
    %36 = vector.load %arg5[%c0_49, %c2_50, %c2_51, %c0_52] : memref<2x18x24x8xf32, #tpu.memory_space<vmem>>, vector<1x16x16x8xf32>
    %37 = vector.shape_cast %36 : vector<1x16x16x8xf32> to vector<16x16x8xf32>
    %38 = vector.shape_cast %37 : vector<16x16x8xf32> to vector<256x8xf32>
    %cst_53 = arith.constant 0.000000e+00 : f32
    %39 = vector.broadcast %cst_53 : f32 to vector<256x56xf32>
    %40 = tpu.concatenate %14, %17, %20, %23, %26, %29, %32, %35, %38, %39 in 1 : vector<256x8xf32>, vector<256x8xf32>, vector<256x8xf32>, vector<256x8xf32>, vector<256x8xf32>, vector<256x8xf32>, vector<256x8xf32>, vector<256x8xf32>, vector<256x8xf32>, vector<256x56xf32> -> vector<256x128xf32>
    %c1_54 = arith.constant 1 : index
    %c0_55 = arith.constant 0 : index
    %c0_56 = arith.constant 0 : index
    %c0_57 = arith.constant 0 : index
    %41 = vector.load %arg5[%c1_54, %c0_55, %c0_56, %c0_57] : memref<2x18x24x8xf32, #tpu.memory_space<vmem>>, vector<1x16x16x8xf32>
    %42 = vector.shape_cast %41 : vector<1x16x16x8xf32> to vector<16x16x8xf32>
    %43 = vector.shape_cast %42 : vector<16x16x8xf32> to vector<256x8xf32>
    %c1_58 = arith.constant 1 : index
    %c0_59 = arith.constant 0 : index
    %c1_60 = arith.constant 1 : index
    %c0_61 = arith.constant 0 : index
    %44 = vector.load %arg5[%c1_58, %c0_59, %c1_60, %c0_61] : memref<2x18x24x8xf32, #tpu.memory_space<vmem>>, vector<1x16x16x8xf32>
    %45 = vector.shape_cast %44 : vector<1x16x16x8xf32> to vector<16x16x8xf32>
    %46 = vector.shape_cast %45 : vector<16x16x8xf32> to vector<256x8xf32>
    %c1_62 = arith.constant 1 : index
    %c0_63 = arith.constant 0 : index
    %c2_64 = arith.constant 2 : index
    %c0_65 = arith.constant 0 : index
    %47 = vector.load %arg5[%c1_62, %c0_63, %c2_64, %c0_65] : memref<2x18x24x8xf32, #tpu.memory_space<vmem>>, vector<1x16x16x8xf32>
    %48 = vector.shape_cast %47 : vector<1x16x16x8xf32> to vector<16x16x8xf32>
    %49 = vector.shape_cast %48 : vector<16x16x8xf32> to vector<256x8xf32>
    %c1_66 = arith.constant 1 : index
    %c1_67 = arith.constant 1 : index
    %c0_68 = arith.constant 0 : index
    %c0_69 = arith.constant 0 : index
    %50 = vector.load %arg5[%c1_66, %c1_67, %c0_68, %c0_69] : memref<2x18x24x8xf32, #tpu.memory_space<vmem>>, vector<1x16x16x8xf32>
    %51 = vector.shape_cast %50 : vector<1x16x16x8xf32> to vector<16x16x8xf32>
    %52 = vector.shape_cast %51 : vector<16x16x8xf32> to vector<256x8xf32>
    %c1_70 = arith.constant 1 : index
    %c1_71 = arith.constant 1 : index
    %c1_72 = arith.constant 1 : index
    %c0_73 = arith.constant 0 : index
    %53 = vector.load %arg5[%c1_70, %c1_71, %c1_72, %c0_73] : memref<2x18x24x8xf32, #tpu.memory_space<vmem>>, vector<1x16x16x8xf32>
    %54 = vector.shape_cast %53 : vector<1x16x16x8xf32> to vector<16x16x8xf32>
    %55 = vector.shape_cast %54 : vector<16x16x8xf32> to vector<256x8xf32>
    %c1_74 = arith.constant 1 : index
    %c1_75 = arith.constant 1 : index
    %c2_76 = arith.constant 2 : index
    %c0_77 = arith.constant 0 : index
    %56 = vector.load %arg5[%c1_74, %c1_75, %c2_76, %c0_77] : memref<2x18x24x8xf32, #tpu.memory_space<vmem>>, vector<1x16x16x8xf32>
    %57 = vector.shape_cast %56 : vector<1x16x16x8xf32> to vector<16x16x8xf32>
    %58 = vector.shape_cast %57 : vector<16x16x8xf32> to vector<256x8xf32>
    %c1_78 = arith.constant 1 : index
    %c2_79 = arith.constant 2 : index
    %c0_80 = arith.constant 0 : index
    %c0_81 = arith.constant 0 : index
    %59 = vector.load %arg5[%c1_78, %c2_79, %c0_80, %c0_81] : memref<2x18x24x8xf32, #tpu.memory_space<vmem>>, vector<1x16x16x8xf32>
    %60 = vector.shape_cast %59 : vector<1x16x16x8xf32> to vector<16x16x8xf32>
    %61 = vector.shape_cast %60 : vector<16x16x8xf32> to vector<256x8xf32>
    %c1_82 = arith.constant 1 : index
    %c2_83 = arith.constant 2 : index
    %c1_84 = arith.constant 1 : index
    %c0_85 = arith.constant 0 : index
    %62 = vector.load %arg5[%c1_82, %c2_83, %c1_84, %c0_85] : memref<2x18x24x8xf32, #tpu.memory_space<vmem>>, vector<1x16x16x8xf32>
    %63 = vector.shape_cast %62 : vector<1x16x16x8xf32> to vector<16x16x8xf32>
    %64 = vector.shape_cast %63 : vector<16x16x8xf32> to vector<256x8xf32>
    %c1_86 = arith.constant 1 : index
    %c2_87 = arith.constant 2 : index
    %c2_88 = arith.constant 2 : index
    %c0_89 = arith.constant 0 : index
    %65 = vector.load %arg5[%c1_86, %c2_87, %c2_88, %c0_89] : memref<2x18x24x8xf32, #tpu.memory_space<vmem>>, vector<1x16x16x8xf32>
    %66 = vector.shape_cast %65 : vector<1x16x16x8xf32> to vector<16x16x8xf32>
    %67 = vector.shape_cast %66 : vector<16x16x8xf32> to vector<256x8xf32>
    %cst_90 = arith.constant 0.000000e+00 : f32
    %68 = vector.broadcast %cst_90 : f32 to vector<256x56xf32>
    %69 = tpu.concatenate %43, %46, %49, %52, %55, %58, %61, %64, %67, %68 in 1 : vector<256x8xf32>, vector<256x8xf32>, vector<256x8xf32>, vector<256x8xf32>, vector<256x8xf32>, vector<256x8xf32>, vector<256x8xf32>, vector<256x8xf32>, vector<256x8xf32>, vector<256x56xf32> -> vector<256x128xf32>
    %70 = tpu.concatenate %40, %69 in 0 : vector<256x128xf32>, vector<256x128xf32> -> vector<512x128xf32>
    %c0_91 = arith.constant 0 : index
    %c0_92 = arith.constant 0 : index
    %71 = vector.load %arg2[%c0_91, %c0_92] : memref<128x128xf32, #tpu.memory_space<vmem>>, vector<128x128xf32>
    %cst_93 = arith.constant dense<0.000000e+00> : vector<512x128xf32>
    %72 = tpu.matmul %70, %71, %cst_93 {dimension_numbers = #tpu.dot_dimension_numbers<[1], [0], [0], [1], [0, 0, 1, 1], [], []>} : vector<512x128xf32>, vector<128x128xf32>, vector<512x128xf32> -> vector<512x128xf32>
    %c0_94 = arith.constant 0 : index
    %c0_95 = arith.constant 0 : index
    %73 = vector.load %arg3[%c0_94, %c0_95] : memref<512x128xf32, #tpu.memory_space<vmem>>, vector<512x128xf32>
    tpu.vector_store %arg3[%c0_94, %c0_95], %72 {strides = array<i32>} : memref<512x128xf32, #tpu.memory_space<vmem>>, vector<512x128xf32>,
    %cst_96 = arith.constant dense<0.000000e+00> : vector<128xf32>
    %74 = vector.multi_reduction <add>, %72, %cst_96 [0] : vector<512x128xf32> to vector<128xf32>
    %75 = vector.shape_cast %74 : vector<128xf32> to vector<1x128xf32>
    %cst_97 = arith.constant 0.001953125 : f32
    %76 = vector.broadcast %cst_97 : f32 to vector<1x128xf32>
    %77 = arith.mulf %75, %76 : vector<1x128xf32>
    %78 = vector.broadcast %77 : vector<1x128xf32> to vector<512x128xf32>
    %79 = arith.subf %72, %78 : vector<512x128xf32>
    %80 = arith.mulf %79, %79 : vector<512x128xf32>
    %cst_98 = arith.constant dense<0.000000e+00> : vector<128xf32>
    %81 = vector.multi_reduction <add>, %80, %cst_98 [0] : vector<512x128xf32> to vector<128xf32>
    %82 = vector.shape_cast %81 : vector<128xf32> to vector<1x128xf32>
    %cst_99 = arith.constant 0.000000e+00 : f32
    %83 = vector.broadcast %cst_99 : f32 to vector<6x128xf32>
    %84 = tpu.concatenate %75, %82, %83 in 0 : vector<1x128xf32>, vector<1x128xf32>, vector<6x128xf32> -> vector<8x128xf32>
    %85 = vector.shape_cast %84 : vector<8x128xf32> to vector<1x8x128xf32>
    %c0_100 = arith.constant 0 : index
    %c0_101 = arith.constant 0 : index
    %c0_102 = arith.constant 0 : index
    %86 = vector.load %arg4[%c0_100, %c0_101, %c0_102] : memref<1x8x128xf32, #tpu.memory_space<vmem>>, vector<1x8x128xf32>
    tpu.vector_store %arg4[%c0_100, %c0_101, %c0_102], %85 {strides = array<i32>} : memref<1x8x128xf32, #tpu.memory_space<vmem>>, vector<1x8x128xf32>,
    return
  }
  func.func @transform_0(%arg0: i32) -> (i32, i32, i32, i32) {
    %c0_i32 = arith.constant 0 : i32
    %c0_i32_0 = arith.constant 0 : i32
    %c0_i32_1 = arith.constant 0 : i32
    %c0_i32_2 = arith.constant 0 : i32
    return %arg0, %c0_i32, %c0_i32_0, %c0_i32_1 : i32, i32, i32, i32
  }
  func.func @transform_1(%arg0: i32) -> (i32, i32) {
    %c0_i32 = arith.constant 0 : i32
    %c0_i32_0 = arith.constant 0 : i32
    %c0_i32_1 = arith.constant 0 : i32
    return %c0_i32, %c0_i32_0 : i32, i32
  }
  func.func @transform_2(%arg0: i32) -> (i32, i32) {
    %c0_i32 = arith.constant 0 : i32
    %c0_i32_0 = arith.constant 0 : i32
    return %arg0, %c0_i32 : i32, i32
  }
  func.func @transform_3(%arg0: i32) -> (i32, i32, i32) {
    %c0_i32 = arith.constant 0 : i32
    %c0_i32_0 = arith.constant 0 : i32
    %c0_i32_1 = arith.constant 0 : i32
    return %arg0, %c0_i32, %c0_i32_0 : i32, i32, i32
  }
}

</mosaic_0001>

<bundles_post_ra>
// kernel: tpu_custom_call.1
= control target key start
LH: loop header
LB: loop body
LE: loop exit
PB: predicated region body
PF: predicated region fallthrough
CT: control target
= control target key end

     0   :  { %9 = vsyncpa [#allocation4], 0  ;;  %vm15_vm0 = vcmask 64512   ;;  %v4688_v3 = vmov 0.0   ;;  %s4689_s8 = smov 8   ;;  %s8398_s0 = inlined_call_operand.vmem [shape: f32[2,16,16,8], index: 0, kind: input, shape index: {}]   ;;  %s8399_s1 = inlined_call_operand.vmem [shape: f32[128,128], index: 1, kind: input, shape index: {}]   ;;  %s8400_s2 = inlined_call_operand.hbm [shape: f32[512,128], index: 2, kind: output, shape index: {0}]   ;;  %s8401_s3 = inlined_call_operand.hbm [shape: f32[1,8,128], index: 3, kind: output, shape index: {1}]  }
   0x1   :  { %v4723_v0 = vld [vmem:[%s8398_s0] sm:$0xff]  ;;  %v4728_v1 = vld [vmem:[%s8398_s0 + $0x8] sm:$0xff]  ;;  %v4733_v2 = vld [vmem:[%s8398_s0 + $0x10] sm:$0xff]  ;;  %16 = vst.msk [vmem:[#allocation2] sm:$0xff] %vm15_vm0, %v4688_v3 }
   0x2   :  { %17 = vst.msk [vmem:[#allocation2 + $0x8] sm:$0xff] %vm15_vm0, %v4688_v3  ;;  %18 = vst.msk [vmem:[#allocation2 + $0x10] sm:$0xff] %vm15_vm0, %v4688_v3  ;;  %v127_v4 = vld [vmem:[%s8398_s0 + $0x18] sm:$0xff]  ;;  %v128_v5 = vld [vmem:[%s8398_s0 + $0x20] sm:$0xff] }
   0x3   :  { %19 = vst.msk [vmem:[#allocation2 + $0x18] sm:$0xff] %vm15_vm0, %v4688_v3  ;;  %20 = vst.msk [vmem:[#allocation2 + $0x20] sm:$0xff] %vm15_vm0, %v4688_v3  ;;  %v129_v6 = vld [vmem:[%s8398_s0 + $0x28] sm:$0xff]  ;;  %v130_v7 = vld [vmem:[%s8398_s0 + $0x30] sm:$0xff] }
   0x4   :  { %21 = vst.msk [vmem:[#allocation2 + $0x28] sm:$0xff] %vm15_vm0, %v4688_v3  ;;  %22 = vst.msk [vmem:[#allocation2 + $0x30] sm:$0xff] %vm15_vm0, %v4688_v3  ;;  %v131_v8 = vld [vmem:[%s8398_s0 + $0x38] sm:$0xff]  ;;  %v132_v9 = vld [vmem:[%s8398_s0 + $0x40] sm:$0xff] }
   0x5   :  { %23 = vst.msk [vmem:[#allocation2 + $0x38] sm:$0xff] %vm15_vm0, %v4688_v3  ;;  %24 = vst.msk [vmem:[#allocation2 + $0x40] sm:$0xff] %vm15_vm0, %v4688_v3  ;;  %v133_v10 = vld [vmem:[%s8398_s0 + $0x48] sm:$0xff]  ;;  %v134_v11 = vld [vmem:[%s8398_s0 + $0x50] sm:$0xff] }
   0x6   :  { %25 = vst.msk [vmem:[#allocation2 + $0x48] sm:$0xff] %vm15_vm0, %v4688_v3  ;;  %26 = vst.msk [vmem:[#allocation2 + $0x50] sm:$0xff] %vm15_vm0, %v4688_v3  ;;  %v135_v12 = vld [vmem:[%s8398_s0 + $0x58] sm:$0xff]  ;;  %v136_v13 = vld [vmem:[%s8398_s0 + $0x60] sm:$0xff] }
   0x7   :  { %27 = vst.msk [vmem:[#allocation2 + $0x58] sm:$0xff] %vm15_vm0, %v4688_v3  ;;  %28 = vst.msk [vmem:[#allocation2 + $0x60] sm:$0xff] %vm15_vm0, %v4688_v3  ;;  %v137_v14 = vld [vmem:[%s8398_s0 + $0x68] sm:$0xff]  ;;  %v138_v15 = vld [vmem:[%s8398_s0 + $0x70] sm:$0xff] }
   0x8   :  { %29 = vst.msk [vmem:[#allocation2 + $0x68] sm:$0xff] %vm15_vm0, %v4688_v3  ;;  %30 = vst.msk [vmem:[#allocation2 + $0x70] sm:$0xff] %vm15_vm0, %v4688_v3  ;;  %v139_v16 = vld [vmem:[%s8398_s0 + $0x78] sm:$0xff]  ;;  %v140_v17 = vld [vmem:[%s8398_s0 + $0x80] sm:$0xff] }
   0x9   :  { %31 = vst.msk [vmem:[#allocation2 + $0x78] sm:$0xff] %vm15_vm0, %v4688_v3  ;;  %32 = vst.msk [vmem:[#allocation2 + $0x80] sm:$0xff] %vm15_vm0, %v4688_v3  ;;  %v141_v18 = vld [vmem:[%s8398_s0 + $0x88] sm:$0xff]  ;;  %v142_v19 = vld [vmem:[%s8398_s0 + $0x90] sm:$0xff] }
   0xa   :  { %33 = vst.msk [vmem:[#allocation2 + $0x88] sm:$0xff] %vm15_vm0, %v4688_v3  ;;  %34 = vst.msk [vmem:[#allocation2 + $0x90] sm:$0xff] %vm15_vm0, %v4688_v3  ;;  %v143_v20 = vld [vmem:[%s8398_s0 + $0x98] sm:$0xff]  ;;  %v144_v21 = vld [vmem:[%s8398_s0 + $0xa0] sm:$0xff] }
   0xb   :  { %35 = vst.msk [vmem:[#allocation2 + $0x98] sm:$0xff] %vm15_vm0, %v4688_v3  ;;  %36 = vst.msk [vmem:[#allocation2 + $0xa0] sm:$0xff] %vm15_vm0, %v4688_v3  ;;  %v145_v22 = vld [vmem:[%s8398_s0 + $0xa8] sm:$0xff]  ;;  %v146_v23 = vld [vmem:[%s8398_s0 + $0xb0] sm:$0xff] }
   0xc   :  { %37 = vst.msk [vmem:[#allocation2 + $0xa8] sm:$0xff] %vm15_vm0, %v4688_v3  ;;  %38 = vst.msk [vmem:[#allocation2 + $0xb0] sm:$0xff] %vm15_vm0, %v4688_v3  ;;  %v147_v24 = vld [vmem:[%s8398_s0 + $0xb8] sm:$0xff]  ;;  %v287_v25 = vld [vmem:[#allocation2 + $0x1] sm:$0xff] }
   0xd   :  { %39 = vst.msk [vmem:[#allocation2 + $0xb8] sm:$0xff] %vm15_vm0, %v4688_v3  ;;  %40 = vst.msk [vmem:[#allocation2 + $0xc0] sm:$0xff] %vm15_vm0, %v4688_v3  ;;  %v148_v26 = vld [vmem:[%s8398_s0 + $0xc0] sm:$0xff]  ;;  %576 = vrot.lane.b32.xlu0 %v287_v25, %s4689_s8  ;;  %v288_v28 = vld [vmem:[#allocation2 + $0x9] sm:$0xff] }
   0xe   :  { %41 = vst.msk [vmem:[#allocation2 + $0xc8] sm:$0xff] %vm15_vm0, %v4688_v3  ;;  %42 = vst.msk [vmem:[#allocation2 + $0xd0] sm:$0xff] %vm15_vm0, %v4688_v3  ;;  %v149_v33 = vld [vmem:[%s8398_s0 + $0xc8] sm:$0xff]  ;;  %v150_v34 = vld [vmem:[%s8398_s0 + $0xd0] sm:$0xff] }
   0xf   :  { %43 = vst.msk [vmem:[#allocation2 + $0xd8] sm:$0xff] %vm15_vm0, %v4688_v3  ;;  %44 = vst.msk [vmem:[#allocation2 + $0xe0] sm:$0xff] %vm15_vm0, %v4688_v3  ;;  %v151_v35 = vld [vmem:[%s8398_s0 + $0xd8] sm:$0xff]  ;;  %v152_v36 = vld [vmem:[%s8398_s0 + $0xe0] sm:$0xff] }
  0x10   :  { %45 = vst.msk [vmem:[#allocation2 + $0xe8] sm:$0xff] %vm15_vm0, %v4688_v3  ;;  %46 = vst.msk [vmem:[#allocation2 + $0xf0] sm:$0xff] %vm15_vm0, %v4688_v3  ;;  %v153_v37 = vld [vmem:[%s8398_s0 + $0xe8] sm:$0xff] }
  0x11   :  { %47 = vst.msk [vmem:[#allocation2 + $0xf8] sm:$0xff] %vm15_vm0, %v4688_v3  ;;  %48 = vst.msk [vmem:[#allocation2 + $0x100] sm:$0xff] %vm15_vm0, %v4688_v3  ;;  %578 = vrot.lane.b32.xlu0 %v288_v28, %s4689_s8 }
  0x12   :  { %49 = vst.msk [vmem:[#allocation2 + $0x108] sm:$0xff] %vm15_vm0, %v4688_v3  ;;  %50 = vst.msk [vmem:[#allocation2 + $0x110] sm:$0xff] %vm15_vm0, %v4688_v3 }
  0x13   :  { %51 = vst.msk [vmem:[#allocation2 + $0x118] sm:$0xff] %vm15_vm0, %v4688_v3  ;;  %52 = vst.msk [vmem:[#allocation2 + $0x120] sm:$0xff] %vm15_vm0, %v4688_v3 }
  0x14   :  { %53 = vst.msk [vmem:[#allocation2 + $0x128] sm:$0xff] %vm15_vm0, %v4688_v3  ;;  %54 = vst.msk [vmem:[#allocation2 + $0x130] sm:$0xff] %vm15_vm0, %v4688_v3 }
  0x15   :  { %55 = vst.msk [vmem:[#allocation2 + $0x138] sm:$0xff] %vm15_vm0, %v4688_v3  ;;  %56 = vst.msk [vmem:[#allocation2 + $0x140] sm:$0xff] %vm15_vm0, %v4688_v3 }
  0x16   :  { %57 = vst.msk [vmem:[#allocation2 + $0x148] sm:$0xff] %vm15_vm0, %v4688_v3  ;;  %58 = vst.msk [vmem:[#allocation2 + $0x150] sm:$0xff] %vm15_vm0, %v4688_v3 }
  0x17   :  { %59 = vst.msk [vmem:[#allocation2 + $0x158] sm:$0xff] %vm15_vm0, %v4688_v3  ;;  %60 = vst.msk [vmem:[#allocation2 + $0x160] sm:$0xff] %vm15_vm0, %v4688_v3 }
  0x18   :  { %61 = vst.msk [vmem:[#allocation2 + $0x168] sm:$0xff] %vm15_vm0, %v4688_v3  ;;  %62 = vst.msk [vmem:[#allocation2 + $0x170] sm:$0xff] %vm15_vm0, %v4688_v3 }
  0x19   :  { %63 = vst.msk [vmem:[#allocation2 + $0x178] sm:$0xff] %vm15_vm0, %v4688_v3  ;;  %64 = vst.msk [vmem:[#allocation2 + $0x180] sm:$0xff] %vm15_vm0, %v4688_v3 }
  0x1a   :  { %65 = vst.msk [vmem:[#allocation2 + $0x188] sm:$0xff] %vm15_vm0, %v4688_v3  ;;  %66 = vst.msk [vmem:[#allocation2 + $0x190] sm:$0xff] %vm15_vm0, %v4688_v3 }
  0x1b   :  { %67 = vst.msk [vmem:[#allocation2 + $0x198] sm:$0xff] %vm15_vm0, %v4688_v3  ;;  %68 = vst.msk [vmem:[#allocation2 + $0x1a0] sm:$0xff] %vm15_vm0, %v4688_v3 }
  0x1c   :  { %69 = vst.msk [vmem:[#allocation2 + $0x1a8] sm:$0xff] %vm15_vm0, %v4688_v3  ;;  %70 = vst.msk [vmem:[#allocation2 + $0x1b0] sm:$0xff] %vm15_vm0, %v4688_v3 }
  0x1d   :  { %71 = vst.msk [vmem:[#allocation2 + $0x1b8] sm:$0xff] %vm15_vm0, %v4688_v3  ;;  %72 = vst.msk [vmem:[#allocation2 + $0x1c0] sm:$0xff] %vm15_vm0, %v4688_v3 }
  0x1e   :  { %73 = vst.msk [vmem:[#allocation2 + $0x1c8] sm:$0xff] %vm15_vm0, %v4688_v3  ;;  %74 = vst.msk [vmem:[#allocation2 + $0x1d0] sm:$0xff] %vm15_vm0, %v4688_v3 }
  0x1f   :  { %75 = vst.msk [vmem:[#allocation2 + $0x1d8] sm:$0xff] %vm15_vm0, %v4688_v3  ;;  %76 = vst.msk [vmem:[#allocation2 + $0x1e0] sm:$0xff] %vm15_vm0, %v4688_v3 }
  0x20   :  { %77 = vst.msk [vmem:[#allocation2 + $0x1e8] sm:$0xff] %vm15_vm0, %v4688_v3  ;;  %78 = vst.msk [vmem:[#allocation2 + $0x1f0] sm:$0xff] %vm15_vm0, %v4688_v3 }
  0x21   :  { %79 = vst.msk [vmem:[#allocation2 + $0x1f8] sm:$0xff] %vm15_vm0, %v4688_v3  ;;  %80 = vst.msk [vmem:[#allocation2 + $0x200] sm:$0xff] %vm15_vm0, %v4688_v3 }
  0x22   :  { %81 = vst.msk [vmem:[#allocation2 + $0x208] sm:$0xff] %vm15_vm0, %v4688_v3  ;;  %82 = vst.msk [vmem:[#allocation2 + $0x210] sm:$0xff] %vm15_vm0, %v4688_v3 }
  0x23   :  { %83 = vst.msk [vmem:[#allocation2 + $0x218] sm:$0xff] %vm15_vm0, %v4688_v3  ;;  %84 = vst.msk [vmem:[#allocation2 + $0x220] sm:$0xff] %vm15_vm0, %v4688_v3 }
  0x24   :  { %85 = vst.msk [vmem:[#allocation2 + $0x228] sm:$0xff] %vm15_vm0, %v4688_v3  ;;  %86 = vst.msk [vmem:[#allocation2 + $0x230] sm:$0xff] %vm15_vm0, %v4688_v3 }
  0x25   :  { %87 = vst.msk [vmem:[#allocation2 + $0x238] sm:$0xff] %vm15_vm0, %v4688_v3  ;;  %88 = vst.msk [vmem:[#allocation2 + $0x240] sm:$0xff] %vm15_vm0, %v4688_v3 }
  0x26   :  { %89 = vst.msk [vmem:[#allocation2 + $0x248] sm:$0xff] %vm15_vm0, %v4688_v3  ;;  %90 = vst.msk [vmem:[#allocation2 + $0x250] sm:$0xff] %vm15_vm0, %v4688_v3 }
  0x27   :  { %91 = vst.msk [vmem:[#allocation2 + $0x258] sm:$0xff] %vm15_vm0, %v4688_v3  ;;  %92 = vst.msk [vmem:[#allocation2 + $0x260] sm:$0xff] %vm15_vm0, %v4688_v3 }
  0x28   :  { %93 = vst.msk [vmem:[#allocation2 + $0x268] sm:$0xff] %vm15_vm0, %v4688_v3  ;;  %94 = vst.msk [vmem:[#allocation2 + $0x270] sm:$0xff] %vm15_vm0, %v4688_v3 }
  0x29   :  { %95 = vst.msk [vmem:[#allocation2 + $0x278] sm:$0xff] %vm15_vm0, %v4688_v3  ;;  %96 = vst.msk [vmem:[#allocation2 + $0x280] sm:$0xff] %vm15_vm0, %v4688_v3 }
  0x2a   :  { %97 = vst.msk [vmem:[#allocation2 + $0x288] sm:$0xff] %vm15_vm0, %v4688_v3  ;;  %98 = vst.msk [vmem:[#allocation2 + $0x290] sm:$0xff] %vm15_vm0, %v4688_v3 }
  0x2b   :  { %99 = vst.msk [vmem:[#allocation2 + $0x298] sm:$0xff] %vm15_vm0, %v4688_v3  ;;  %100 = vst.msk [vmem:[#allocation2 + $0x2a0] sm:$0xff] %vm15_vm0, %v4688_v3 }
  0x2c   :  { %101 = vst.msk [vmem:[#allocation2 + $0x2a8] sm:$0xff] %vm15_vm0, %v4688_v3  ;;  %102 = vst.msk [vmem:[#allocation2 + $0x2b0] sm:$0xff] %vm15_vm0, %v4688_v3 }
  0x2d   :  { %103 = vst.msk [vmem:[#allocation2 + $0x2b8] sm:$0xff] %vm15_vm0, %v4688_v3  ;;  %104 = vst.msk [vmem:[#allocation2 + $0x2c0] sm:$0xff] %vm15_vm0, %v4688_v3 }
  0x2e   :  { %105 = vst.msk [vmem:[#allocation2 + $0x2c8] sm:$0xff] %vm15_vm0, %v4688_v3  ;;  %106 = vst.msk [vmem:[#allocation2 + $0x2d0] sm:$0xff] %vm15_vm0, %v4688_v3 }
  0x2f   :  { %107 = vst.msk [vmem:[#allocation2 + $0x2d8] sm:$0xff] %vm15_vm0, %v4688_v3  ;;  %108 = vst.msk [vmem:[#allocation2 + $0x2e0] sm:$0xff] %vm15_vm0, %v4688_v3 }
  0x30   :  { %109 = vst.msk [vmem:[#allocation2 + $0x2e8] sm:$0xff] %vm15_vm0, %v4688_v3  ;;  %110 = vst.msk [vmem:[#allocation2 + $0x2f0] sm:$0xff] %vm15_vm0, %v4688_v3 }
  0x31   :  { %111 = vst.msk [vmem:[#allocation2 + $0x2f8] sm:$0xff] %vm15_vm0, %v4688_v3  ;;  %112 = vst.msk [vmem:[#allocation2 + $0x300] sm:$0xff] %vm15_vm0, %v4688_v3 }
  0x32   :  { %113 = vst.msk [vmem:[#allocation2 + $0x308] sm:$0xff] %vm15_vm0, %v4688_v3  ;;  %114 = vst.msk [vmem:[#allocation2 + $0x310] sm:$0xff] %vm15_vm0, %v4688_v3 }
  0x33   :  { %115 = vst.msk [vmem:[#allocation2 + $0x318] sm:$0xff] %vm15_vm0, %v4688_v3  ;;  %116 = vst.msk [vmem:[#allocation2 + $0x320] sm:$0xff] %vm15_vm0, %v4688_v3 }
  0x34   :  { %117 = vst.msk [vmem:[#allocation2 + $0x328] sm:$0xff] %vm15_vm0, %v4688_v3  ;;  %118 = vst.msk [vmem:[#allocation2 + $0x330] sm:$0xff] %vm15_vm0, %v4688_v3 }
  0x35   :  { %119 = vst.msk [vmem:[#allocation2 + $0x338] sm:$0xff] %vm15_vm0, %v4688_v3  ;;  %120 = vst.msk [vmem:[#allocation2 + $0x340] sm:$0xff] %vm15_vm0, %v4688_v3 }
  0x36   :  { %121 = vst.msk [vmem:[#allocation2 + $0x348] sm:$0xff] %vm15_vm0, %v4688_v3  ;;  %122 = vst.msk [vmem:[#allocation2 + $0x350] sm:$0xff] %vm15_vm0, %v4688_v3 }
  0x37   :  { %123 = vst.msk [vmem:[#allocation2 + $0x358] sm:$0xff] %vm15_vm0, %v4688_v3  ;;  %157 = vst.msk [vmem:[#allocation2 + $0x19] sm:$0xff] %vm15_vm0, %v4723_v0 }
  0x38   :  { %158 = vst.msk [vmem:[#allocation2 + $0x21] sm:$0xff] %vm15_vm0, %v4728_v1  ;;  %159 = vst.msk [vmem:[#allocation2 + $0x31] sm:$0xff] %vm15_vm0, %v4733_v2 }
  0x39   :  { %160 = vst.msk [vmem:[#allocation2 + $0x39] sm:$0xff] %vm15_vm0, %v127_v4  ;;  %161 = vst.msk [vmem:[#allocation2 + $0x49] sm:$0xff] %vm15_vm0, %v128_v5 }
  0x3a   :  { %162 = vst.msk [vmem:[#allocation2 + $0x51] sm:$0xff] %vm15_vm0, %v129_v6  ;;  %163 = vst.msk [vmem:[#allocation2 + $0x61] sm:$0xff] %vm15_vm0, %v130_v7 }
  0x3b   :  { %164 = vst.msk [vmem:[#allocation2 + $0x69] sm:$0xff] %vm15_vm0, %v131_v8  ;;  %165 = vst.msk [vmem:[#allocation2 + $0x79] sm:$0xff] %vm15_vm0, %v132_v9 }
  0x3c   :  { %166 = vst.msk [vmem:[#allocation2 + $0x81] sm:$0xff] %vm15_vm0, %v133_v10  ;;  %167 = vst.msk [vmem:[#allocation2 + $0x91] sm:$0xff] %vm15_vm0, %v134_v11 }
  0x3d   :  { %168 = vst.msk [vmem:[#allocation2 + $0x99] sm:$0xff] %vm15_vm0, %v135_v12  ;;  %169 = vst.msk [vmem:[#allocation2 + $0xa9] sm:$0xff] %vm15_vm0, %v136_v13 }
  0x3e   :  { %170 = vst.msk [vmem:[#allocation2 + $0xb1] sm:$0xff] %vm15_vm0, %v137_v14  ;;  %171 = vst.msk [vmem:[#allocation2 + $0xc1] sm:$0xff] %vm15_vm0, %v138_v15  ;;  %v5045_v27 = vld [vmem:[#allocation2 + $0x19] sm:$0xff] }
  0x3f   :  { %172 = vst.msk [vmem:[#allocation2 + $0xc9] sm:$0xff] %vm15_vm0, %v139_v16  ;;  %173 = vst.msk [vmem:[#allocation2 + $0xd9] sm:$0xff] %vm15_vm0, %v140_v17  ;;  %580 = vrot.lane.b32.xlu1 %v5045_v27, %s4689_s8  ;;  %v5050_v29 = vld [vmem:[#allocation2 + $0x21] sm:$0xff]  ;;  %v5055_v30 = vld [vmem:[#allocation2 + $0x31] sm:$0xff] }
  0x40   :  { %174 = vst.msk [vmem:[#allocation2 + $0xe1] sm:$0xff] %vm15_vm0, %v141_v18  ;;  %175 = vst.msk [vmem:[#allocation2 + $0xf1] sm:$0xff] %vm15_vm0, %v142_v19  ;;  %v5057_v31 = vld [vmem:[#allocation2 + $0x39] sm:$0xff]  ;;  %584 = vrot.lane.b32.xlu0 %v5055_v30, %s4689_s8  ;;  %v5061_v32 = vld [vmem:[#allocation2 + $0x49] sm:$0xff] }
  0x41   :  { %176 = vst.msk [vmem:[#allocation2 + $0xf9] sm:$0xff] %vm15_vm0, %v143_v20  ;;  %177 = vst.msk [vmem:[#allocation2 + $0x109] sm:$0xff] %vm15_vm0, %v144_v21  ;;  %v5082_v38 = vld [vmem:[#allocation2 + $0x51] sm:$0xff]  ;;  %v5091_v39 = vld [vmem:[#allocation2 + $0x61] sm:$0xff] }
  0x42   :  { %178 = vst.msk [vmem:[#allocation2 + $0x111] sm:$0xff] %vm15_vm0, %v145_v22  ;;  %179 = vst.msk [vmem:[#allocation2 + $0x121] sm:$0xff] %vm15_vm0, %v146_v23  ;;  %v5093_v40 = vld [vmem:[#allocation2 + $0x69] sm:$0xff]  ;;  %v5099_v41 = vld [vmem:[#allocation2 + $0x79] sm:$0xff] }
  0x43   :  { %180 = vst.msk [vmem:[#allocation2 + $0x129] sm:$0xff] %vm15_vm0, %v147_v24  ;;  %181 = vst.msk [vmem:[#allocation2 + $0x139] sm:$0xff] %vm15_vm0, %v148_v26  ;;  %582 = vrot.lane.b32.xlu1 %v5050_v29, %s4689_s8  ;;  %v5101_v42 = vld [vmem:[#allocation2 + $0x81] sm:$0xff]  ;;  %v5107_v43 = vld [vmem:[#allocation2 + $0x91] sm:$0xff] }
  0x44   :  { %182 = vst.msk [vmem:[#allocation2 + $0x141] sm:$0xff] %vm15_vm0, %v149_v33  ;;  %183 = vst.msk [vmem:[#allocation2 + $0x151] sm:$0xff] %vm15_vm0, %v150_v34  ;;  %588 = vrot.lane.b32.xlu0 %v5061_v32, %s4689_s8  ;;  %v5109_v44 = vld [vmem:[#allocation2 + $0x99] sm:$0xff]  ;;  %v5115_v45 = vld [vmem:[#allocation2 + $0xa9] sm:$0xff] }
  0x45   :  { %184 = vst.msk [vmem:[#allocation2 + $0x159] sm:$0xff] %vm15_vm0, %v151_v35  ;;  %185 = vst.msk [vmem:[#allocation2 + $0x169] sm:$0xff] %vm15_vm0, %v152_v36  ;;  %v5117_v46 = vld [vmem:[#allocation2 + $0xb1] sm:$0xff]  ;;  %v5123_v47 = vld [vmem:[#allocation2 + $0xc1] sm:$0xff] }
  0x46   :  { %186 = vst.msk [vmem:[#allocation2 + $0x171] sm:$0xff] %vm15_vm0, %v153_v37  ;;  %v5125_v48 = vld [vmem:[#allocation2 + $0xc9] sm:$0xff] }
  0x47   :  { %586 = vrot.lane.b32.xlu1 %v5057_v31, %s4689_s8 }
  0x48   :  { %592 = vrot.lane.b32.xlu0 %v5091_v39, %s4689_s8 }
  0x4b   :  { %590 = vrot.lane.b32.xlu1 %v5082_v38, %s4689_s8 }
  0x4c   :  { %596 = vrot.lane.b32.xlu0 %v5099_v41, %s4689_s8 }
  0x4f   :  { %594 = vrot.lane.b32.xlu1 %v5093_v40, %s4689_s8 }
  0x50   :  { %600 = vrot.lane.b32.xlu0 %v5107_v43, %s4689_s8 }
  0x53   :  { %598 = vrot.lane.b32.xlu1 %v5101_v42, %s4689_s8 }
  0x54   :  { %604 = vrot.lane.b32.xlu0 %v5115_v45, %s4689_s8 }
  0x57   :  { %602 = vrot.lane.b32.xlu1 %v5109_v44, %s4689_s8 }
  0x5b   :  { %606 = vrot.lane.b32.xlu1 %v5117_v46, %s4689_s8 }
  0x5c   :  { %10 = vsyncpa [#allocation6], 0  ;;  %608 = vrot.lane.b32.xlu0 %v5123_v47, %s4689_s8  ;;  %v5131_v49 = vld [vmem:[#allocation2 + $0xd9] sm:$0xff]  ;;  %v5133_v50 = vld [vmem:[#allocation2 + $0xe1] sm:$0xff]  ;;  %s4690_s23 = smov 16   ;;  %s4691_s24 = smov 24  }
  0x5d   :  { %v5139_v51 = vld [vmem:[#allocation2 + $0xf1] sm:$0xff]  ;;  %v5141_v52 = vld [vmem:[#allocation2 + $0xf9] sm:$0xff]  ;;  %v5147_v53 = vld [vmem:[#allocation2 + $0x109] sm:$0xff]  ;;  %s4692_s25 = smov 32   ;;  %s4693_s26 = smov 40   ;;  %vm1600_vm1 = vcmask 130048  }
  0x5e   :  { %v5149_v54 = vld [vmem:[#allocation2 + $0x111] sm:$0xff]  ;;  %v5155_v55 = vld [vmem:[#allocation2 + $0x121] sm:$0xff]  ;;  %v5157_v56 = vld [vmem:[#allocation2 + $0x129] sm:$0xff]  ;;  %s4694_s27 = smov 48   ;;  %s4695_s7 = smov 56   ;;  %vm1633_vm2 = vcmask 195584  }
  0x5f   :  { %610 = vrot.lane.b32.xlu1 %v5125_v48, %s4689_s8  ;;  %v5163_v57 = vld [vmem:[#allocation2 + $0x139] sm:$0xff]  ;;  %v5165_v58 = vld [vmem:[#allocation2 + $0x141] sm:$0xff]  ;;  %v154_v59 = vld [vmem:[%s8398_s0 + $0xf0] sm:$0xff]  ;;  %s4696_s4 = smov 64   ;;  %vm1666_vm3 = vcmask 261120   ;;  %vm1699_vm4 = vcmask 326656  }
  0x60   :  { %612 = vrot.lane.b32.xlu0 %v5131_v49, %s4689_s8  ;;  %187 = vst.msk [vmem:[#allocation2 + $0x181] sm:$0xff] %vm15_vm0, %v154_v59  ;;  %v155_v60 = vld [vmem:[%s8398_s0 + $0xf8] sm:$0xff]  ;;  %v5187_v63 = vld [vmem:[#allocation2 + $0x169] sm:$0xff]  ;;  %vm1732_vm5 = vcmask 392192   ;;  %vm1765_vm6 = vcmask 457728   ;;  %vm1798_vm7 = vcmask 523264  }
  0x61   :  { %v5178_v61 = vld [vmem:[#allocation2 + $0x151] sm:$0xff]  ;;  %188 = vst.msk [vmem:[#allocation2 + $0x189] sm:$0xff] %vm15_vm0, %v155_v60  ;;  %v5181_v62 = vld [vmem:[#allocation2 + $0x159] sm:$0xff]  ;;  %v319_v1 = vld [vmem:[#allocation2 + $0x2] sm:$0xff]  ;;  %vm1831_vm8 = vcmask 588800  }
  0x62   :  { %v5189_v0 = vld [vmem:[#allocation2 + $0x171] sm:$0xff]  ;;  %v5197_v3 = vld [vmem:[#allocation2 + $0x1a] sm:$0xff]  ;;  %v5199_v4 = vld [vmem:[#allocation2 + $0x22] sm:$0xff] }
  0x63   :  { %614 = vrot.lane.b32.xlu1 %v5133_v50, %s4689_s8  ;;  %v320_v2 = vld [vmem:[#allocation2 + $0xa] sm:$0xff]  ;;  %v5205_v5 = vld [vmem:[#allocation2 + $0x32] sm:$0xff]  ;;  %v5207_v6 = vld [vmem:[#allocation2 + $0x3a] sm:$0xff] }
  0x64   :  { %616 = vrot.lane.b32.xlu0 %v5139_v51, %s4689_s8  ;;  %v5213_v7 = vld [vmem:[#allocation2 + $0x4a] sm:$0xff]  ;;  %v5215_v8 = vld [vmem:[#allocation2 + $0x52] sm:$0xff]  ;;  %v5221_v9 = vld [vmem:[#allocation2 + $0x62] sm:$0xff] }
  0x65   :  { %v5223_v10 = vld [vmem:[#allocation2 + $0x6a] sm:$0xff]  ;;  %v5229_v11 = vld [vmem:[#allocation2 + $0x7a] sm:$0xff]  ;;  %v5231_v12 = vld [vmem:[#allocation2 + $0x82] sm:$0xff] }
  0x66   :  { %v5237_v13 = vld [vmem:[#allocation2 + $0x92] sm:$0xff]  ;;  %v5239_v14 = vld [vmem:[#allocation2 + $0x9a] sm:$0xff]  ;;  %v5245_v15 = vld [vmem:[#allocation2 + $0xaa] sm:$0xff] }
  0x67   :  { %618 = vrot.lane.b32.xlu1 %v5141_v52, %s4689_s8  ;;  %v5247_v16 = vld [vmem:[#allocation2 + $0xb2] sm:$0xff]  ;;  %v5253_v17 = vld [vmem:[#allocation2 + $0xc2] sm:$0xff]  ;;  %v5255_v18 = vld [vmem:[#allocation2 + $0xca] sm:$0xff] }
  0x68   :  { %620 = vrot.lane.b32.xlu0 %v5147_v53, %s4689_s8  ;;  %v5261_v19 = vld [vmem:[#allocation2 + $0xda] sm:$0xff]  ;;  %v5263_v20 = vld [vmem:[#allocation2 + $0xe2] sm:$0xff]  ;;  %v5269_v21 = vld [vmem:[#allocation2 + $0xf2] sm:$0xff] }
  0x69   :  { %v5271_v22 = vld [vmem:[#allocation2 + $0xfa] sm:$0xff]  ;;  %v5277_v23 = vld [vmem:[#allocation2 + $0x10a] sm:$0xff]  ;;  %v5279_v24 = vld [vmem:[#allocation2 + $0x112] sm:$0xff] }
  0x6a   :  { %v5285_v25 = vld [vmem:[#allocation2 + $0x122] sm:$0xff]  ;;  %v5287_v26 = vld [vmem:[#allocation2 + $0x12a] sm:$0xff]  ;;  %v5293_v28 = vld [vmem:[#allocation2 + $0x13a] sm:$0xff] }
  0x6b   :  { %622 = vrot.lane.b32.xlu1 %v5149_v54, %s4689_s8  ;;  %v5297_v34 = vld [vmem:[#allocation2 + $0x142] sm:$0xff]  ;;  %v5305_v36 = vld [vmem:[#allocation2 + $0x152] sm:$0xff]  ;;  %v5309_v59 = vld [vmem:[#allocation2 + $0x15a] sm:$0xff] }
  0x6c   :  { %624 = vrot.lane.b32.xlu0 %v5155_v55, %s4689_s8  ;;  %8442 = vst [vmem:[#allocation10_spill] sm:$0xff] %v5297_v34  ;;  %8444 = vst [vmem:[#allocation12_spill] sm:$0xff] %v5305_v36 }
  0x6d   :  { %8446 = vst [vmem:[#allocation14_spill] sm:$0xff] %v5309_v59 }
  0x6f   :  { %626 = vrot.lane.b32.xlu1 %v5157_v56, %s4689_s8 }
  0x70   :  { %628 = vrot.lane.b32.xlu0 %v5163_v57, %s4689_s8 }
  0x73   :  { %630 = vrot.lane.b32.xlu1 %v5165_v58, %s4689_s8 }
  0x74   :  { %632 = vrot.lane.b32.xlu0 %v5178_v61, %s4689_s8 }
  0x77   :  { %634 = vrot.lane.b32.xlu1 %v5181_v62, %s4689_s8 }
  0x78   :  { %636 = vrot.lane.b32.xlu0 %v5187_v63, %s4689_s8 }
  0x7b   :  { %638 = vrot.lane.b32.xlu1 %v5189_v0, %s4689_s8 }
  0x7c   :  { %704 = vrot.lane.b32.xlu0 %v319_v1, %s4690_s23  ;;  %v5317_v1 = vld [vmem:[#allocation2 + $0x16a] sm:$0xff] }
  0x7d   :  { %8448 = vst [vmem:[#allocation16_spill] sm:$0xff] %v5317_v1 }
  0x7f   :  { %706 = vrot.lane.b32.xlu1 %v320_v2, %s4690_s23  ;;  %v5295_v33 = vpop.permute.xlu0 %576 }
  0x80   :  { %708 = vrot.lane.b32.xlu0 %v5197_v3, %s4690_s23  ;;  %8441 = vst [vmem:[#allocation9_spill] sm:$0xff] %v5295_v33 }
  0x83   :  { %710 = vrot.lane.b32.xlu1 %v5199_v4, %s4690_s23  ;;  %v5307_v37 = vpop.permute.xlu0 %578 }
  0x84   :  { %712 = vrot.lane.b32.xlu0 %v5205_v5, %s4690_s23  ;;  %8445 = vst [vmem:[#allocation13_spill] sm:$0xff] %v5307_v37  ;;  %v257_v37 = vld [vmem:[#allocation2 + $0x18] sm:$0xff] }
  0x87   :  { %714 = vrot.lane.b32.xlu1 %v5207_v6, %s4690_s23 }
  0x88   :  { %716 = vrot.lane.b32.xlu0 %v5213_v7, %s4690_s23 }
  0x8b   :  { %718 = vrot.lane.b32.xlu1 %v5215_v8, %s4690_s23 }
  0x8c   :  { %720 = vrot.lane.b32.xlu0 %v5221_v9, %s4690_s23 }
  0x8f   :  { %722 = vrot.lane.b32.xlu1 %v5223_v10, %s4690_s23 }
  0x90   :  { %724 = vrot.lane.b32.xlu0 %v5229_v11, %s4690_s23 }
  0x93   :  { %726 = vrot.lane.b32.xlu1 %v5231_v12, %s4690_s23 }
  0x94   :  { %728 = vrot.lane.b32.xlu0 %v5237_v13, %s4690_s23 }
  0x97   :  { %730 = vrot.lane.b32.xlu1 %v5239_v14, %s4690_s23 }
  0x98   :  { %732 = vrot.lane.b32.xlu0 %v5245_v15, %s4690_s23 }
  0x9b   :  { %734 = vrot.lane.b32.xlu1 %v5247_v16, %s4690_s23 }
  0x9c   :  { %736 = vrot.lane.b32.xlu0 %v5253_v17, %s4690_s23 }
  0x9f   :  { %738 = vrot.lane.b32.xlu1 %v5255_v18, %s4690_s23 }
  0xa0   :  { %740 = vrot.lane.b32.xlu0 %v5261_v19, %s4690_s23 }
  0xa3   :  { %742 = vrot.lane.b32.xlu1 %v5263_v20, %s4690_s23 }
  0xa4   :  { %744 = vrot.lane.b32.xlu0 %v5269_v21, %s4690_s23 }
  0xa7   :  { %746 = vrot.lane.b32.xlu1 %v5271_v22, %s4690_s23 }
  0xa8   :  { %748 = vrot.lane.b32.xlu0 %v5277_v23, %s4690_s23 }
  0xab   :  { %750 = vrot.lane.b32.xlu1 %v5279_v24, %s4690_s23 }
  0xac   :  { %752 = vrot.lane.b32.xlu0 %v5285_v25, %s4690_s23 }
  0xaf   :  { %754 = vrot.lane.b32.xlu1 %v5287_v26, %s4690_s23 }
  0xb0   :  { %756 = vrot.lane.b32.xlu0 %v5293_v28, %s4690_s23 }
  0xb1   :  { %v5299_v35 = vpop.permute.xlu1 %580 }
  0xb2   :  { %8443 = vst [vmem:[#allocation11_spill] sm:$0xff] %v5299_v35  ;;  %v5319_v2 = vpop.permute.xlu0 %584  ;;  %v5321_v35 = vld [vmem:[#allocation2 + $0x172] sm:$0xff] }
  0xb3   :  { %758 = vrot.lane.b32.xlu1 %v5297_v34, %s4690_s23  ;;  %8449 = vst [vmem:[#allocation17_spill] sm:$0xff] %v5319_v2 }
  0xb4   :  { %760 = vrot.lane.b32.xlu0 %v5305_v36, %s4690_s23 }
  0xb5   :  { %v5311_v60 = vpop.permute.xlu1 %582 }
  0xb6   :  { %8447 = vst [vmem:[#allocation15_spill] sm:$0xff] %v5311_v60  ;;  %v5329_v60 = vpop.permute.xlu0 %588 }
  0xb7   :  { %762 = vrot.lane.b32.xlu1 %v5309_v59, %s4690_s23  ;;  %8451 = vst [vmem:[#allocation19_spill] sm:$0xff] %v5329_v60  ;;  %v258_v59 = vld [vmem:[#allocation2 + $0x20] sm:$0xff]  ;;  %v5349_v60 = vld [vmem:[#allocation2 + $0x48] sm:$0xff] }
  0xb8   :  { %764 = vrot.lane.b32.xlu0 %v5317_v1, %s4690_s23  ;;  %v5341_v1 = vld [vmem:[#allocation2 + $0x38] sm:$0xff]  ;;  %8458 = vst [vmem:[#allocation26_spill] sm:$0xff] %v5349_v60 }
  0xb9   :  { %v5323_v33 = vpop.permute.xlu1 %586  ;;  %8456 = vst [vmem:[#allocation24_spill] sm:$0xff] %v5341_v1 }
  0xba   :  { %8450 = vst [vmem:[#allocation18_spill] sm:$0xff] %v5323_v33  ;;  %v5335_v2 = vpop.permute.xlu0 %592  ;;  %v5337_v33 = vld [vmem:[#allocation2 + $0x30] sm:$0xff] }
  0xbb   :  { %766 = vrot.lane.b32.xlu1 %v5321_v35, %s4690_s23  ;;  %8453 = vst [vmem:[#allocation21_spill] sm:$0xff] %v5335_v2  ;;  %8454 = vst [vmem:[#allocation22_spill] sm:$0xff] %v5337_v33  ;;  %v5361_v2 = vld [vmem:[#allocation2 + $0x60] sm:$0xff] }
  0xbc   :  { %832 = vrot.lane.b32.xlu0 %v257_v37, %s4691_s24  ;;  %8462 = vst [vmem:[#allocation30_spill] sm:$0xff] %v5361_v2 }
  0xbd   :  { %v5331_v36 = vpop.permute.xlu1 %590 }
  0xbe   :  { %8452 = vst [vmem:[#allocation20_spill] sm:$0xff] %v5331_v36  ;;  %v5347_v36 = vpop.permute.xlu0 %596 }
  0xbf   :  { %834 = vrot.lane.b32.xlu1 %v258_v59, %s4691_s24  ;;  %8457 = vst [vmem:[#allocation25_spill] sm:$0xff] %v5347_v36  ;;  %v5353_v59 = vld [vmem:[#allocation2 + $0x50] sm:$0xff]  ;;  %v5373_v36 = vld [vmem:[#allocation2 + $0x78] sm:$0xff] }
  0xc0   :  { %836 = vrot.lane.b32.xlu0 %v5337_v33, %s4691_s24  ;;  %8460 = vst [vmem:[#allocation28_spill] sm:$0xff] %v5353_v59  ;;  %8466 = vst [vmem:[#allocation34_spill] sm:$0xff] %v5373_v36 }
  0xc1   :  { %v5339_v34 = vpop.permute.xlu1 %594 }
  0xc2   :  { %8455 = vst [vmem:[#allocation23_spill] sm:$0xff] %v5339_v34  ;;  %v5359_v34 = vpop.permute.xlu0 %600 }
  0xc3   :  { %838 = vrot.lane.b32.xlu1 %v5341_v1, %s4691_s24  ;;  %8461 = vst [vmem:[#allocation29_spill] sm:$0xff] %v5359_v34  ;;  %v5365_v1 = vld [vmem:[#allocation2 + $0x68] sm:$0xff]  ;;  %v5385_v34 = vld [vmem:[#allocation2 + $0x90] sm:$0xff] }
  0xc4   :  { %840 = vrot.lane.b32.xlu0 %v5349_v60, %s4691_s24  ;;  %8464 = vst [vmem:[#allocation32_spill] sm:$0xff] %v5365_v1  ;;  %8470 = vst [vmem:[#allocation38_spill] sm:$0xff] %v5385_v34 }
  0xc5   :  { %v5351_v37 = vpop.permute.xlu1 %598 }
  0xc6   :  { %8459 = vst [vmem:[#allocation27_spill] sm:$0xff] %v5351_v37  ;;  %v5371_v37 = vpop.permute.xlu0 %604 }
  0xc7   :  { %842 = vrot.lane.b32.xlu1 %v5353_v59, %s4691_s24  ;;  %8465 = vst [vmem:[#allocation33_spill] sm:$0xff] %v5371_v37  ;;  %v5377_v59 = vld [vmem:[#allocation2 + $0x80] sm:$0xff]  ;;  %v5397_v37 = vld [vmem:[#allocation2 + $0xa8] sm:$0xff] }
  0xc8   :  { %844 = vrot.lane.b32.xlu0 %v5361_v2, %s4691_s24  ;;  %8468 = vst [vmem:[#allocation36_spill] sm:$0xff] %v5377_v59  ;;  %8474 = vst [vmem:[#allocation42_spill] sm:$0xff] %v5397_v37 }
  0xc9   :  { %v5363_v33 = vpop.permute.xlu1 %602 }
  0xca   :  { %8463 = vst [vmem:[#allocation31_spill] sm:$0xff] %v5363_v33 }
  0xcb   :  { %846 = vrot.lane.b32.xlu1 %v5365_v1, %s4691_s24  ;;  %v5389_v1 = vld [vmem:[#allocation2 + $0x98] sm:$0xff] }
  0xcc   :  { %848 = vrot.lane.b32.xlu0 %v5373_v36, %s4691_s24  ;;  %8472 = vst [vmem:[#allocation40_spill] sm:$0xff] %v5389_v1 }
  0xcd   :  { %v5375_v60 = vpop.permute.xlu1 %606 }
  0xce   :  { %8467 = vst [vmem:[#allocation35_spill] sm:$0xff] %v5375_v60  ;;  %v5383_v33 = vpop.permute.xlu0 %608 }
  0xcf   :  { %850 = vrot.lane.b32.xlu1 %v5377_v59, %s4691_s24  ;;  %8469 = vst [vmem:[#allocation37_spill] sm:$0xff] %v5383_v33  ;;  %v5401_v59 = vld [vmem:[#allocation2 + $0xb0] sm:$0xff]  ;;  %v5409_v33 = vld [vmem:[#allocation2 + $0xc0] sm:$0xff] }
  0xd0   :  { %852 = vrot.lane.b32.xlu0 %v5385_v34, %s4691_s24  ;;  %8476 = vst [vmem:[#allocation44_spill] sm:$0xff] %v5401_v59  ;;  %8478 = vst [vmem:[#allocation46_spill] sm:$0xff] %v5409_v33 }
  0xd1   :  { %v5387_v2 = vpop.permute.xlu1 %610 }
  0xd2   :  { %8471 = vst [vmem:[#allocation39_spill] sm:$0xff] %v5387_v2  ;;  %v5395_v60 = vpop.permute.xlu0 %612 }
  0xd3   :  { %854 = vrot.lane.b32.xlu1 %v5389_v1, %s4691_s24  ;;  %8473 = vst [vmem:[#allocation41_spill] sm:$0xff] %v5395_v60  ;;  %v5413_v1 = vld [vmem:[#allocation2 + $0xc8] sm:$0xff]  ;;  %v5421_v60 = vld [vmem:[#allocation2 + $0xd8] sm:$0xff] }
  0xd4   :  { %856 = vrot.lane.b32.xlu0 %v5397_v37, %s4691_s24  ;;  %8480 = vst [vmem:[#allocation48_spill] sm:$0xff] %v5413_v1  ;;  %8482 = vst [vmem:[#allocation50_spill] sm:$0xff] %v5421_v60 }
  0xd5   :  { %v5399_v36 = vpop.permute.xlu1 %614 }
  0xd6   :  { %8475 = vst [vmem:[#allocation43_spill] sm:$0xff] %v5399_v36  ;;  %v5407_v2 = vpop.permute.xlu0 %616 }
  0xd7   :  { %858 = vrot.lane.b32.xlu1 %v5401_v59, %s4691_s24  ;;  %8477 = vst [vmem:[#allocation45_spill] sm:$0xff] %v5407_v2  ;;  %v5425_v59 = vld [vmem:[#allocation2 + $0xe0] sm:$0xff]  ;;  %v5433_v2 = vld [vmem:[#allocation2 + $0xf0] sm:$0xff] }
  0xd8   :  { %860 = vrot.lane.b32.xlu0 %v5409_v33, %s4691_s24  ;;  %8484 = vst [vmem:[#allocation52_spill] sm:$0xff] %v5425_v59  ;;  %8486 = vst [vmem:[#allocation54_spill] sm:$0xff] %v5433_v2 }
  0xd9   :  { %v5411_v34 = vpop.permute.xlu1 %618 }
  0xda   :  { %8479 = vst [vmem:[#allocation47_spill] sm:$0xff] %v5411_v34  ;;  %v5419_v36 = vpop.permute.xlu0 %620 }
  0xdb   :  { %862 = vrot.lane.b32.xlu1 %v5413_v1, %s4691_s24  ;;  %8481 = vst [vmem:[#allocation49_spill] sm:$0xff] %v5419_v36  ;;  %v5437_v1 = vld [vmem:[#allocation2 + $0xf8] sm:$0xff]  ;;  %v5445_v36 = vld [vmem:[#allocation2 + $0x108] sm:$0xff] }
  0xdc   :  { %864 = vrot.lane.b32.xlu0 %v5421_v60, %s4691_s24  ;;  %8488 = vst [vmem:[#allocation56_spill] sm:$0xff] %v5437_v1  ;;  %8490 = vst [vmem:[#allocation58_spill] sm:$0xff] %v5445_v36 }
  0xdd   :  { %v5423_v37 = vpop.permute.xlu1 %622 }
  0xde   :  { %8483 = vst [vmem:[#allocation51_spill] sm:$0xff] %v5423_v37  ;;  %v5431_v34 = vpop.permute.xlu0 %624 }
  0xdf   :  { %866 = vrot.lane.b32.xlu1 %v5425_v59, %s4691_s24  ;;  %8485 = vst [vmem:[#allocation53_spill] sm:$0xff] %v5431_v34  ;;  %v5449_v59 = vld [vmem:[#allocation2 + $0x110] sm:$0xff]  ;;  %v5457_v34 = vld [vmem:[#allocation2 + $0x120] sm:$0xff] }
  0xe0   :  { %868 = vrot.lane.b32.xlu0 %v5433_v2, %s4691_s24  ;;  %8492 = vst [vmem:[#allocation60_spill] sm:$0xff] %v5449_v59  ;;  %8494 = vst [vmem:[#allocation62_spill] sm:$0xff] %v5457_v34 }
  0xe1   :  { %v5435_v33 = vpop.permute.xlu1 %626 }
  0xe2   :  { %8487 = vst [vmem:[#allocation55_spill] sm:$0xff] %v5435_v33  ;;  %v5443_v37 = vpop.permute.xlu0 %628 }
  0xe3   :  { %870 = vrot.lane.b32.xlu1 %v5437_v1, %s4691_s24  ;;  %8489 = vst [vmem:[#allocation57_spill] sm:$0xff] %v5443_v37  ;;  %v5461_v1 = vld [vmem:[#allocation2 + $0x128] sm:$0xff]  ;;  %v5469_v37 = vld [vmem:[#allocation2 + $0x138] sm:$0xff] }
  0xe4   :  { %872 = vrot.lane.b32.xlu0 %v5445_v36, %s4691_s24  ;;  %8496 = vst [vmem:[#allocation64_spill] sm:$0xff] %v5461_v1  ;;  %8498 = vst [vmem:[#allocation66_spill] sm:$0xff] %v5469_v37 }
  0xe5   :  { %v5447_v60 = vpop.permute.xlu1 %630 }
  0xe6   :  { %8491 = vst [vmem:[#allocation59_spill] sm:$0xff] %v5447_v60  ;;  %v5455_v33 = vpop.permute.xlu0 %632 }
  0xe7   :  { %874 = vrot.lane.b32.xlu1 %v5449_v59, %s4691_s24  ;;  %8493 = vst [vmem:[#allocation61_spill] sm:$0xff] %v5455_v33  ;;  %v5473_v59 = vld [vmem:[#allocation2 + $0x140] sm:$0xff]  ;;  %v5481_v33 = vld [vmem:[#allocation2 + $0x150] sm:$0xff] }
  0xe8   :  { %876 = vrot.lane.b32.xlu0 %v5457_v34, %s4691_s24  ;;  %8500 = vst [vmem:[#allocation68_spill] sm:$0xff] %v5473_v59  ;;  %8502 = vst [vmem:[#allocation70_spill] sm:$0xff] %v5481_v33 }
  0xe9   :  { %v5459_v2 = vpop.permute.xlu1 %634 }
  0xea   :  { %8495 = vst [vmem:[#allocation63_spill] sm:$0xff] %v5459_v2  ;;  %v5467_v60 = vpop.permute.xlu0 %636 }
  0xeb   :  { %878 = vrot.lane.b32.xlu1 %v5461_v1, %s4691_s24  ;;  %8497 = vst [vmem:[#allocation65_spill] sm:$0xff] %v5467_v60  ;;  %v5485_v1 = vld [vmem:[#allocation2 + $0x158] sm:$0xff]  ;;  %v5493_v60 = vld [vmem:[#allocation2 + $0x168] sm:$0xff] }
  0xec   :  { %880 = vrot.lane.b32.xlu0 %v5469_v37, %s4691_s24  ;;  %8504 = vst [vmem:[#allocation72_spill] sm:$0xff] %v5485_v1 }
  0xed   :  { %v5471_v36 = vpop.permute.xlu1 %638 }
  0xee   :  { %8499 = vst [vmem:[#allocation67_spill] sm:$0xff] %v5471_v36  ;;  %v5479_v2 = vpop.permute.xlu0 %704 }
  0xef   :  { %882 = vrot.lane.b32.xlu1 %v5473_v59, %s4691_s24  ;;  %8501 = vst [vmem:[#allocation69_spill] sm:$0xff] %v5479_v2  ;;  %v5497_v59 = vld [vmem:[#allocation2 + $0x170] sm:$0xff] }
  0xf0   :  { %884 = vrot.lane.b32.xlu0 %v5481_v33, %s4691_s24  ;;  %v5507_v33 = vld [vmem:[#allocation2 + $0x188] sm:$0xff] }
  0xf1   :  { %v5483_v34 = vpop.permute.xlu1 %706 }
  0xf2   :  { %8503 = vst [vmem:[#allocation71_spill] sm:$0xff] %v5483_v34  ;;  %v5491_v36 = vpop.permute.xlu0 %708  ;;  %v5503_v34 = vld [vmem:[#allocation2 + $0x180] sm:$0xff] }
  0xf3   :  { %886 = vrot.lane.b32.xlu1 %v5485_v1, %s4691_s24  ;;  %8505 = vst [vmem:[#allocation73_spill] sm:$0xff] %v5491_v36 }
  0xf4   :  { %888 = vrot.lane.b32.xlu0 %v5493_v60, %s4691_s24 }
  0xf5   :  { %v5495_v37 = vpop.permute.xlu1 %710 }
  0xf6   :  { %8506 = vst [vmem:[#allocation74_spill] sm:$0xff] %v5495_v37  ;;  %v5505_v2 = vpop.permute.xlu0 %712 }
  0xf7   :  { %890 = vrot.lane.b32.xlu1 %v5497_v59, %s4691_s24  ;;  %8507 = vst [vmem:[#allocation75_spill] sm:$0xff] %v5505_v2 }
  0xf8   :  { %892 = vrot.lane.b32.xlu0 %v5503_v34, %s4691_s24 }
  0xf9   :  { %v5509_v1 = vpop.permute.xlu1 %714 }
  0xfa   :  { %8508 = vst [vmem:[#allocation76_spill] sm:$0xff] %v5509_v1  ;;  %v5515_v37 = vpop.permute.xlu0 %716 }
  0xfb   :  { %894 = vrot.lane.b32.xlu1 %v5507_v33, %s4691_s24  ;;  %8509 = vst [vmem:[#allocation77_spill] sm:$0xff] %v5515_v37 }
  0xfc   :  { %960 = vrot.lane.b32.xlu0 %v5045_v27, %s4692_s25 }
  0xfd   :  { %v5517_v36 = vpop.permute.xlu1 %718 }
  0xfe   :  { %8510 = vst [vmem:[#allocation78_spill] sm:$0xff] %v5517_v36  ;;  %v5523_v2 = vpop.permute.xlu0 %720 }
  0xff   :  { %962 = vrot.lane.b32.xlu1 %v5050_v29, %s4692_s25 }
 0x100   :  { %964 = vrot.lane.b32.xlu0 %v5055_v30, %s4692_s25 }
 0x101   :  { %v5525_v1 = vpop.permute.xlu1 %722 }
 0x102   :  { %v5531_v37 = vpop.permute.xlu0 %724 }
 0x103   :  { %966 = vrot.lane.b32.xlu1 %v5057_v31, %s4692_s25  ;;  %8511 = vst [vmem:[#allocation79_spill] sm:$0xff] %v5531_v37 }
 0x104   :  { %968 = vrot.lane.b32.xlu0 %v5061_v32, %s4692_s25 }
 0x105   :  { %v5533_v36 = vpop.permute.xlu1 %726 }
 0x106   :  { %8512 = vst [vmem:[#allocation80_spill] sm:$0xff] %v5533_v36  ;;  %v5539_v27 = vpop.permute.xlu0 %728 }
 0x107   :  { %970 = vrot.lane.b32.xlu1 %v5082_v38, %s4692_s25  ;;  %8513 = vst [vmem:[#allocation81_spill] sm:$0xff] %v5539_v27 }
 0x108   :  { %972 = vrot.lane.b32.xlu0 %v5091_v39, %s4692_s25 }
 0x109   :  { %v5541_v29 = vpop.permute.xlu1 %730 }
 0x10a   :  { %8514 = vst [vmem:[#allocation82_spill] sm:$0xff] %v5541_v29  ;;  %v5547_v30 = vpop.permute.xlu0 %732  ;;  %v521_v29 = vld [vmem:[#allocation2 + $0x9a] sm:$0xff] }
 0x10b   :  { %974 = vrot.lane.b32.xlu1 %v5093_v40, %s4692_s25  ;;  %8515 = vst [vmem:[#allocation83_spill] sm:$0xff] %v5547_v30  ;;  %v515_v30 = vld [vmem:[#allocation2 + $0x52] sm:$0xff] }
 0x10c   :  { %976 = vrot.lane.b32.xlu0 %v5099_v41, %s4692_s25 }
 0x10d   :  { %v5549_v31 = vpop.permute.xlu1 %734 }
 0x10e   :  { %8516 = vst [vmem:[#allocation84_spill] sm:$0xff] %v5549_v31  ;;  %v5555_v32 = vpop.permute.xlu0 %736  ;;  %v3469_v31 = vld [vmem:[%s8399_s1 + $0x18] sm:$0xff] }
 0x10f   :  { %978 = vrot.lane.b32.xlu1 %v5101_v42, %s4692_s25  ;;  %8517 = vst [vmem:[#allocation85_spill] sm:$0xff] %v5555_v32 }
 0x110   :  { %980 = vrot.lane.b32.xlu0 %v5107_v43, %s4692_s25 }
 0x111   :  { %v5557_v38 = vpop.permute.xlu1 %738 }
 0x112   :  { %8518 = vst [vmem:[#allocation86_spill] sm:$0xff] %v5557_v38  ;;  %v5563_v39 = vpop.permute.xlu0 %740 }
 0x113   :  { %982 = vrot.lane.b32.xlu1 %v5109_v44, %s4692_s25  ;;  %8519 = vst [vmem:[#allocation87_spill] sm:$0xff] %v5563_v39 }
 0x114   :  { %984 = vrot.lane.b32.xlu0 %v5115_v45, %s4692_s25 }
 0x115   :  { %v5565_v40 = vpop.permute.xlu1 %742 }
 0x116   :  { %8520 = vst [vmem:[#allocation88_spill] sm:$0xff] %v5565_v40  ;;  %v5571_v41 = vpop.permute.xlu0 %744  ;;  %v8589_v40 = vld [vmem:[#allocation50_spill] sm:$0xff] }
 0x117   :  { %986 = vrot.lane.b32.xlu1 %v5117_v46, %s4692_s25  ;;  %8521 = vst [vmem:[#allocation89_spill] sm:$0xff] %v5571_v41 }
 0x118   :  { %988 = vrot.lane.b32.xlu0 %v5123_v47, %s4692_s25 }
 0x119   :  { %v5573_v42 = vpop.permute.xlu1 %746 }
 0x11a   :  { %8522 = vst [vmem:[#allocation90_spill] sm:$0xff] %v5573_v42  ;;  %v5579_v43 = vpop.permute.xlu0 %748  ;;  %v8581_v42 = vld [vmem:[#allocation42_spill] sm:$0xff] }
 0x11b   :  { %990 = vrot.lane.b32.xlu1 %v5125_v48, %s4692_s25  ;;  %8523 = vst [vmem:[#allocation91_spill] sm:$0xff] %v5579_v43 }
 0x11c   :  { %992 = vrot.lane.b32.xlu0 %v5131_v49, %s4692_s25 }
 0x11d   :  { %v5581_v44 = vpop.permute.xlu1 %750 }
 0x11e   :  { %8524 = vst [vmem:[#allocation92_spill] sm:$0xff] %v5581_v44  ;;  %v5587_v45 = vpop.permute.xlu0 %752  ;;  %v8573_v44 = vld [vmem:[#allocation34_spill] sm:$0xff] }
 0x11f   :  { %994 = vrot.lane.b32.xlu1 %v5133_v50, %s4692_s25  ;;  %8525 = vst [vmem:[#allocation93_spill] sm:$0xff] %v5587_v45 }
 0x120   :  { %996 = vrot.lane.b32.xlu0 %v5139_v51, %s4692_s25 }
 0x121   :  { %v5589_v46 = vpop.permute.xlu1 %754 }
 0x122   :  { %8526 = vst [vmem:[#allocation94_spill] sm:$0xff] %v5589_v46  ;;  %v5595_v47 = vpop.permute.xlu0 %756 }
 0x123   :  { %998 = vrot.lane.b32.xlu1 %v5141_v52, %s4692_s25  ;;  %8527 = vst [vmem:[#allocation95_spill] sm:$0xff] %v5595_v47 }
 0x124   :  { %1000 = vrot.lane.b32.xlu0 %v5147_v53, %s4692_s25 }
 0x125   :  { %v5597_v48 = vpop.permute.xlu1 %758 }
 0x126   :  { %8528 = vst [vmem:[#allocation96_spill] sm:$0xff] %v5597_v48  ;;  %v5603_v49 = vpop.permute.xlu0 %760 }
 0x127   :  { %1002 = vrot.lane.b32.xlu1 %v5149_v54, %s4692_s25  ;;  %8529 = vst [vmem:[#allocation97_spill] sm:$0xff] %v5603_v49 }
 0x128   :  { %1004 = vrot.lane.b32.xlu0 %v5155_v55, %s4692_s25 }
 0x129   :  { %v5605_v50 = vpop.permute.xlu1 %762 }
 0x12a   :  { %8530 = vst [vmem:[#allocation98_spill] sm:$0xff] %v5605_v50  ;;  %v5611_v51 = vpop.permute.xlu0 %764 }
 0x12b   :  { %1006 = vrot.lane.b32.xlu1 %v5157_v56, %s4692_s25  ;;  %8531 = vst [vmem:[#allocation99_spill] sm:$0xff] %v5611_v51 }
 0x12c   :  { %1008 = vrot.lane.b32.xlu0 %v5163_v57, %s4692_s25  ;;  %v5635_v57 = vld [vmem:[#allocation2 + $0x181] sm:$0xff] }
 0x12d   :  { %v5613_v52 = vpop.permute.xlu1 %766 }
 0x12e   :  { %8532 = vst [vmem:[#allocation100_spill] sm:$0xff] %v5613_v52  ;;  %v5619_v53 = vpop.permute.xlu0 %832  ;;  %v5639_v52 = vld [vmem:[#allocation2 + $0x189] sm:$0xff] }
 0x12f   :  { %1010 = vrot.lane.b32.xlu1 %v5165_v58, %s4692_s25 }
 0x130   :  { %1012 = vrot.lane.b32.xlu0 %v5178_v61, %s4692_s25 }
 0x131   :  { %v5621_v54 = vpop.permute.xlu1 %834 }
 0x132   :  { %v5627_v55 = vpop.permute.xlu0 %836 }
 0x133   :  { %1014 = vrot.lane.b32.xlu1 %v5181_v62, %s4692_s25 }
 0x134   :  { %1016 = vrot.lane.b32.xlu0 %v5187_v63, %s4692_s25 }
 0x135   :  { %v5629_v56 = vpop.permute.xlu1 %838 }
 0x136   :  { %v5637_v58 = vpop.permute.xlu0 %840 }
 0x137   :  { %1018 = vrot.lane.b32.xlu1 %v5189_v0, %s4692_s25 }
 0x138   :  { %1020 = vrot.lane.b32.xlu0 %v5635_v57, %s4692_s25 }
 0x139   :  { %v5641_v61 = vpop.permute.xlu1 %842 }
 0x13a   :  { %v5647_v62 = vpop.permute.xlu0 %844 }
 0x13b   :  { %1022 = vrot.lane.b32.xlu1 %v5639_v52, %s4692_s25 }
 0x13c   :  { %1088 = vrot.lane.b32.xlu0 %v5197_v3, %s4693_s26 }
 0x13d   :  { %v5649_v63 = vpop.permute.xlu1 %846 }
 0x13e   :  { %v5655_v0 = vpop.permute.xlu0 %848 }
 0x13f   :  { %1090 = vrot.lane.b32.xlu1 %v5199_v4, %s4693_s26  ;;  %8533 = vst [vmem:[#allocation101_spill] sm:$0xff] %v5655_v0 }
 0x140   :  { %1092 = vrot.lane.b32.xlu0 %v5205_v5, %s4693_s26 }
 0x141   :  { %v5657_v51 = vpop.permute.xlu1 %850 }
 0x142   :  { %8534 = vst [vmem:[#allocation102_spill] sm:$0xff] %v5657_v51  ;;  %v5663_v50 = vpop.permute.xlu0 %852  ;;  %v4605_v51 = vld [vmem:[#allocation2 + $0x78] sm:$0xff] }
 0x143   :  { %1094 = vrot.lane.b32.xlu1 %v5207_v6, %s4693_s26  ;;  %8535 = vst [vmem:[#allocation103_spill] sm:$0xff] %v5663_v50  ;;  %v8683_v50 = vld [vmem:[#allocation15_spill] sm:$0xff] }
 0x144   :  { %1096 = vrot.lane.b32.xlu0 %v5213_v7, %s4693_s26 }
 0x145   :  { %v5665_v49 = vpop.permute.xlu1 %854 }
 0x146   :  { %8536 = vst [vmem:[#allocation104_spill] sm:$0xff] %v5665_v49  ;;  %v5671_v3 = vpop.permute.xlu0 %856 }
 0x147   :  { %1098 = vrot.lane.b32.xlu1 %v5215_v8, %s4693_s26  ;;  %8537 = vst [vmem:[#allocation105_spill] sm:$0xff] %v5671_v3 }
 0x148   :  { %1100 = vrot.lane.b32.xlu0 %v5221_v9, %s4693_s26 }
 0x149   :  { %v5673_v4 = vpop.permute.xlu1 %858 }
 0x14a   :  { %8538 = vst [vmem:[#allocation106_spill] sm:$0xff] %v5673_v4  ;;  %v5679_v5 = vpop.permute.xlu0 %860  ;;  %v519_v4 = vld [vmem:[#allocation2 + $0x82] sm:$0xff] }
 0x14b   :  { %1102 = vrot.lane.b32.xlu1 %v5223_v10, %s4693_s26  ;;  %8539 = vst [vmem:[#allocation107_spill] sm:$0xff] %v5679_v5 }
 0x14c   :  { %1104 = vrot.lane.b32.xlu0 %v5229_v11, %s4693_s26 }
 0x14d   :  { %v5681_v6 = vpop.permute.xlu1 %862 }
 0x14e   :  { %8540 = vst [vmem:[#allocation108_spill] sm:$0xff] %v5681_v6  ;;  %v5687_v7 = vpop.permute.xlu0 %864  ;;  %v491_v6 = vld [vmem:[#allocation2 + $0xb1] sm:$0xff] }
 0x14f   :  { %1106 = vrot.lane.b32.xlu1 %v5231_v12, %s4693_s26  ;;  %8541 = vst [vmem:[#allocation109_spill] sm:$0xff] %v5687_v7  ;;  %v485_v7 = vld [vmem:[#allocation2 + $0x69] sm:$0xff] }
 0x150   :  { %1108 = vrot.lane.b32.xlu0 %v5237_v13, %s4693_s26 }
 0x151   :  { %v5689_v8 = vpop.permute.xlu1 %866 }
 0x152   :  { %8542 = vst [vmem:[#allocation110_spill] sm:$0xff] %v5689_v8  ;;  %v5695_v9 = vpop.permute.xlu0 %868 }
 0x153   :  { %1110 = vrot.lane.b32.xlu1 %v5239_v14, %s4693_s26  ;;  %8543 = vst [vmem:[#allocation111_spill] sm:$0xff] %v5695_v9 }
 0x154   :  { %1112 = vrot.lane.b32.xlu0 %v5245_v15, %s4693_s26 }
 0x155   :  { %v5697_v10 = vpop.permute.xlu1 %870 }
 0x156   :  { %8544 = vst [vmem:[#allocation112_spill] sm:$0xff] %v5697_v10  ;;  %v5703_v11 = vpop.permute.xlu0 %872  ;;  %v8585_v10 = vld [vmem:[#allocation46_spill] sm:$0xff] }
 0x157   :  { %1114 = vrot.lane.b32.xlu1 %v5247_v16, %s4693_s26  ;;  %8545 = vst [vmem:[#allocation113_spill] sm:$0xff] %v5703_v11 }
 0x158   :  { %1116 = vrot.lane.b32.xlu0 %v5253_v17, %s4693_s26 }
 0x159   :  { %v5705_v12 = vpop.permute.xlu1 %874 }
 0x15a   :  { %8546 = vst [vmem:[#allocation114_spill] sm:$0xff] %v5705_v12  ;;  %v5711_v13 = vpop.permute.xlu0 %876  ;;  %v8577_v12 = vld [vmem:[#allocation38_spill] sm:$0xff] }
 0x15b   :  { %1118 = vrot.lane.b32.xlu1 %v5255_v18, %s4693_s26  ;;  %8547 = vst [vmem:[#allocation115_spill] sm:$0xff] %v5711_v13 }
 0x15c   :  { %1120 = vrot.lane.b32.xlu0 %v5261_v19, %s4693_s26 }
 0x15d   :  { %v5713_v14 = vpop.permute.xlu1 %878 }
 0x15e   :  { %8548 = vst [vmem:[#allocation116_spill] sm:$0xff] %v5713_v14  ;;  %v5719_v15 = vpop.permute.xlu0 %880  ;;  %v8569_v14 = vld [vmem:[#allocation30_spill] sm:$0xff] }
 0x15f   :  { %1122 = vrot.lane.b32.xlu1 %v5263_v20, %s4693_s26  ;;  %8549 = vst [vmem:[#allocation117_spill] sm:$0xff] %v5719_v15  ;;  %v8566_v15 = vld [vmem:[#allocation28_spill] sm:$0xff] }
 0x160   :  { %1124 = vrot.lane.b32.xlu0 %v5269_v21, %s4693_s26 }
 0x161   :  { %v5721_v16 = vpop.permute.xlu1 %882 }
 0x162   :  { %8550 = vst [vmem:[#allocation118_spill] sm:$0xff] %v5721_v16  ;;  %v5727_v17 = vpop.permute.xlu0 %884  ;;  %v8565_v16 = vld [vmem:[#allocation26_spill] sm:$0xff] }
 0x163   :  { %1126 = vrot.lane.b32.xlu1 %v5271_v22, %s4693_s26  ;;  %8551 = vst [vmem:[#allocation119_spill] sm:$0xff] %v5727_v17  ;;  %v8562_v17 = vld [vmem:[#allocation24_spill] sm:$0xff] }
 0x164   :  { %1128 = vrot.lane.b32.xlu0 %v5277_v23, %s4693_s26  ;;  %v8557_v23 = vld [vmem:[#allocation10_spill] sm:$0xff] }
 0x165   :  { %v5729_v18 = vpop.permute.xlu1 %886 }
 0x166   :  { %8552 = vst [vmem:[#allocation120_spill] sm:$0xff] %v5729_v18  ;;  %v5735_v19 = vpop.permute.xlu0 %888  ;;  %v5771_v18 = vld [vmem:[#allocation2 + $0x18a] sm:$0xff] }
 0x167   :  { %1130 = vrot.lane.b32.xlu1 %v5279_v24, %s4693_s26  ;;  %8553 = vst [vmem:[#allocation121_spill] sm:$0xff] %v5735_v19 }
 0x168   :  { %1132 = vrot.lane.b32.xlu0 %v5285_v25, %s4693_s26  ;;  %v8559_v25 = vld [vmem:[#allocation14_spill] sm:$0xff] }
 0x169   :  { %v5737_v20 = vpop.permute.xlu1 %890 }
 0x16a   :  { %8554 = vst [vmem:[#allocation122_spill] sm:$0xff] %v5737_v20  ;;  %v5743_v21 = vpop.permute.xlu0 %892  ;;  %v8558_v20 = vld [vmem:[#allocation12_spill] sm:$0xff] }
 0x16b   :  { %1134 = vrot.lane.b32.xlu1 %v5287_v26, %s4693_s26  ;;  %8555 = vst [vmem:[#allocation123_spill] sm:$0xff] %v5743_v21 }
 0x16c   :  { %1136 = vrot.lane.b32.xlu0 %v5293_v28, %s4693_s26  ;;  %v5767_v28 = vld [vmem:[#allocation2 + $0x182] sm:$0xff] }
 0x16d   :  { %v5745_v22 = vpop.permute.xlu1 %894 }
 0x16e   :  { %8556 = vst [vmem:[#allocation124_spill] sm:$0xff] %v5745_v22  ;;  %v5751_v24 = vpop.permute.xlu0 %960  ;;  %v8560_v22 = vld [vmem:[#allocation16_spill] sm:$0xff] }
 0x16f   :  { %1138 = vrot.lane.b32.xlu1 %v8557_v23, %s4693_s26 }
 0x170   :  { %1140 = vrot.lane.b32.xlu0 %v8558_v20, %s4693_s26 }
 0x171   :  { %v5753_v19 = vpop.permute.xlu1 %962 }
 0x172   :  { %v5759_v26 = vpop.permute.xlu0 %964 }
 0x173   :  { %1142 = vrot.lane.b32.xlu1 %v8559_v25, %s4693_s26 }
 0x174   :  { %1144 = vrot.lane.b32.xlu0 %v8560_v22, %s4693_s26 }
 0x175   :  { %v5761_v21 = vpop.permute.xlu1 %966 }
 0x176   :  { %v5769_v23 = vpop.permute.xlu0 %968 }
 0x177   :  { %1146 = vrot.lane.b32.xlu1 %v5321_v35, %s4693_s26  ;;  %v8561_v35 = vld [vmem:[#allocation22_spill] sm:$0xff] }
 0x178   :  { %1148 = vrot.lane.b32.xlu0 %v5767_v28, %s4693_s26 }
 0x179   :  { %v5773_v20 = vpop.permute.xlu1 %970 }
 0x17a   :  { %v5779_v25 = vpop.permute.xlu0 %972 }
 0x17b   :  { %1150 = vrot.lane.b32.xlu1 %v5771_v18, %s4693_s26 }
 0x17c   :  { %1216 = vrot.lane.b32.xlu0 %v8561_v35, %s4694_s27  ;;  %v8570_v35 = vld [vmem:[#allocation32_spill] sm:$0xff] }
 0x17d   :  { %v5781_v22 = vpop.permute.xlu1 %974 }
 0x17e   :  { %v5787_v48 = vpop.permute.xlu0 %976 }
 0x17f   :  { %1218 = vrot.lane.b32.xlu1 %v8562_v17, %s4694_s27  ;;  %8563 = vst [vmem:[#allocation10_spill] sm:$0xff] %v5787_v48  ;;  %v4604_v48 = vld [vmem:[#allocation2 + $0x68] sm:$0xff] }
 0x180   :  { %1220 = vrot.lane.b32.xlu0 %v8565_v16, %s4694_s27  ;;  %v8574_v16 = vld [vmem:[#allocation36_spill] sm:$0xff] }
 0x181   :  { %v5789_v47 = vpop.permute.xlu1 %978 }
 0x182   :  { %8564 = vst [vmem:[#allocation12_spill] sm:$0xff] %v5789_v47  ;;  %v5795_v46 = vpop.permute.xlu0 %980 }
 0x183   :  { %1222 = vrot.lane.b32.xlu1 %v8566_v15, %s4694_s27  ;;  %8567 = vst [vmem:[#allocation14_spill] sm:$0xff] %v5795_v46 }
 0x184   :  { %1224 = vrot.lane.b32.xlu0 %v8569_v14, %s4694_s27  ;;  %v8578_v14 = vld [vmem:[#allocation40_spill] sm:$0xff] }
 0x185   :  { %v5797_v45 = vpop.permute.xlu1 %982 }
 0x186   :  { %8568 = vst [vmem:[#allocation16_spill] sm:$0xff] %v5797_v45  ;;  %v5803_v17 = vpop.permute.xlu0 %984  ;;  %v1929_v45 = vld [vmem:[#allocation2 + $0x1b2] sm:$0xff] }
 0x187   :  { %1226 = vrot.lane.b32.xlu1 %v8570_v35, %s4694_s27  ;;  %8571 = vst [vmem:[#allocation22_spill] sm:$0xff] %v5803_v17 }
 0x188   :  { %1228 = vrot.lane.b32.xlu0 %v8573_v44, %s4694_s27  ;;  %v8582_v44 = vld [vmem:[#allocation44_spill] sm:$0xff] }
 0x189   :  { %v5805_v13 = vpop.permute.xlu1 %986 }
 0x18a   :  { %8572 = vst [vmem:[#allocation24_spill] sm:$0xff] %v5805_v13  ;;  %v5811_v15 = vpop.permute.xlu0 %988  ;;  %v517_v13 = vld [vmem:[#allocation2 + $0x6a] sm:$0xff] }
 0x18b   :  { %1230 = vrot.lane.b32.xlu1 %v8574_v16, %s4694_s27  ;;  %8575 = vst [vmem:[#allocation26_spill] sm:$0xff] %v5811_v15 }
 0x18c   :  { %1232 = vrot.lane.b32.xlu0 %v8577_v12, %s4694_s27  ;;  %v8586_v12 = vld [vmem:[#allocation48_spill] sm:$0xff] }
 0x18d   :  { %v5813_v43 = vpop.permute.xlu1 %990 }
 0x18e   :  { %8576 = vst [vmem:[#allocation28_spill] sm:$0xff] %v5813_v43  ;;  %v5819_v35 = vpop.permute.xlu0 %992  ;;  %v489_v43 = vld [vmem:[#allocation2 + $0x99] sm:$0xff] }
 0x18f   :  { %1234 = vrot.lane.b32.xlu1 %v8578_v14, %s4694_s27  ;;  %8579 = vst [vmem:[#allocation30_spill] sm:$0xff] %v5819_v35  ;;  %v484_v35 = vld [vmem:[#allocation2 + $0x61] sm:$0xff] }
 0x190   :  { %1236 = vrot.lane.b32.xlu0 %v8581_v42, %s4694_s27  ;;  %v8590_v42 = vld [vmem:[#allocation52_spill] sm:$0xff] }
 0x191   :  { %v5821_v11 = vpop.permute.xlu1 %994 }
 0x192   :  { %8580 = vst [vmem:[#allocation32_spill] sm:$0xff] %v5821_v11  ;;  %v5827_v16 = vpop.permute.xlu0 %996 }
 0x193   :  { %1238 = vrot.lane.b32.xlu1 %v8582_v44, %s4694_s27  ;;  %8583 = vst [vmem:[#allocation34_spill] sm:$0xff] %v5827_v16 }
 0x194   :  { %1240 = vrot.lane.b32.xlu0 %v8585_v10, %s4694_s27  ;;  %v8594_v10 = vld [vmem:[#allocation56_spill] sm:$0xff] }
 0x195   :  { %v5829_v41 = vpop.permute.xlu1 %998 }
 0x196   :  { %8584 = vst [vmem:[#allocation36_spill] sm:$0xff] %v5829_v41  ;;  %v5835_v14 = vpop.permute.xlu0 %1000  ;;  %v8593_v41 = vld [vmem:[#allocation54_spill] sm:$0xff] }
 0x197   :  { %1242 = vrot.lane.b32.xlu1 %v8586_v12, %s4694_s27  ;;  %8587 = vst [vmem:[#allocation38_spill] sm:$0xff] %v5835_v14 }
 0x198   :  { %1244 = vrot.lane.b32.xlu0 %v8589_v40, %s4694_s27  ;;  %v8598_v40 = vld [vmem:[#allocation60_spill] sm:$0xff] }
 0x199   :  { %v5837_v9 = vpop.permute.xlu1 %1002 }
 0x19a   :  { %8588 = vst [vmem:[#allocation40_spill] sm:$0xff] %v5837_v9  ;;  %v5843_v44 = vpop.permute.xlu0 %1004  ;;  %v8597_v9 = vld [vmem:[#allocation58_spill] sm:$0xff] }
 0x19b   :  { %1246 = vrot.lane.b32.xlu1 %v8590_v42, %s4694_s27  ;;  %8591 = vst [vmem:[#allocation42_spill] sm:$0xff] %v5843_v44 }
 0x19c   :  { %1248 = vrot.lane.b32.xlu0 %v8593_v41, %s4694_s27  ;;  %v8602_v41 = vld [vmem:[#allocation64_spill] sm:$0xff] }
 0x19d   :  { %v5845_v16 = vpop.permute.xlu1 %1006 }
 0x19e   :  { %8592 = vst [vmem:[#allocation44_spill] sm:$0xff] %v5845_v16  ;;  %v5851_v12 = vpop.permute.xlu0 %1008  ;;  %v8601_v16 = vld [vmem:[#allocation62_spill] sm:$0xff] }
 0x19f   :  { %1250 = vrot.lane.b32.xlu1 %v8594_v10, %s4694_s27  ;;  %8595 = vst [vmem:[#allocation46_spill] sm:$0xff] %v5851_v12 }
 0x1a0   :  { %1252 = vrot.lane.b32.xlu0 %v8597_v9, %s4694_s27  ;;  %v8606_v9 = vld [vmem:[#allocation68_spill] sm:$0xff] }
 0x1a1   :  { %v5853_v14 = vpop.permute.xlu1 %1010 }
 0x1a2   :  { %8596 = vst [vmem:[#allocation48_spill] sm:$0xff] %v5853_v14  ;;  %v5859_v42 = vpop.permute.xlu0 %1012  ;;  %v8605_v14 = vld [vmem:[#allocation66_spill] sm:$0xff] }
 0x1a3   :  { %1254 = vrot.lane.b32.xlu1 %v8598_v40, %s4694_s27  ;;  %8599 = vst [vmem:[#allocation50_spill] sm:$0xff] %v5859_v42 }
 0x1a4   :  { %1256 = vrot.lane.b32.xlu0 %v8601_v16, %s4694_s27  ;;  %v8610_v16 = vld [vmem:[#allocation72_spill] sm:$0xff] }
 0x1a5   :  { %v5861_v44 = vpop.permute.xlu1 %1014 }
 0x1a6   :  { %8600 = vst [vmem:[#allocation52_spill] sm:$0xff] %v5861_v44  ;;  %v5867_v10 = vpop.permute.xlu0 %1016  ;;  %v8609_v44 = vld [vmem:[#allocation70_spill] sm:$0xff] }
 0x1a7   :  { %1258 = vrot.lane.b32.xlu1 %v8602_v41, %s4694_s27  ;;  %8603 = vst [vmem:[#allocation54_spill] sm:$0xff] %v5867_v10 }
 0x1a8   :  { %1260 = vrot.lane.b32.xlu0 %v8605_v14, %s4694_s27 }
 0x1a9   :  { %v5869_v12 = vpop.permute.xlu1 %1018 }
 0x1aa   :  { %8604 = vst [vmem:[#allocation56_spill] sm:$0xff] %v5869_v12  ;;  %v5875_v40 = vpop.permute.xlu0 %1020  ;;  %v481_v12 = vld [vmem:[#allocation2 + $0x39] sm:$0xff] }
 0x1ab   :  { %1262 = vrot.lane.b32.xlu1 %v8606_v9, %s4694_s27  ;;  %8607 = vst [vmem:[#allocation58_spill] sm:$0xff] %v5875_v40 }
 0x1ac   :  { %1264 = vrot.lane.b32.xlu0 %v8609_v44, %s4694_s27  ;;  %v478_v44 = vld [vmem:[#allocation2 + $0x198] sm:$0xff] }
 0x1ad   :  { %v5877_v42 = vpop.permute.xlu1 %1022 }
 0x1ae   :  { %8608 = vst [vmem:[#allocation60_spill] sm:$0xff] %v5877_v42  ;;  %v5883_v41 = vpop.permute.xlu0 %1088  ;;  %v479_v42 = vld [vmem:[#allocation2 + $0x1a0] sm:$0xff] }
 0x1af   :  { %1266 = vrot.lane.b32.xlu1 %v8610_v16, %s4694_s27 }
 0x1b0   :  { %1268 = vrot.lane.b32.xlu0 %v5493_v60, %s4694_s27  ;;  %v4233_v60 = vld [vmem:[%s8398_s0 + $0x100] sm:$0xff] }
 0x1b1   :  { %v5885_v10 = vpop.permute.xlu1 %1090  ;;  %223 = vst.msk [vmem:[#allocation2 + $0x1c9] sm:$0xff] %vm15_vm0, %v4233_v60 }
 0x1b2   :  { %v5891_v14 = vpop.permute.xlu0 %1092 }
 0x1b3   :  { %1270 = vrot.lane.b32.xlu1 %v5497_v59, %s4694_s27 }
 0x1b4   :  { %1272 = vrot.lane.b32.xlu0 %v5503_v34, %s4694_s27  ;;  %v4234_v34 = vld [vmem:[%s8398_s0 + $0x108] sm:$0xff] }
 0x1b5   :  { %v5893_v9 = vpop.permute.xlu1 %1094  ;;  %224 = vst.msk [vmem:[#allocation2 + $0x1d1] sm:$0xff] %vm15_vm0, %v4234_v34  ;;  %v483_v34 = vld [vmem:[#allocation2 + $0x51] sm:$0xff] }
 0x1b6   :  { %v5899_v16 = vpop.permute.xlu0 %1096 }
 0x1b7   :  { %1274 = vrot.lane.b32.xlu1 %v5507_v33, %s4694_s27  ;;  %v480_v33 = vld [vmem:[#allocation2 + $0x31] sm:$0xff] }
 0x1b8   :  { %1276 = vrot.lane.b32.xlu0 %v478_v44, %s4694_s27  ;;  %v4235_v44 = vld [vmem:[%s8398_s0 + $0x110] sm:$0xff] }
 0x1b9   :  { %v5901_v40 = vpop.permute.xlu1 %1098  ;;  %225 = vst.msk [vmem:[#allocation2 + $0x1e1] sm:$0xff] %vm15_vm0, %v4235_v44  ;;  %v487_v44 = vld [vmem:[#allocation2 + $0x81] sm:$0xff] }
 0x1ba   :  { %v5913_v59 = vpop.permute.xlu0 %1100 }
 0x1bb   :  { %1278 = vrot.lane.b32.xlu1 %v479_v42, %s4694_s27  ;;  %v482_v42 = vld [vmem:[#allocation2 + $0x49] sm:$0xff] }
 0x1bc   :  { %1344 = vrot.lane.b32.xlu0 %v480_v33, %s4695_s7  ;;  %v1900_v27 = vld [vmem:[#allocation2 + $0x1d1] sm:$0xff] }
 0x1bd   :  { %v5915_v39 = vpop.permute.xlu1 %1102 }
 0x1be   :  { %v5923_v60 = vpop.permute.xlu0 %1104 }
 0x1bf   :  { %1346 = vrot.lane.b32.xlu1 %v481_v12, %s4695_s7  ;;  %8611 = vst [vmem:[#allocation62_spill] sm:$0xff] %v5923_v60  ;;  %v486_v12 = vld [vmem:[#allocation2 + $0x79] sm:$0xff] }
 0x1c0   :  { %1348 = vrot.lane.b32.xlu0 %v482_v42, %s4695_s7  ;;  %v488_v42 = vld [vmem:[#allocation2 + $0x91] sm:$0xff] }
 0x1c1   :  { %v5925_v11 = vpop.permute.xlu1 %1106 }
 0x1c2   :  { %8612 = vst [vmem:[#allocation64_spill] sm:$0xff] %v5925_v11  ;;  %v5929_v8 = vpop.permute.xlu0 %1108 }
 0x1c3   :  { %1350 = vrot.lane.b32.xlu1 %v483_v34, %s4695_s7  ;;  %8613 = vst [vmem:[#allocation66_spill] sm:$0xff] %v5929_v8 }
 0x1c4   :  { %1352 = vrot.lane.b32.xlu0 %v484_v35, %s4695_s7 }
 0x1c5   :  { %v5931_v38 = vpop.permute.xlu1 %1110 }
 0x1c6   :  { %8614 = vst [vmem:[#allocation68_spill] sm:$0xff] %v5931_v38  ;;  %v5935_v33 = vpop.permute.xlu0 %1112  ;;  %v1898_v38 = vld [vmem:[#allocation2 + $0x1b9] sm:$0xff] }
 0x1c7   :  { %1354 = vrot.lane.b32.xlu1 %v485_v7, %s4695_s7  ;;  %8615 = vst [vmem:[#allocation70_spill] sm:$0xff] %v5935_v33  ;;  %v490_v7 = vld [vmem:[#allocation2 + $0xa9] sm:$0xff] }
 0x1c8   :  { %1356 = vrot.lane.b32.xlu0 %v486_v12, %s4695_s7  ;;  %v3466_v12 = vld [vmem:[%s8399_s1] sm:$0xff] }
 0x1c9   :  { %v5937_v32 = vpop.permute.xlu1 %1114 }
 0x1ca   :  { %8616 = vst [vmem:[#allocation72_spill] sm:$0xff] %v5937_v32  ;;  %v5941_v34 = vpop.permute.xlu0 %1116  ;;  %v513_v32 = vld [vmem:[#allocation2 + $0x3a] sm:$0xff] }
 0x1cb   :  { %1358 = vrot.lane.b32.xlu1 %v487_v44, %s4695_s7  ;;  %8617 = vst [vmem:[#allocation125_spill] sm:$0xff] %v5941_v34  ;;  %v3467_v44 = vld [vmem:[%s8399_s1 + $0x8] sm:$0xff] }
 0x1cc   :  { %1360 = vrot.lane.b32.xlu0 %v488_v42, %s4695_s7  ;;  %v4537_v5 = vpack.c.bf16 %v3467_v44, %v3466_v12  ;;  %v494_v44 = vld [vmem:[#allocation2 + $0xd9] sm:$0xff] }
 0x1cd   :  { %v5943_v15 = vpop.permute.xlu1 %1118 }
 0x1ce   :  { %8618 = vst [vmem:[#allocation126_spill] sm:$0xff] %v5943_v15  ;;  %v5947_v35 = vpop.permute.xlu0 %1120  ;;  %4538 = vmatprep.subr.bf16.mxu0 %v4537_v5  ;;  %v3468_v15 = vld [vmem:[%s8399_s1 + $0x10] sm:$0xff]  ;;  %4569 = vmatprep.subr.bf16.mxu1 %v4537_v5 }
 0x1cf   :  { %1362 = vrot.lane.b32.xlu1 %v489_v43, %s4695_s7  ;;  %8619 = vst [vmem:[#allocation127_spill] sm:$0xff] %v5947_v35  ;;  %v492_v43 = vld [vmem:[#allocation2 + $0xc1] sm:$0xff]  ;;  %v493_v35 = vld [vmem:[#allocation2 + $0xc9] sm:$0xff]  ;;  %4540 = vmatpush3.bf16.msra.mxu0 %v4537_v5 }
 0x1d0   :  { %1364 = vrot.lane.b32.xlu0 %v490_v7, %s4695_s7  ;;  %v4541_v7 = vpack.c.bf16 %v3469_v31, %v3468_v15  ;;  %4577 = vmatpush3.bf16.msra.mxu1 %v4537_v5  ;;  %v3470_v31 = vld [vmem:[%s8399_s1 + $0x20] sm:$0xff]  ;;  %v3471_v5 = vld [vmem:[%s8399_s1 + $0x28] sm:$0xff] }
 0x1d1   :  { %v5955_v34 = vpop.permute.xlu1 %1122 }
 0x1d2   :  { %8620 = vst [vmem:[#allocation128_spill] sm:$0xff] %v5955_v34  ;;  %v5959_v42 = vpop.permute.xlu0 %1124  ;;  %4542 = vmatprep.subr.bf16.mxu0 %v4541_v7  ;;  %v495_v34 = vld [vmem:[#allocation2 + $0xe1] sm:$0xff]  ;;  %4570 = vmatprep.subr.bf16.mxu1 %v4541_v7 }
 0x1d3   :  { %1366 = vrot.lane.b32.xlu1 %v491_v6, %s4695_s7  ;;  %8621 = vst [vmem:[#allocation129_spill] sm:$0xff] %v5959_v42  ;;  %v4236_v6 = vld [vmem:[%s8398_s0 + $0x118] sm:$0xff]  ;;  %4544 = vmatpush3.bf16.msra.mxu0 %v4541_v7 }
 0x1d4   :  { %1368 = vrot.lane.b32.xlu0 %v492_v43, %s4695_s7  ;;  %226 = vst.msk [vmem:[#allocation2 + $0x1e9] sm:$0xff] %vm15_vm0, %v4236_v6  ;;  %4578 = vmatpush3.bf16.msra.mxu1 %v4541_v7  ;;  %v496_v43 = vld [vmem:[#allocation2 + $0xf1] sm:$0xff] }
 0x1d5   :  { %v5967_v12 = vpop.permute.xlu1 %1126 }
 0x1d6   :  { %8622 = vst [vmem:[#allocation130_spill] sm:$0xff] %v5967_v12  ;;  %v5975_v42 = vpop.permute.xlu0 %1128  ;;  %v3472_v12 = vld [vmem:[%s8399_s1 + $0x30] sm:$0xff] }
 0x1d7   :  { %1370 = vrot.lane.b32.xlu1 %v493_v35, %s4695_s7  ;;  %8623 = vst [vmem:[#allocation131_spill] sm:$0xff] %v5975_v42  ;;  %v4545_v35 = vpack.c.bf16 %v3471_v5, %v3470_v31  ;;  %v497_v42 = vld [vmem:[#allocation2 + $0xf9] sm:$0xff]  ;;  %v499_v5 = vld [vmem:[#allocation2 + $0x111] sm:$0xff] }
 0x1d8   :  { %1372 = vrot.lane.b32.xlu0 %v494_v44, %s4695_s7 }
 0x1d9   :  { %v5983_v15 = vpop.permute.xlu1 %1130  ;;  %4546 = vmatprep.subr.bf16.mxu0 %v4545_v35  ;;  %4571 = vmatprep.subr.bf16.mxu1 %v4545_v35 }
 0x1da   :  { %8624 = vst [vmem:[#allocation132_spill] sm:$0xff] %v5983_v15  ;;  %v5987_v6 = vpop.permute.xlu0 %1132  ;;  %4548 = vmatpush3.bf16.msra.mxu0 %v4545_v35  ;;  %v3473_v15 = vld [vmem:[%s8399_s1 + $0x38] sm:$0xff]  ;;  %4579 = vmatpush3.bf16.msra.mxu1 %v4545_v35 }
 0x1db   :  { %1374 = vrot.lane.b32.xlu1 %v495_v34, %s4695_s7  ;;  %8625 = vst [vmem:[#allocation133_spill] sm:$0xff] %v5987_v6  ;;  %v4549_v44 = vpack.c.bf16 %v3473_v15, %v3472_v12  ;;  %v498_v34 = vld [vmem:[#allocation2 + $0x109] sm:$0xff]  ;;  %v3474_v6 = vld [vmem:[%s8399_s1 + $0x40] sm:$0xff] }
 0x1dc   :  { %1376 = vrot.lane.b32.xlu0 %v496_v43, %s4695_s7  ;;  %v501_v43 = vld [vmem:[#allocation2 + $0x129] sm:$0xff] }
 0x1dd   :  { %v5995_v7 = vpop.permute.xlu1 %1134  ;;  %4550 = vmatprep.subr.bf16.mxu0 %v4549_v44  ;;  %4572 = vmatprep.subr.bf16.mxu1 %v4549_v44 }
 0x1de   :  { %8626 = vst [vmem:[#allocation134_spill] sm:$0xff] %v5995_v7  ;;  %v5999_v31 = vpop.permute.xlu0 %1136  ;;  %4552 = vmatpush3.bf16.msra.mxu0 %v4549_v44  ;;  %v3475_v7 = vld [vmem:[%s8399_s1 + $0x48] sm:$0xff]  ;;  %4580 = vmatpush3.bf16.msra.mxu1 %v4549_v44  ;;  %v502_v44 = vld [vmem:[#allocation2 + $0x139] sm:$0xff] }
 0x1df   :  { %1378 = vrot.lane.b32.xlu1 %v497_v42, %s4695_s7  ;;  %8627 = vst [vmem:[#allocation135_spill] sm:$0xff] %v5999_v31  ;;  %v4553_v15 = vpack.c.bf16 %v3475_v7, %v3474_v6  ;;  %v500_v42 = vld [vmem:[#allocation2 + $0x121] sm:$0xff]  ;;  %v3476_v31 = vld [vmem:[%s8399_s1 + $0x50] sm:$0xff] }
 0x1e0   :  { %1380 = vrot.lane.b32.xlu0 %v498_v34, %s4695_s7 }
 0x1e1   :  { %v6007_v12 = vpop.permute.xlu1 %1138  ;;  %4554 = vmatprep.subr.bf16.mxu0 %v4553_v15  ;;  %4573 = vmatprep.subr.bf16.mxu1 %v4553_v15 }
 0x1e2   :  { %8628 = vst [vmem:[#allocation136_spill] sm:$0xff] %v6007_v12  ;;  %v6011_v35 = vpop.permute.xlu0 %1140  ;;  %4556 = vmatpush3.bf16.msra.mxu0 %v4553_v15  ;;  %v3477_v12 = vld [vmem:[%s8399_s1 + $0x58] sm:$0xff]  ;;  %4581 = vmatpush3.bf16.msra.mxu1 %v4553_v15 }
 0x1e3   :  { %1382 = vrot.lane.b32.xlu1 %v499_v5, %s4695_s7  ;;  %8629 = vst [vmem:[#allocation137_spill] sm:$0xff] %v6011_v35  ;;  %v4557_v7 = vpack.c.bf16 %v3477_v12, %v3476_v31  ;;  %v503_v5 = vld [vmem:[#allocation2 + $0x141] sm:$0xff]  ;;  %v504_v15 = vld [vmem:[#allocation2 + $0x151] sm:$0xff] }
 0x1e4   :  { %1384 = vrot.lane.b32.xlu0 %v500_v42, %s4695_s7  ;;  %v3478_v35 = vld [vmem:[%s8399_s1 + $0x60] sm:$0xff] }
 0x1e5   :  { %v6019_v6 = vpop.permute.xlu1 %1142  ;;  %4558 = vmatprep.subr.bf16.mxu0 %v4557_v7  ;;  %4574 = vmatprep.subr.bf16.mxu1 %v4557_v7 }
 0x1e6   :  { %8630 = vst [vmem:[#allocation138_spill] sm:$0xff] %v6019_v6  ;;  %v6023_v34 = vpop.permute.xlu0 %1144  ;;  %4560 = vmatpush3.bf16.msra.mxu0 %v4557_v7  ;;  %v3479_v6 = vld [vmem:[%s8399_s1 + $0x68] sm:$0xff]  ;;  %4582 = vmatpush3.bf16.msra.mxu1 %v4557_v7  ;;  %v4237_v7 = vld [vmem:[%s8398_s0 + $0x120] sm:$0xff] }
 0x1e7   :  { %1386 = vrot.lane.b32.xlu1 %v501_v43, %s4695_s7  ;;  %8631 = vst [vmem:[#allocation139_spill] sm:$0xff] %v6023_v34  ;;  %v4561_v12 = vpack.c.bf16 %v3479_v6, %v3478_v35  ;;  %v505_v43 = vld [vmem:[#allocation2 + $0x159] sm:$0xff]  ;;  %v3480_v34 = vld [vmem:[%s8399_s1 + $0x70] sm:$0xff]  ;;  %227 = vst.msk [vmem:[#allocation2 + $0x1f9] sm:$0xff] %vm15_vm0, %v4237_v7 }
 0x1e8   :  { %1388 = vrot.lane.b32.xlu0 %v502_v44, %s4695_s7  ;;  %v506_v44 = vld [vmem:[#allocation2 + $0x169] sm:$0xff]  ;;  %v512_v7 = vld [vmem:[#allocation2 + $0x32] sm:$0xff] }
 0x1e9   :  { %v6031_v31 = vpop.permute.xlu1 %1146  ;;  %4562 = vmatprep.subr.bf16.mxu0 %v4561_v12  ;;  %4575 = vmatprep.subr.bf16.mxu1 %v4561_v12 }
 0x1ea   :  { %8632 = vst [vmem:[#allocation140_spill] sm:$0xff] %v6031_v31  ;;  %v6035_v42 = vpop.permute.xlu0 %1148  ;;  %4564 = vmatpush3.bf16.msra.mxu0 %v4561_v12  ;;  %v3481_v31 = vld [vmem:[%s8399_s1 + $0x78] sm:$0xff]  ;;  %4583 = vmatpush3.bf16.msra.mxu1 %v4561_v12  ;;  %v4238_v12 = vld [vmem:[%s8398_s0 + $0x128] sm:$0xff] }
 0x1eb   :  { %1390 = vrot.lane.b32.xlu1 %v503_v5, %s4695_s7  ;;  %8633 = vst [vmem:[#allocation141_spill] sm:$0xff] %v6035_v42  ;;  %v4565_v6 = vpack.c.bf16 %v3481_v31, %v3480_v34  ;;  %v507_v42 = vld [vmem:[#allocation2 + $0x171] sm:$0xff]  ;;  %228 = vst.msk [vmem:[#allocation2 + $0x201] sm:$0xff] %vm15_vm0, %v4238_v12 }
 0x1ec   :  { %1392 = vrot.lane.b32.xlu0 %v504_v15, %s4695_s7  ;;  %v510_v15 = vld [vmem:[#allocation2 + $0x199] sm:$0xff] }
 0x1ed   :  { %v6043_v35 = vpop.permute.xlu1 %1150  ;;  %4566 = vmatprep.subr.bf16.mxu0 %v4565_v6  ;;  %4576 = vmatprep.subr.bf16.mxu1 %v4565_v6 }
 0x1ee   :  { %8634 = vst [vmem:[#allocation142_spill] sm:$0xff] %v6043_v35  ;;  %v6051_v5 = vpop.permute.xlu0 %1216  ;;  %4568 = vmatpush3.bf16.msra.mxu0 %v4565_v6  ;;  %4584 = vmatpush3.bf16.msra.mxu1 %v4565_v6 }
 0x1ef   :  { %1394 = vrot.lane.b32.xlu1 %v505_v43, %s4695_s7 }
 0x1f0   :  { %1396 = vrot.lane.b32.xlu0 %v506_v44, %s4695_s7 }
 0x1f1   :  { %v6053_v35 = vpop.permute.xlu1 %1218 }
 0x1f2   :  { %v6057_v34 = vpop.permute.xlu0 %1220 }
 0x1f3   :  { %1398 = vrot.lane.b32.xlu1 %v507_v42, %s4695_s7  ;;  %v511_v42 = vld [vmem:[#allocation2 + $0x1a1] sm:$0xff] }
 0x1f4   :  { %1400 = vrot.lane.b32.xlu0 %v5635_v57, %s4695_s7 }
 0x1f5   :  { %v6059_v31 = vpop.permute.xlu1 %1222 }
 0x1f6   :  { %v6069_v43 = vpop.permute.xlu0 %1224 }
 0x1f7   :  { %1402 = vrot.lane.b32.xlu1 %v5639_v52, %s4695_s7  ;;  %v514_v52 = vld [vmem:[#allocation2 + $0x4a] sm:$0xff] }
 0x1f8   :  { %1404 = vrot.lane.b32.xlu0 %v510_v15, %s4695_s7  ;;  %v516_v15 = vld [vmem:[#allocation2 + $0x62] sm:$0xff] }
 0x1f9   :  { %v6071_v6 = vpop.permute.xlu1 %1226 }
 0x1fa   :  { %v6075_v44 = vpop.permute.xlu0 %1228 }
 0x1fb   :  { %1406 = vrot.lane.b32.xlu1 %v511_v42, %s4695_s7 }
 0x1fc   :  { %1472 = vrot.lane.b32.xlu0 %v512_v7, %s4696_s4 }
 0x1fd   :  { %v6077_v57 = vpop.permute.xlu1 %1230 }
 0x1fe   :  { %8635 = vst [vmem:[#allocation143_spill] sm:$0xff] %v6077_v57  ;;  %v6081_v12 = vpop.permute.xlu0 %1232 }
 0x1ff   :  { %1474 = vrot.lane.b32.xlu1 %v513_v32, %s4696_s4  ;;  %8636 = vst [vmem:[#allocation144_spill] sm:$0xff] %v6081_v12  ;;  %v518_v32 = vld [vmem:[#allocation2 + $0x7a] sm:$0xff] }
 0x200   :  { %1476 = vrot.lane.b32.xlu0 %v514_v52, %s4696_s4 }
 0x201   :  { %v6083_v33 = vpop.permute.xlu1 %1234 }
 0x202   :  { %8637 = vst [vmem:[#allocation145_spill] sm:$0xff] %v6083_v33  ;;  %v6087_v42 = vpop.permute.xlu0 %1236 }
 0x203   :  { %1478 = vrot.lane.b32.xlu1 %v515_v30, %s4696_s4  ;;  %8638 = vst [vmem:[#allocation146_spill] sm:$0xff] %v6087_v42  ;;  %v520_v30 = vld [vmem:[#allocation2 + $0x92] sm:$0xff] }
 0x204   :  { %1480 = vrot.lane.b32.xlu0 %v516_v15, %s4696_s4  ;;  %v522_v15 = vld [vmem:[#allocation2 + $0xaa] sm:$0xff] }
 0x205   :  { %v6089_v17 = vpop.permute.xlu1 %1238 }
 0x206   :  { %8639 = vst [vmem:[#allocation147_spill] sm:$0xff] %v6089_v17  ;;  %v6093_v7 = vpop.permute.xlu0 %1240 }
 0x207   :  { %1482 = vrot.lane.b32.xlu1 %v517_v13, %s4696_s4  ;;  %8640 = vst [vmem:[#allocation148_spill] sm:$0xff] %v6093_v7  ;;  %v4239_v13 = vld [vmem:[%s8398_s0 + $0x130] sm:$0xff] }
 0x208   :  { %1484 = vrot.lane.b32.xlu0 %v518_v32, %s4696_s4  ;;  %229 = vst.msk [vmem:[#allocation2 + $0x211] sm:$0xff] %vm15_vm0, %v4239_v13  ;;  %v526_v13 = vld [vmem:[#allocation2 + $0xda] sm:$0xff] }
 0x209   :  { %v6095_v3 = vpop.permute.xlu1 %1242 }
 0x20a   :  { %8641 = vst [vmem:[#allocation149_spill] sm:$0xff] %v6095_v3  ;;  %v6099_v52 = vpop.permute.xlu0 %1244 }
 0x20b   :  { %1486 = vrot.lane.b32.xlu1 %v519_v4, %s4696_s4  ;;  %8642 = vst [vmem:[#allocation150_spill] sm:$0xff] %v6099_v52  ;;  %v523_v4 = vld [vmem:[#allocation2 + $0xb2] sm:$0xff]  ;;  %v525_v52 = vld [vmem:[#allocation2 + $0xca] sm:$0xff] }
 0x20c   :  { %1488 = vrot.lane.b32.xlu0 %v520_v30, %s4696_s4 }
 0x20d   :  { %v6101_v42 = vpop.permute.xlu1 %1246 }
 0x20e   :  { %8643 = vst [vmem:[#allocation151_spill] sm:$0xff] %v6101_v42  ;;  %v6109_v32 = vpop.permute.xlu0 %1248  ;;  %v524_v42 = vld [vmem:[#allocation2 + $0xc2] sm:$0xff] }
 0x20f   :  { %1490 = vrot.lane.b32.xlu1 %v521_v29, %s4696_s4  ;;  %8644 = vst [vmem:[#allocation152_spill] sm:$0xff] %v6109_v32  ;;  %v4240_v29 = vld [vmem:[%s8398_s0 + $0x138] sm:$0xff] }
 0x210   :  { %1492 = vrot.lane.b32.xlu0 %v522_v15, %s4696_s4  ;;  %230 = vst.msk [vmem:[#allocation2 + $0x219] sm:$0xff] %vm15_vm0, %v4240_v29  ;;  %v529_v32 = vld [vmem:[#allocation2 + $0xfa] sm:$0xff]  ;;  %v531_v29 = vld [vmem:[#allocation2 + $0x112] sm:$0xff] }
 0x211   :  { %v6111_v3 = vpop.permute.xlu1 %1250 }
 0x212   :  { %8645 = vst [vmem:[#allocation153_spill] sm:$0xff] %v6111_v3  ;;  %v6115_v30 = vpop.permute.xlu0 %1252 }
 0x213   :  { %1494 = vrot.lane.b32.xlu1 %v523_v4, %s4696_s4  ;;  %8646 = vst [vmem:[#allocation154_spill] sm:$0xff] %v6115_v30  ;;  %v527_v4 = vld [vmem:[#allocation2 + $0xe2] sm:$0xff] }
 0x214   :  { %1496 = vrot.lane.b32.xlu0 %v524_v42, %s4696_s4  ;;  %v530_v42 = vld [vmem:[#allocation2 + $0x10a] sm:$0xff] }
 0x215   :  { %v6117_v7 = vpop.permute.xlu1 %1254 }
 0x216   :  { %8647 = vst [vmem:[#allocation155_spill] sm:$0xff] %v6117_v7  ;;  %v6125_v15 = vpop.permute.xlu0 %1256  ;;  %v528_v7 = vld [vmem:[#allocation2 + $0xf2] sm:$0xff] }
 0x217   :  { %1498 = vrot.lane.b32.xlu1 %v525_v52, %s4696_s4  ;;  %8648 = vst [vmem:[#allocation156_spill] sm:$0xff] %v6125_v15 }
 0x218   :  { %1500 = vrot.lane.b32.xlu0 %v526_v13, %s4696_s4  ;;  %v532_v13 = vld [vmem:[#allocation2 + $0x122] sm:$0xff] }
 0x219   :  { %v6127_v3 = vpop.permute.xlu1 %1258 }
 0x21a   :  { %8649 = vst [vmem:[#allocation157_spill] sm:$0xff] %v6127_v3  ;;  %v6131_v30 = vpop.permute.xlu0 %1260 }
 0x21b   :  { %1502 = vrot.lane.b32.xlu1 %v527_v4, %s4696_s4  ;;  %8650 = vst [vmem:[#allocation158_spill] sm:$0xff] %v6131_v30  ;;  %v533_v30 = vld [vmem:[#allocation2 + $0x12a] sm:$0xff] }
 0x21c   :  { %1504 = vrot.lane.b32.xlu0 %v528_v7, %s4696_s4  ;;  %v534_v7 = vld [vmem:[#allocation2 + $0x13a] sm:$0xff] }
 0x21d   :  { %v6133_v17 = vpop.permute.xlu1 %1262 }
 0x21e   :  { %8651 = vst [vmem:[#allocation159_spill] sm:$0xff] %v6133_v17  ;;  %v6137_v52 = vpop.permute.xlu0 %1264 }
 0x21f   :  { %1506 = vrot.lane.b32.xlu1 %v529_v32, %s4696_s4  ;;  %8652 = vst [vmem:[#allocation160_spill] sm:$0xff] %v6137_v52  ;;  %v535_v52 = vld [vmem:[#allocation2 + $0x142] sm:$0xff] }
 0x220   :  { %1508 = vrot.lane.b32.xlu0 %v530_v42, %s4696_s4  ;;  %v536_v42 = vld [vmem:[#allocation2 + $0x152] sm:$0xff] }
 0x221   :  { %v6139_v15 = vpop.permute.xlu1 %1266 }
 0x222   :  { %8653 = vst [vmem:[#allocation161_spill] sm:$0xff] %v6139_v15  ;;  %v6143_v4 = vpop.permute.xlu0 %1268 }
 0x223   :  { %1510 = vrot.lane.b32.xlu1 %v531_v29, %s4696_s4  ;;  %8654 = vst [vmem:[#allocation162_spill] sm:$0xff] %v6143_v4  ;;  %v537_v4 = vld [vmem:[#allocation2 + $0x15a] sm:$0xff] }
 0x224   :  { %1512 = vrot.lane.b32.xlu0 %v532_v13, %s4696_s4  ;;  %v538_v13 = vld [vmem:[#allocation2 + $0x16a] sm:$0xff] }
 0x225   :  { %v6145_v3 = vpop.permute.xlu1 %1270 }
 0x226   :  { %8655 = vst [vmem:[#allocation163_spill] sm:$0xff] %v6145_v3  ;;  %v6149_v32 = vpop.permute.xlu0 %1272 }
 0x227   :  { %1514 = vrot.lane.b32.xlu1 %v533_v30, %s4696_s4  ;;  %8656 = vst [vmem:[#allocation164_spill] sm:$0xff] %v6149_v32  ;;  %v4241_v30 = vld [vmem:[%s8398_s0 + $0x140] sm:$0xff]  ;;  %v1897_v32 = vld [vmem:[#allocation2 + $0x1b1] sm:$0xff] }
 0x228   :  { %1516 = vrot.lane.b32.xlu0 %v534_v7, %s4696_s4  ;;  %231 = vst.msk [vmem:[#allocation2 + $0x229] sm:$0xff] %vm15_vm0, %v4241_v30  ;;  %v542_v30 = vld [vmem:[#allocation2 + $0x19a] sm:$0xff] }
 0x229   :  { %v6151_v17 = vpop.permute.xlu1 %1274 }
 0x22a   :  { %8657 = vst [vmem:[#allocation165_spill] sm:$0xff] %v6151_v17  ;;  %v6155_v29 = vpop.permute.xlu0 %1276 }
 0x22b   :  { %1518 = vrot.lane.b32.xlu1 %v535_v52, %s4696_s4  ;;  %8658 = vst [vmem:[#allocation166_spill] sm:$0xff] %v6155_v29  ;;  %v539_v52 = vld [vmem:[#allocation2 + $0x172] sm:$0xff] }
 0x22c   :  { %1520 = vrot.lane.b32.xlu0 %v536_v42, %s4696_s4 }
 0x22d   :  { %v6157_v15 = vpop.permute.xlu1 %1278 }
 0x22e   :  { %8659 = vst [vmem:[#allocation167_spill] sm:$0xff] %v6157_v15  ;;  %v6165_v7 = vpop.permute.xlu0 %1344 }
 0x22f   :  { %1522 = vrot.lane.b32.xlu1 %v537_v4, %s4696_s4  ;;  %v4242_v4 = vld [vmem:[%s8398_s0 + $0x148] sm:$0xff] }
 0x230   :  { %1524 = vrot.lane.b32.xlu0 %v538_v13, %s4696_s4  ;;  %232 = vst.msk [vmem:[#allocation2 + $0x231] sm:$0xff] %vm15_vm0, %v4242_v4 }
 0x231   :  { %v6167_v17 = vpop.permute.xlu1 %1346 }
 0x232   :  { %v6171_v15 = vpop.permute.xlu0 %1348 }
 0x233   :  { %1526 = vrot.lane.b32.xlu1 %v539_v52, %s4696_s4  ;;  %v543_v52 = vld [vmem:[#allocation2 + $0x1a2] sm:$0xff] }
 0x234   :  { %1528 = vrot.lane.b32.xlu0 %v5767_v28, %s4696_s4 }
 0x235   :  { %v6173_v42 = vpop.permute.xlu1 %1350 }
 0x236   :  { %v6183_v13 = vpop.permute.xlu0 %1352 }
 0x237   :  { %1530 = vrot.lane.b32.xlu1 %v5771_v18, %s4696_s4  ;;  %v1899_v18 = vld [vmem:[#allocation2 + $0x1c9] sm:$0xff] }
 0x238   :  { %1532 = vrot.lane.b32.xlu0 %v542_v30, %s4696_s4  ;;  %v6201_v30 = vld [vmem:[#allocation2 + $0x1e1] sm:$0xff] }
 0x239   :  { %v6185_v29 = vpop.permute.xlu1 %1354 }
 0x23a   :  { %v6189_v3 = vpop.permute.xlu0 %1356 }
 0x23b   :  { %1534 = vrot.lane.b32.xlu1 %v543_v52, %s4696_s4  ;;  %8660 = vst [vmem:[#allocation168_spill] sm:$0xff] %v6189_v3  ;;  %v4606_v3 = vld [vmem:[#allocation2 + $0x80] sm:$0xff] }
 0x23c   :  { %2186 = vrot.lane.b32.xlu0 %v1897_v32, %s4689_s8 }
 0x23d   :  { %v6191_v28 = vpop.permute.xlu1 %1358 }
 0x23e   :  { %8661 = vst [vmem:[#allocation169_spill] sm:$0xff] %v6191_v28  ;;  %v6195_v4 = vpop.permute.xlu0 %1360  ;;  %v4603_v28 = vld [vmem:[#allocation2 + $0x60] sm:$0xff] }
 0x23f   :  { %2188 = vrot.lane.b32.xlu1 %v1898_v38, %s4689_s8  ;;  %8662 = vst [vmem:[#allocation170_spill] sm:$0xff] %v6195_v4  ;;  %v1930_v38 = vld [vmem:[#allocation2 + $0x1ba] sm:$0xff]  ;;  %v1962_v4 = vld [vmem:[#allocation2 + $0x1d0] sm:$0xff] }
 0x240   :  { %2190 = vrot.lane.b32.xlu0 %v1899_v18, %s4689_s8 }
 0x241   :  { %v6197_v8 = vpop.permute.xlu1 %1362 }
 0x242   :  { %8663 = vst [vmem:[#allocation171_spill] sm:$0xff] %v6197_v8  ;;  %v6203_v52 = vpop.permute.xlu0 %1364  ;;  %v1961_v8 = vld [vmem:[#allocation2 + $0x1c8] sm:$0xff] }
 0x243   :  { %2192 = vrot.lane.b32.xlu1 %v1900_v27, %s4689_s8  ;;  %8664 = vst [vmem:[#allocation172_spill] sm:$0xff] %v6203_v52 }
 0x244   :  { %2194 = vrot.lane.b32.xlu0 %v6201_v30, %s4689_s8 }
 0x245   :  { %v6205_v46 = vpop.permute.xlu1 %1366 }
 0x246   :  { %8665 = vst [vmem:[#allocation173_spill] sm:$0xff] %v6205_v46  ;;  %v6210_v32 = vpop.permute.xlu0 %1368 }
 0x247   :  { %2314 = vrot.lane.b32.xlu1 %v1929_v45, %s4690_s23  ;;  %8666 = vst [vmem:[#allocation174_spill] sm:$0xff] %v6210_v32  ;;  %v4243_v45 = vld [vmem:[%s8398_s0 + $0x150] sm:$0xff] }
 0x248   :  { %2316 = vrot.lane.b32.xlu0 %v1930_v38, %s4690_s23  ;;  %233 = vst.msk [vmem:[#allocation2 + $0x241] sm:$0xff] %vm15_vm0, %v4243_v45  ;;  %v2025_v38 = vld [vmem:[#allocation2 + $0x1ca] sm:$0xff]  ;;  %v2058_v45 = vld [vmem:[#allocation2 + $0x1e0] sm:$0xff] }
 0x249   :  { %v6212_v49 = vpop.permute.xlu1 %1370 }
 0x24a   :  { %8667 = vst [vmem:[#allocation175_spill] sm:$0xff] %v6212_v49  ;;  %v6216_v52 = vpop.permute.xlu0 %1372 }
 0x24b   :  { %2442 = vrot.lane.b32.xlu1 %v1961_v8, %s4691_s24  ;;  %8668 = vst [vmem:[#allocation176_spill] sm:$0xff] %v6216_v52  ;;  %v256_v52 = vld [vmem:[#allocation2 + $0x8] sm:$0xff] }
 0x24c   :  { %2444 = vrot.lane.b32.xlu0 %v1962_v4, %s4691_s24  ;;  %v2026_v4 = vld [vmem:[#allocation2 + $0x1d2] sm:$0xff] }
 0x24d   :  { %v6218_v33 = vpop.permute.xlu1 %1374 }
 0x24e   :  { %8669 = vst [vmem:[#allocation177_spill] sm:$0xff] %v6218_v33  ;;  %v6226_v49 = vpop.permute.xlu0 %1376 }
 0x24f   :  { %2570 = vrot.lane.b32.xlu1 %v1899_v18, %s4692_s25  ;;  %8670 = vst [vmem:[#allocation178_spill] sm:$0xff] %v6226_v49  ;;  %v4244_v18 = vld [vmem:[%s8398_s0 + $0x158] sm:$0xff] }
 0x250   :  { %2572 = vrot.lane.b32.xlu0 %v1900_v27, %s4692_s25  ;;  %234 = vst.msk [vmem:[#allocation2 + $0x249] sm:$0xff] %vm15_vm0, %v4244_v18  ;;  %v255_v18 = vld [vmem:[#allocation2] sm:$0xff] }
 0x251   :  { %v6228_v32 = vpop.permute.xlu1 %1378 }
 0x252   :  { %8671 = vst [vmem:[#allocation179_spill] sm:$0xff] %v6228_v32  ;;  %v6232_v8 = vpop.permute.xlu0 %1380 }
 0x253   :  { %2698 = vrot.lane.b32.xlu1 %v2025_v38, %s4693_s26  ;;  %8672 = vst [vmem:[#allocation180_spill] sm:$0xff] %v6232_v8  ;;  %v2059_v8 = vld [vmem:[#allocation2 + $0x1e8] sm:$0xff] }
 0x254   :  { %2318 = vrot.lane.b32.xlu0 %v2025_v38, %s4690_s23 }
 0x255   :  { %v6234_v33 = vpop.permute.xlu1 %1382 }
 0x256   :  { %8673 = vst [vmem:[#allocation181_spill] sm:$0xff] %v6234_v33  ;;  %v6242_v32 = vpop.permute.xlu0 %1384 }
 0x257   :  { %2700 = vrot.lane.b32.xlu1 %v2026_v4, %s4693_s26  ;;  %8674 = vst [vmem:[#allocation182_spill] sm:$0xff] %v6242_v32 }
 0x258   :  { %2826 = vrot.lane.b32.xlu0 %v2058_v45, %s4694_s27 }
 0x259   :  { %v6244_v27 = vpop.permute.xlu1 %1386 }
 0x25a   :  { %8675 = vst [vmem:[#allocation183_spill] sm:$0xff] %v6244_v27  ;;  %v6248_v33 = vpop.permute.xlu0 %1388 }
 0x25b   :  { %2320 = vrot.lane.b32.xlu1 %v2026_v4, %s4690_s23  ;;  %8676 = vst [vmem:[#allocation184_spill] sm:$0xff] %v6248_v33  ;;  %v8680_v4 = vld [vmem:[#allocation9_spill] sm:$0xff]  ;;  %v8681_v33 = vld [vmem:[#allocation11_spill] sm:$0xff] }
 0x25c   :  { %2446 = vrot.lane.b32.xlu0 %v2058_v45, %s4691_s24  ;;  %v4597_v45 = vld [vmem:[#allocation2 + $0x18] sm:$0xff] }
 0x25d   :  { %v6250_v49 = vpop.permute.xlu1 %1390  ;;  %v6267_v27 = vsel %vm15_vm0, %v4597_v45, %v8681_v33  ;;  %v4600_v33 = vld [vmem:[#allocation2 + $0x38] sm:$0xff]  ;;  %v8686_v45 = vld [vmem:[#allocation18_spill] sm:$0xff] }
 0x25e   :  { %8677 = vst [vmem:[#allocation185_spill] sm:$0xff] %v6250_v49  ;;  %v6254_v38 = vpop.permute.xlu0 %1392  ;;  %v6263_v49 = vsel %vm15_vm0, %v255_v18, %v8680_v4  ;;  %v4599_v18 = vld [vmem:[#allocation2 + $0x30] sm:$0xff]  ;;  %v8685_v4 = vld [vmem:[#allocation17_spill] sm:$0xff]  ;;  %v6287_v37 = vsel %vm15_vm0, %v4600_v33, %v8686_v45  ;;  %v8691_v33 = vld [vmem:[#allocation23_spill] sm:$0xff] }
 0x25f   :  { %2828 = vrot.lane.b32.xlu1 %v2059_v8, %s4694_s27  ;;  %8678 = vst [vmem:[#allocation186_spill] sm:$0xff] %v6254_v38  ;;  %v8682_v38 = vld [vmem:[#allocation13_spill] sm:$0xff]  ;;  %v6283_v11 = vsel %vm15_vm0, %v4599_v18, %v8685_v4  ;;  %v6305_v45 = vsel %vm15_vm0, %v4604_v48, %v8691_v33  ;;  %v4608_v48 = vld [vmem:[#allocation2 + $0x98] sm:$0xff] }
 0x260   :  { %2954 = vrot.lane.b32.xlu0 %v6201_v30, %s4695_s7  ;;  %v6271_v46 = vsel %vm15_vm0, %v256_v52, %v8682_v38  ;;  %v4601_v52 = vld [vmem:[#allocation2 + $0x48] sm:$0xff]  ;;  %v8687_v38 = vld [vmem:[#allocation19_spill] sm:$0xff]  ;;  %8692 = vst [vmem:[#allocation13_spill] sm:$0xff] %v6305_v45  ;;  %v4615_v45 = vld [vmem:[#allocation2 + $0xf0] sm:$0xff] }
 0x261   :  { %v6256_v32 = vpop.permute.xlu1 %1394  ;;  %v6291_v60 = vsel %vm15_vm0, %v4601_v52, %v8687_v38  ;;  %v8690_v18 = vld [vmem:[#allocation21_spill] sm:$0xff]  ;;  %v8699_v33 = vld [vmem:[#allocation31_spill] sm:$0xff] }
 0x262   :  { %8679 = vst [vmem:[#allocation187_spill] sm:$0xff] %v6256_v32  ;;  %v4598_v32 = vld [vmem:[#allocation2 + $0x20] sm:$0xff]  ;;  %v6277_v12 = vpop.permute.xlu0 %1396  ;;  %v6301_v4 = vsel %vm15_vm0, %v4603_v28, %v8690_v18  ;;  %v8693_v52 = vld [vmem:[#allocation25_spill] sm:$0xff]  ;;  %v4607_v28 = vld [vmem:[#allocation2 + $0x90] sm:$0xff]  ;;  %v6323_v57 = vsel %vm15_vm0, %v4608_v48, %v8699_v33 }
 0x263   :  { %2448 = vrot.lane.b32.xlu1 %v2059_v8, %s4691_s24  ;;  %v6275_v36 = vsel %vm15_vm0, %v4598_v32, %v8683_v50  ;;  %8684 = vst [vmem:[#allocation9_spill] sm:$0xff] %v6277_v12  ;;  %v6279_v8 = vld [vmem:[#allocation2 + $0x1e9] sm:$0xff]  ;;  %v8688_v32 = vld [vmem:[#allocation20_spill] sm:$0xff]  ;;  %v6309_v38 = vsel %vm15_vm0, %v4605_v51, %v8693_v52  ;;  %8700 = vst [vmem:[#allocation19_spill] sm:$0xff] %v6323_v57 }
 0x264   :  { %v4602_v50 = vld [vmem:[#allocation2 + $0x50] sm:$0xff]  ;;  %8694 = vst [vmem:[#allocation15_spill] sm:$0xff] %v6309_v38  ;;  %2574 = vrot.lane.b32.xlu0 %v6201_v30, %s4692_s25  ;;  %v8697_v18 = vld [vmem:[#allocation29_spill] sm:$0xff]  ;;  %v8707_v57 = vld [vmem:[#allocation39_spill] sm:$0xff] }
 0x265   :  { %v6295_v12 = vsel %vm15_vm0, %v4602_v50, %v8688_v32  ;;  %v6297_v47 = vpop.permute.xlu1 %1398  ;;  %v8695_v50 = vld [vmem:[#allocation27_spill] sm:$0xff]  ;;  %v4609_v51 = vld [vmem:[#allocation2 + $0xa8] sm:$0xff] }
 0x266   :  { %8689 = vst [vmem:[#allocation11_spill] sm:$0xff] %v6297_v47  ;;  %v6313_v32 = vsel %vm15_vm0, %v4606_v3, %v8695_v50  ;;  %v6319_v47 = vsel %vm15_vm0, %v4607_v28, %v8697_v18  ;;  %v8701_v52 = vld [vmem:[#allocation33_spill] sm:$0xff]  ;;  %v4610_v3 = vld [vmem:[#allocation2 + $0xb0] sm:$0xff]  ;;  %v8703_v50 = vld [vmem:[#allocation35_spill] sm:$0xff]  ;;  %v6353_v0 = vpop.permute.xlu0 %1400 }
 0x267   :  { %8696 = vst [vmem:[#allocation17_spill] sm:$0xff] %v6313_v32  ;;  %8698 = vst [vmem:[#allocation18_spill] sm:$0xff] %v6319_v47  ;;  %v6327_v38 = vsel %vm15_vm0, %v4609_v51, %v8701_v52  ;;  %v6331_v32 = vsel %vm15_vm0, %v4610_v3, %v8703_v50  ;;  %2956 = vrot.lane.b32.xlu1 %v6279_v8, %s4695_s7  ;;  %v6335_v30 = vld [vmem:[#allocation2 + $0x1e2] sm:$0xff]  ;;  %v4613_v52 = vld [vmem:[#allocation2 + $0xd8] sm:$0xff] }
 0x268   :  { %8702 = vst [vmem:[#allocation20_spill] sm:$0xff] %v6327_v38  ;;  %8704 = vst [vmem:[#allocation21_spill] sm:$0xff] %v6331_v32  ;;  %v4611_v28 = vld [vmem:[#allocation2 + $0xc0] sm:$0xff]  ;;  %v8705_v18 = vld [vmem:[#allocation37_spill] sm:$0xff]  ;;  %3082 = vrot.lane.b32.xlu0 %v6335_v30, %s4696_s4 }
 0x269   :  { %v6339_v48 = vsel %vm15_vm0, %v4611_v28, %v8705_v18  ;;  %v4612_v33 = vld [vmem:[#allocation2 + $0xc8] sm:$0xff]  ;;  %v4614_v50 = vld [vmem:[#allocation2 + $0xe0] sm:$0xff]  ;;  %v8711_v32 = vld [vmem:[#allocation43_spill] sm:$0xff]  ;;  %8713 = vst [vmem:[#allocation31_spill] sm:$0xff] %v6353_v0  ;;  %v6371_v0 = vpop.permute.xlu1 %1402 }
 0x26a   :  { %8706 = vst [vmem:[#allocation23_spill] sm:$0xff] %v6339_v48  ;;  %v6343_v51 = vsel %vm15_vm0, %v4612_v33, %v8707_v57  ;;  %v8709_v38 = vld [vmem:[#allocation41_spill] sm:$0xff]  ;;  %v6351_v47 = vsel %vm15_vm0, %v4614_v50, %v8711_v32  ;;  %v4616_v48 = vld [vmem:[#allocation2 + $0xf8] sm:$0xff]  ;;  %8720 = vst [vmem:[#allocation37_spill] sm:$0xff] %v6371_v0 }
 0x26b   :  { %8708 = vst [vmem:[#allocation25_spill] sm:$0xff] %v6343_v51  ;;  %v6347_v3 = vsel %vm15_vm0, %v4613_v52, %v8709_v38  ;;  %8712 = vst [vmem:[#allocation29_spill] sm:$0xff] %v6351_v47  ;;  %v8714_v28 = vld [vmem:[#allocation45_spill] sm:$0xff]  ;;  %v8716_v57 = vld [vmem:[#allocation47_spill] sm:$0xff]  ;;  %2576 = vrot.lane.b32.xlu1 %v6279_v8, %s4692_s25 }
 0x26c   :  { %8710 = vst [vmem:[#allocation27_spill] sm:$0xff] %v6347_v3  ;;  %v6357_v18 = vsel %vm15_vm0, %v4615_v45, %v8714_v28  ;;  %v6361_v33 = vsel %vm15_vm0, %v4616_v48, %v8716_v57  ;;  %v4617_v51 = vld [vmem:[#allocation2 + $0x108] sm:$0xff]  ;;  %v4618_v3 = vld [vmem:[#allocation2 + $0x110] sm:$0xff]  ;;  %v8719_v32 = vld [vmem:[#allocation51_spill] sm:$0xff]  ;;  %2702 = vrot.lane.b32.xlu0 %v6335_v30, %s4693_s26 }
 0x26d   :  { %8715 = vst [vmem:[#allocation33_spill] sm:$0xff] %v6357_v18  ;;  %8717 = vst [vmem:[#allocation35_spill] sm:$0xff] %v6361_v33  ;;  %v8718_v38 = vld [vmem:[#allocation49_spill] sm:$0xff]  ;;  %v6369_v50 = vsel %vm15_vm0, %v4618_v3, %v8719_v32  ;;  %v4619_v47 = vld [vmem:[#allocation2 + $0x120] sm:$0xff] }
 0x26e   :  { %v6365_v52 = vsel %vm15_vm0, %v4617_v51, %v8718_v38  ;;  %v8721_v45 = vld [vmem:[#allocation53_spill] sm:$0xff]  ;;  %v8723_v48 = vld [vmem:[#allocation55_spill] sm:$0xff]  ;;  %v4622_v3 = vld [vmem:[#allocation2 + $0x140] sm:$0xff] }
 0x26f   :  { %v6375_v28 = vsel %vm15_vm0, %v4619_v47, %v8721_v45  ;;  %v4620_v18 = vld [vmem:[#allocation2 + $0x128] sm:$0xff]  ;;  %v4621_v33 = vld [vmem:[#allocation2 + $0x138] sm:$0xff]  ;;  %v4623_v47 = vld [vmem:[#allocation2 + $0x150] sm:$0xff] }
 0x270   :  { %8722 = vst [vmem:[#allocation39_spill] sm:$0xff] %v6375_v28  ;;  %v6379_v57 = vsel %vm15_vm0, %v4620_v18, %v8723_v48  ;;  %v8724_v51 = vld [vmem:[#allocation57_spill] sm:$0xff]  ;;  %v8726_v32 = vld [vmem:[#allocation59_spill] sm:$0xff]  ;;  %2196 = vrot.lane.b32.xlu0 %v6279_v8, %s4689_s8 }
 0x271   :  { %v6383_v38 = vsel %vm15_vm0, %v4621_v33, %v8724_v51  ;;  %v6389_v0 = vsel %vm15_vm0, %v4622_v3, %v8726_v32  ;;  %v8728_v45 = vld [vmem:[#allocation61_spill] sm:$0xff]  ;;  %v4624_v33 = vld [vmem:[#allocation2 + $0x158] sm:$0xff] }
 0x272   :  { %8725 = vst [vmem:[#allocation41_spill] sm:$0xff] %v6383_v38  ;;  %8727 = vst [vmem:[#allocation43_spill] sm:$0xff] %v6389_v0  ;;  %v6393_v28 = vsel %vm15_vm0, %v4623_v47, %v8728_v45  ;;  %v8730_v18 = vld [vmem:[#allocation69_spill] sm:$0xff]  ;;  %v8731_v51 = vld [vmem:[#allocation63_spill] sm:$0xff]  ;;  %v6409_v45 = vpop.permute.xlu0 %1404 }
 0x273   :  { %8729 = vst [vmem:[#allocation45_spill] sm:$0xff] %v6393_v28  ;;  %v1601_v48 = vsel %vm1600_vm1, %v6263_v49, %v8730_v18  ;;  %v6402_v38 = vsel %vm15_vm0, %v4624_v33, %v8731_v51  ;;  %v8732_v3 = vld [vmem:[#allocation71_spill] sm:$0xff]  ;;  %8733 = vst [vmem:[#allocation47_spill] sm:$0xff] %v6409_v45  ;;  %v6411_v49 = vld [vmem:[#allocation2 + $0x1ea] sm:$0xff] }
 0x274   :  { %v1602_v32 = vsel %vm1600_vm1, %v6271_v46, %v8732_v3  ;;  %v1634_v47 = vsel %vm1633_vm2, %v1601_v48, %v5619_v53  ;;  %v4625_v18 = vld [vmem:[#allocation2 + $0x168] sm:$0xff]  ;;  %v6421_v46 = vpop.permute.xlu1 %1406  ;;  %v4626_v53 = vld [vmem:[#allocation2 + $0x170] sm:$0xff]  ;;  %v8735_v48 = vld [vmem:[#allocation67_spill] sm:$0xff]  ;;  %3084 = vrot.lane.b32.xlu1 %v6411_v49, %s4696_s4  ;;  %2704 = vrot.lane.b32.xlu0 %v6411_v49, %s4693_s26 }
 0x275   :  { %v8734_v28 = vld [vmem:[#allocation65_spill] sm:$0xff]  ;;  %v1635_v33 = vsel %vm1633_vm2, %v1602_v32, %v5621_v54  ;;  %v1667_v51 = vsel %vm1666_vm3, %v1634_v47, %v5751_v24  ;;  %v6425_v3 = vsel %vm15_vm0, %v4626_v53, %v8735_v48  ;;  %v4245_v54 = vld [vmem:[%s8398_s0 + $0x160] sm:$0xff] }
 0x276   :  { %v6415_v0 = vsel %vm15_vm0, %v4625_v18, %v8734_v28  ;;  %v1668_v45 = vsel %vm1666_vm3, %v1635_v33, %v5753_v19  ;;  %v1700_v28 = vsel %vm1699_vm4, %v1667_v51, %v5883_v41  ;;  %v8736_v24 = vld [vmem:[#allocation73_spill] sm:$0xff]  ;;  %235 = vst.msk [vmem:[#allocation2 + $0x259] sm:$0xff] %vm15_vm0, %v4245_v54  ;;  %v8737_v41 = vld [vmem:[#allocation74_spill] sm:$0xff] }
 0x277   :  { %v1603_v32 = vsel %vm1600_vm1, %v6267_v27, %v8736_v24  ;;  %v1701_v47 = vsel %vm1699_vm4, %v1668_v45, %v5885_v10  ;;  %v1733_v19 = vsel %vm1732_vm5, %v1700_v28, %v6051_v5  ;;  %v1604_v18 = vsel %vm1600_vm1, %v6275_v36, %v8737_v41  ;;  %v1473_v5 = vpop.permute.xlu0 %1472 }
 0x278   :  { %v1636_v33 = vsel %vm1633_vm2, %v1603_v32, %v5627_v55  ;;  %v1734_v27 = vsel %vm1732_vm5, %v1701_v47, %v6053_v35  ;;  %v1766_v10 = vsel %vm1765_vm6, %v1733_v19, %v6165_v7  ;;  %v1637_v45 = vsel %vm1633_vm2, %v1604_v18, %v5629_v56  ;;  %v1475_v36 = vpop.permute.xlu1 %1474  ;;  %v8738_v56 = vld [vmem:[#allocation75_spill] sm:$0xff]  ;;  %2322 = vrot.lane.b32.xlu1 %v6335_v30, %s4690_s23 }
 0x279   :  { %v1669_v51 = vsel %vm1666_vm3, %v1636_v33, %v5759_v26  ;;  %v1767_v53 = vsel %vm1765_vm6, %v1734_v27, %v6167_v17  ;;  %v1799_v48 = vsel %vm1798_vm7, %v1766_v10, %v1473_v5  ;;  %v1670_v55 = vsel %vm1666_vm3, %v1637_v45, %v5761_v21  ;;  %2324 = vrot.lane.b32.xlu0 %v6411_v49, %s4690_s23  ;;  %v8743_v45 = vld [vmem:[#allocation101_spill] sm:$0xff] }
 0x27a   :  { %v1702_v35 = vsel %vm1699_vm4, %v1669_v51, %v5891_v14  ;;  %v1800_v7 = vsel %vm1798_vm7, %v1767_v53, %v1475_v36  ;;  %4441 = vmatprep.mubr.msk.f32.mxu0 %vm1831_vm8, %v1799_v48  ;;  %v1605_v26 = vsel %vm1600_vm1, %v6283_v11, %v8738_v56  ;;  %v1703_v17 = vsel %vm1699_vm4, %v1670_v55, %v5893_v9  ;;  %v8739_v14 = vld [vmem:[#allocation76_spill] sm:$0xff]  ;;  %v8744_v53 = vld [vmem:[#allocation143_spill] sm:$0xff]  ;;  %v8746_v48 = vld [vmem:[#allocation102_spill] sm:$0xff] }
 0x27b   :  { %v1735_v21 = vsel %vm1732_vm5, %v1702_v35, %v6057_v34  ;;  %4442 = vmatmul.mubr.msk.f32.vlgmr.msra.gmra.mrb[0].mxu0 %vm1831_vm8, %v1800_v7  ;;  %v1606_v8 = vsel %vm1600_vm1, %v6287_v37, %v8739_v14  ;;  %v1638_v28 = vsel %vm1633_vm2, %v1605_v26, %v5637_v58  ;;  %v1736_v11 = vsel %vm1732_vm5, %v1703_v17, %v6059_v31  ;;  %v1477_v54 = vpop.permute.xlu0 %1476  ;;  %v2060_v34 = vld [vmem:[#allocation2 + $0x1f8] sm:$0xff]  ;;  %v4246_v31 = vld [vmem:[%s8398_s0 + $0x168] sm:$0xff]  ;;  %v8747_v35 = vld [vmem:[#allocation10_spill] sm:$0xff] }
 0x27c   :  { %v1768_v9 = vsel %vm1765_vm6, %v1735_v21, %v6171_v15  ;;  %v1639_v30 = vsel %vm1633_vm2, %v1606_v8, %v5641_v61  ;;  %v1671_v24 = vsel %vm1666_vm3, %v1638_v28, %v5769_v23  ;;  %v1769_v37 = vsel %vm1765_vm6, %v1736_v11, %v6173_v42  ;;  %v1479_v58 = vpop.permute.xlu1 %1478  ;;  %236 = vst.msk [vmem:[#allocation2 + $0x261] sm:$0xff] %vm15_vm0, %v4246_v31  ;;  %v8740_v23 = vld [vmem:[#allocation77_spill] sm:$0xff]  ;;  %v8749_v21 = vld [vmem:[#allocation12_spill] sm:$0xff]  ;;  %v8750_v8 = vld [vmem:[#allocation62_spill] sm:$0xff] }
 0x27d   :  { %v1801_v32 = vsel %vm1798_vm7, %v1768_v9, %v1477_v54  ;;  %v1672_v15 = vsel %vm1666_vm3, %v1639_v30, %v5773_v20  ;;  %v1704_v47 = vsel %vm1699_vm4, %v1671_v24, %v5899_v16  ;;  %v1802_v61 = vsel %vm1798_vm7, %v1769_v37, %v1479_v58  ;;  %2830 = vrot.lane.b32.xlu1 %v2060_v34, %s4694_s27  ;;  %v8741_v16 = vld [vmem:[#allocation78_spill] sm:$0xff]  ;;  %v8748_v56 = vld [vmem:[#allocation169_spill] sm:$0xff]  ;;  %v8751_v9 = vld [vmem:[#allocation79_spill] sm:$0xff] }
 0x27e   :  { %4444 = vmatprep.mubr.msk.f32.mxu0 %vm1831_vm8, %v1801_v32  ;;  %v1607_v42 = vsel %vm1600_vm1, %v6291_v60, %v8740_v23  ;;  %v1705_v19 = vsel %vm1699_vm4, %v1672_v15, %v5901_v40  ;;  %v1737_v20 = vsel %vm1732_vm5, %v1704_v47, %v6069_v43  ;;  %v1608_v41 = vsel %vm1600_vm1, %v6295_v12, %v8741_v16  ;;  %v8752_v54 = vld [vmem:[#allocation15_spill] sm:$0xff]  ;;  %v8753_v30 = vld [vmem:[#allocation64_spill] sm:$0xff]  ;;  %v8756_v31 = vld [vmem:[#allocation17_spill] sm:$0xff] }
 0x27f   :  { %4445 = vmatmul.mubr.msk.f32.gmra.mrb[2].mxu0 %vm1831_vm8, %v1802_v61  ;;  %v1640_v18 = vsel %vm1633_vm2, %v1607_v42, %v5647_v62  ;;  %v1738_v60 = vsel %vm1732_vm5, %v1705_v19, %v6071_v6  ;;  %v1770_v40 = vsel %vm1765_vm6, %v1737_v20, %v6183_v13  ;;  %v1481_v33 = vpop.permute.xlu0 %1480  ;;  %v1641_v43 = vsel %vm1633_vm2, %v1608_v41, %v5649_v63  ;;  %v8754_v37 = vld [vmem:[#allocation144_spill] sm:$0xff]  ;;  %v8757_v47 = vld [vmem:[#allocation103_spill] sm:$0xff]  ;;  %v8758_v23 = vld [vmem:[#allocation145_spill] sm:$0xff] }
 0x280   :  { %v1673_v27 = vsel %vm1666_vm3, %v1640_v18, %v5779_v25  ;;  %v1771_v10 = vsel %vm1765_vm6, %v1738_v60, %v6185_v29  ;;  %v1803_v12 = vsel %vm1798_vm7, %v1770_v40, %v1481_v33  ;;  %v1483_v5 = vpop.permute.xlu1 %1482  ;;  %v1674_v62 = vsel %vm1666_vm3, %v1641_v43, %v5781_v22  ;;  %v8742_v29 = vld [vmem:[#allocation13_spill] sm:$0xff]  ;;  %v8755_v58 = vld [vmem:[#allocation80_spill] sm:$0xff]  ;;  %v8759_v19 = vld [vmem:[#allocation170_spill] sm:$0xff] }
 0x281   :  { %v1706_v6 = vsel %vm1699_vm4, %v1673_v27, %v5913_v59  ;;  %v1804_v13 = vsel %vm1798_vm7, %v1771_v10, %v1483_v5  ;;  %4447 = vmatprep.mubr.msk.f32.mxu0 %vm1831_vm8, %v1803_v12  ;;  %v1609_v63 = vsel %vm1600_vm1, %v6301_v4, %v5523_v2  ;;  %v1707_v25 = vsel %vm1699_vm4, %v1674_v62, %v5915_v39  ;;  %v2061_v59 = vld [vmem:[#allocation2 + $0x200] sm:$0xff]  ;;  %v8761_v60 = vld [vmem:[#allocation14_spill] sm:$0xff]  ;;  %v8762_v33 = vld [vmem:[#allocation171_spill] sm:$0xff] }
 0x282   :  { %v1739_v22 = vsel %vm1732_vm5, %v1706_v6, %v6075_v44  ;;  %2450 = vrot.lane.b32.xlu1 %v2060_v34, %s4691_s24  ;;  %v1610_v49 = vsel %vm1600_vm1, %v8742_v29, %v5525_v1  ;;  %v1642_v51 = vsel %vm1633_vm2, %v1609_v63, %v8743_v45  ;;  %v1740_v2 = vsel %vm1732_vm5, %v1707_v25, %v8744_v53  ;;  %v8745_v4 = vld [vmem:[#allocation168_spill] sm:$0xff]  ;;  %v8764_v62 = vld [vmem:[#allocation66_spill] sm:$0xff]  ;;  %v8765_v63 = vld [vmem:[#allocation81_spill] sm:$0xff] }
 0x283   :  { %4448 = vmatmul.mubr.msk.f32.gmra.mrb[4].mxu0 %vm1831_vm8, %v1804_v13  ;;  %v1772_v39 = vsel %vm1765_vm6, %v1739_v22, %v8745_v4  ;;  %v1485_v36 = vpop.permute.xlu0 %1484  ;;  %v6559_v44 = vld [vmem:[#allocation2 + $0x1f9] sm:$0xff]  ;;  %v1643_v55 = vsel %vm1633_vm2, %v1610_v49, %v8746_v48  ;;  %v1675_v7 = vsel %vm1666_vm3, %v1642_v51, %v8747_v35  ;;  %v1773_v1 = vsel %vm1765_vm6, %v1740_v2, %v8748_v56  ;;  %v8766_v25 = vld [vmem:[#allocation18_spill] sm:$0xff]  ;;  %v6618_v53 = vld [vmem:[#allocation2 + $0x201] sm:$0xff] }
 0x284   :  { %v1805_v26 = vsel %vm1798_vm7, %v1772_v39, %v1485_v36  ;;  %v1487_v17 = vpop.permute.xlu1 %1486  ;;  %v1676_v14 = vsel %vm1666_vm3, %v1643_v55, %v8749_v21  ;;  %v1708_v28 = vsel %vm1699_vm4, %v1675_v7, %v8750_v8  ;;  %2832 = vrot.lane.b32.xlu0 %v2061_v59, %s4694_s27  ;;  %v1611_v34 = vsel %vm1600_vm1, %v8752_v54, %v8751_v9  ;;  %v8760_v41 = vld [vmem:[#allocation104_spill] sm:$0xff]  ;;  %v8768_v45 = vld [vmem:[#allocation146_spill] sm:$0xff]  ;;  %v8770_v2 = vld [vmem:[#allocation19_spill] sm:$0xff] }
 0x285   :  { %v1806_v11 = vsel %vm1798_vm7, %v1773_v1, %v1487_v17  ;;  %4450 = vmatprep.mubr.msk.f32.mxu0 %vm1831_vm8, %v1805_v26  ;;  %v1709_v24 = vsel %vm1699_vm4, %v1676_v14, %v8753_v30  ;;  %v1741_v32 = vsel %vm1732_vm5, %v1708_v28, %v8754_v37  ;;  %v1612_v15 = vsel %vm1600_vm1, %v8756_v31, %v8755_v58  ;;  %v8763_v12 = vld [vmem:[#allocation16_spill] sm:$0xff]  ;;  %v8771_v39 = vld [vmem:[#allocation105_spill] sm:$0xff]  ;;  %v8772_v48 = vld [vmem:[#allocation147_spill] sm:$0xff] }
 0x286   :  { %2958 = vrot.lane.b32.xlu1 %v6559_v44, %s4695_s7  ;;  %v1644_v61 = vsel %vm1633_vm2, %v1611_v34, %v8757_v47  ;;  %v1742_v42 = vsel %vm1732_vm5, %v1709_v24, %v8758_v23  ;;  %v1774_v20 = vsel %vm1765_vm6, %v1741_v32, %v8759_v19  ;;  %v1645_v18 = vsel %vm1633_vm2, %v1612_v15, %v8760_v41  ;;  %v8767_v29 = vld [vmem:[#allocation68_spill] sm:$0xff]  ;;  %v8774_v26 = vld [vmem:[#allocation106_spill] sm:$0xff]  ;;  %v8776_v8 = vld [vmem:[#allocation173_spill] sm:$0xff] }
 0x287   :  { %4451 = vmatmul.mubr.msk.f32.gmra.mrb[6].mxu0 %vm1831_vm8, %v1806_v11  ;;  %v1489_v16 = vpop.permute.xlu0 %1488  ;;  %v1677_v40 = vsel %vm1666_vm3, %v1644_v61, %v8761_v60  ;;  %v1775_v43 = vsel %vm1765_vm6, %v1742_v42, %v8762_v33  ;;  %v1678_v5 = vsel %vm1666_vm3, %v1645_v18, %v8763_v12  ;;  %v1613_v22 = vsel %vm1600_vm1, %v8766_v25, %v8765_v63  ;;  %v8773_v35 = vld [vmem:[#allocation172_spill] sm:$0xff]  ;;  %v8775_v21 = vld [vmem:[#allocation22_spill] sm:$0xff]  ;;  %v8779_v32 = vld [vmem:[#allocation83_spill] sm:$0xff] }
 0x288   :  { %v1807_v27 = vsel %vm1798_vm7, %v1774_v20, %v1489_v16  ;;  %v1491_v10 = vpop.permute.xlu1 %1490  ;;  %v1710_v6 = vsel %vm1699_vm4, %v1677_v40, %v8764_v62  ;;  %2452 = vrot.lane.b32.xlu0 %v2061_v59, %s4691_s24  ;;  %v1711_v49 = vsel %vm1699_vm4, %v1678_v5, %v8767_v29  ;;  %v8769_v59 = vld [vmem:[#allocation82_spill] sm:$0xff]  ;;  %v1646_v36 = vsel %vm1633_vm2, %v1613_v22, %v8771_v39  ;;  %v6629_v1 = vld [vmem:[#allocation2 + $0x1fa] sm:$0xff]  ;;  %v8784_v19 = vld [vmem:[#allocation21_spill] sm:$0xff] }
 0x289   :  { %v1808_v13 = vsel %vm1798_vm7, %v1775_v43, %v1491_v10  ;;  %4453 = vmatprep.mubr.msk.f32.mxu0 %vm1831_vm8, %v1807_v27  ;;  %v1743_v51 = vsel %vm1732_vm5, %v1710_v6, %v8768_v45  ;;  %v1614_v4 = vsel %vm1600_vm1, %v8770_v2, %v8769_v59  ;;  %v1744_v55 = vsel %vm1732_vm5, %v1711_v49, %v8772_v48  ;;  %v8777_v54 = vld [vmem:[#allocation24_spill] sm:$0xff]  ;;  %v8778_v30 = vld [vmem:[#allocation70_spill] sm:$0xff]  ;;  %v8785_v16 = vld [vmem:[#allocation107_spill] sm:$0xff] }
 0x28a   :  { %2578 = vrot.lane.b32.xlu1 %v6559_v44, %s4692_s25  ;;  %v1776_v7 = vsel %vm1765_vm6, %v1743_v51, %v8773_v35  ;;  %v1647_v17 = vsel %vm1633_vm2, %v1614_v4, %v8774_v26  ;;  %v1679_v14 = vsel %vm1666_vm3, %v1646_v36, %v8775_v21  ;;  %v1777_v28 = vsel %vm1765_vm6, %v1744_v55, %v8776_v8  ;;  %v8780_v58 = vld [vmem:[#allocation20_spill] sm:$0xff]  ;;  %v8786_v18 = vld [vmem:[#allocation149_spill] sm:$0xff]  ;;  %v8787_v40 = vld [vmem:[#allocation174_spill] sm:$0xff] }
 0x28b   :  { %4454 = vmatmul.mubr.msk.f32.gmra.mrb[8].mxu0 %vm1831_vm8, %v1808_v13  ;;  %v1493_v56 = vpop.permute.xlu0 %1492  ;;  %v1680_v34 = vsel %vm1666_vm3, %v1647_v17, %v8777_v54  ;;  %v1712_v24 = vsel %vm1699_vm4, %v1679_v14, %v8778_v30  ;;  %v1615_v31 = vsel %vm1600_vm1, %v8780_v58, %v8779_v32  ;;  %v8781_v15 = vld [vmem:[#allocation72_spill] sm:$0xff]  ;;  %v8789_v12 = vld [vmem:[#allocation26_spill] sm:$0xff]  ;;  %v8790_v62 = vld [vmem:[#allocation175_spill] sm:$0xff] }
 0x28c   :  { %v1809_v11 = vsel %vm1798_vm7, %v1776_v7, %v1493_v56  ;;  %v1495_v9 = vpop.permute.xlu1 %1494  ;;  %2960 = vrot.lane.b32.xlu0 %v6618_v53, %s4695_s7  ;;  %v1713_v47 = vsel %vm1699_vm4, %v1680_v34, %v8781_v15  ;;  %v8782_v61 = vld [vmem:[#allocation148_spill] sm:$0xff]  ;;  %v1648_v41 = vsel %vm1633_vm2, %v1615_v31, %v8785_v16  ;;  %v8792_v29 = vld [vmem:[#allocation125_spill] sm:$0xff]  ;;  %v8794_v59 = vld [vmem:[#allocation23_spill] sm:$0xff] }
 0x28d   :  { %v1810_v37 = vsel %vm1798_vm7, %v1777_v28, %v1495_v9  ;;  %4456 = vmatprep.mubr.msk.f32.mxu0 %vm1831_vm8, %v1809_v11  ;;  %v1745_v23 = vsel %vm1732_vm5, %v1712_v24, %v8782_v61  ;;  %v8783_v42 = vld [vmem:[#allocation84_spill] sm:$0xff]  ;;  %v1746_v60 = vsel %vm1732_vm5, %v1713_v47, %v8786_v18  ;;  %v1681_v5 = vsel %vm1666_vm3, %v1648_v41, %v8789_v12  ;;  %v8793_v51 = vld [vmem:[#allocation85_spill] sm:$0xff]  ;;  %v8795_v4 = vld [vmem:[#allocation126_spill] sm:$0xff] }
 0x28e   :  { %3086 = vrot.lane.b32.xlu1 %v6629_v1, %s4696_s4  ;;  %v1616_v20 = vsel %vm1600_vm1, %v8784_v19, %v8783_v42  ;;  %v1778_v33 = vsel %vm1765_vm6, %v1745_v23, %v8787_v40  ;;  %v8788_v27 = vld [vmem:[#allocation108_spill] sm:$0xff]  ;;  %v1779_v6 = vsel %vm1765_vm6, %v1746_v60, %v8790_v62  ;;  %v1714_v49 = vsel %vm1699_vm4, %v1681_v5, %v8792_v29  ;;  %v8796_v36 = vld [vmem:[#allocation150_spill] sm:$0xff]  ;;  %v8798_v35 = vld [vmem:[#allocation25_spill] sm:$0xff] }
 0x28f   :  { %4457 = vmatmul.mubr.msk.f32.gmra.mrb[10].mxu0 %vm1831_vm8, %v1810_v37  ;;  %v1497_v43 = vpop.permute.xlu0 %1496  ;;  %v1649_v10 = vsel %vm1633_vm2, %v1616_v20, %v8788_v27  ;;  %v8791_v25 = vld [vmem:[#allocation28_spill] sm:$0xff]  ;;  %v1617_v2 = vsel %vm1600_vm1, %v8794_v59, %v8793_v51  ;;  %v1747_v48 = vsel %vm1732_vm5, %v1714_v49, %v8796_v36  ;;  %v8797_v55 = vld [vmem:[#allocation86_spill] sm:$0xff]  ;;  %v8799_v7 = vld [vmem:[#allocation109_spill] sm:$0xff] }
 0x290   :  { %v1811_v13 = vsel %vm1798_vm7, %v1778_v33, %v1497_v43  ;;  %v1499_v63 = vpop.permute.xlu1 %1498  ;;  %v1682_v22 = vsel %vm1666_vm3, %v1649_v10, %v8791_v25  ;;  %2198 = vrot.lane.b32.xlu0 %v6559_v44, %s4689_s8  ;;  %v1618_v44 = vsel %vm1600_vm1, %v8798_v35, %v8797_v55  ;;  %v1650_v56 = vsel %vm1633_vm2, %v1617_v2, %v8799_v7  ;;  %v8800_v26 = vld [vmem:[#allocation151_spill] sm:$0xff]  ;;  %v8801_v21 = vld [vmem:[#allocation176_spill] sm:$0xff]  ;;  %v8802_v11 = vld [vmem:[#allocation110_spill] sm:$0xff] }
 0x291   :  { %v1812_v45 = vsel %vm1798_vm7, %v1779_v6, %v1499_v63  ;;  %4459 = vmatprep.mubr.msk.f32.mxu0 %vm1831_vm8, %v1811_v13  ;;  %v1715_v39 = vsel %vm1699_vm4, %v1682_v22, %v8795_v4  ;;  %v1780_v14 = vsel %vm1765_vm6, %v1747_v48, %v8801_v21  ;;  %v6699_v28 = vld [vmem:[#allocation2 + $0x202] sm:$0xff]  ;;  %v1651_v9 = vsel %vm1633_vm2, %v1618_v44, %v8802_v11  ;;  %v8803_v54 = vld [vmem:[#allocation30_spill] sm:$0xff]  ;;  %v8806_v15 = vld [vmem:[#allocation127_spill] sm:$0xff] }
 0x292   :  { %2580 = vrot.lane.b32.xlu1 %v6618_v53, %s4692_s25  ;;  %v1748_v17 = vsel %vm1732_vm5, %v1715_v39, %v8800_v26  ;;  %v1683_v34 = vsel %vm1666_vm3, %v1650_v56, %v8803_v54  ;;  %v8804_v30 = vld [vmem:[#allocation177_spill] sm:$0xff]  ;;  %v8805_v58 = vld [vmem:[#allocation32_spill] sm:$0xff]  ;;  %v4247_v23 = vld [vmem:[%s8398_s0 + $0x170] sm:$0xff] }
 0x293   :  { %4460 = vmatmul.mubr.msk.f32.gmra.mrb[12].mxu0 %vm1831_vm8, %v1812_v45  ;;  %v1501_v8 = vpop.permute.xlu0 %1500  ;;  %v1781_v24 = vsel %vm1765_vm6, %v1748_v17, %v8804_v30  ;;  %v1684_v31 = vsel %vm1666_vm3, %v1651_v9, %v8805_v58  ;;  %v1716_v47 = vsel %vm1699_vm4, %v1683_v34, %v8806_v15  ;;  %v8807_v42 = vld [vmem:[#allocation87_spill] sm:$0xff]  ;;  %v8809_v16 = vld [vmem:[#allocation128_spill] sm:$0xff]  ;;  %237 = vst.msk [vmem:[#allocation2 + $0x271] sm:$0xff] %vm15_vm0, %v4247_v23  ;;  %v8812_v33 = vld [vmem:[#allocation29_spill] sm:$0xff] }
 0x294   :  { %v1813_v37 = vsel %vm1798_vm7, %v1780_v14, %v1501_v8  ;;  %v1503_v32 = vpop.permute.xlu1 %1502  ;;  %2706 = vrot.lane.b32.xlu0 %v6629_v1, %s4693_s26  ;;  %v8808_v19 = vld [vmem:[#allocation27_spill] sm:$0xff]  ;;  %v1717_v41 = vsel %vm1699_vm4, %v1684_v31, %v8809_v16  ;;  %v8810_v18 = vld [vmem:[#allocation152_spill] sm:$0xff]  ;;  %v8814_v12 = vld [vmem:[#allocation153_spill] sm:$0xff] }
 0x295   :  { %v1814_v61 = vsel %vm1798_vm7, %v1781_v24, %v1503_v32  ;;  %4462 = vmatprep.mubr.msk.f32.mxu0 %vm1831_vm8, %v1813_v37  ;;  %v1619_v20 = vsel %vm1600_vm1, %v8808_v19, %v8807_v42  ;;  %v1749_v60 = vsel %vm1732_vm5, %v1716_v47, %v8810_v18  ;;  %v8811_v40 = vld [vmem:[#allocation88_spill] sm:$0xff]  ;;  %v8813_v27 = vld [vmem:[#allocation111_spill] sm:$0xff]  ;;  %v1750_v5 = vsel %vm1732_vm5, %v1717_v41, %v8814_v12  ;;  %v8815_v62 = vld [vmem:[#allocation178_spill] sm:$0xff] }
 0x296   :  { %3088 = vrot.lane.b32.xlu1 %v6699_v28, %s4696_s4  ;;  %v1620_v43 = vsel %vm1600_vm1, %v8812_v33, %v8811_v40  ;;  %v1652_v10 = vsel %vm1633_vm2, %v1619_v20, %v8813_v27  ;;  %v1782_v6 = vsel %vm1765_vm6, %v1749_v60, %v8815_v62  ;;  %v8816_v63 = vld [vmem:[#allocation112_spill] sm:$0xff]  ;;  %v8817_v22 = vld [vmem:[#allocation34_spill] sm:$0xff]  ;;  %v8818_v49 = vld [vmem:[#allocation179_spill] sm:$0xff] }
 0x297   :  { %4463 = vmatmul.mubr.msk.f32.gmra.mrb[14].mxu0 %vm1831_vm8, %v1814_v61  ;;  %v1505_v13 = vpop.permute.xlu0 %1504  ;;  %v1653_v25 = vsel %vm1633_vm2, %v1620_v43, %v8816_v63  ;;  %v1685_v29 = vsel %vm1666_vm3, %v1652_v10, %v8817_v22  ;;  %v1783_v45 = vsel %vm1765_vm6, %v1750_v5, %v8818_v49  ;;  %v8819_v2 = vld [vmem:[#allocation36_spill] sm:$0xff]  ;;  %v8820_v39 = vld [vmem:[#allocation129_spill] sm:$0xff]  ;;  %v8823_v7 = vld [vmem:[#allocation130_spill] sm:$0xff] }
 0x298   :  { %v1815_v51 = vsel %vm1798_vm7, %v1782_v6, %v1505_v13  ;;  %v1507_v59 = vpop.permute.xlu1 %1506  ;;  %v1686_v4 = vsel %vm1666_vm3, %v1653_v25, %v8819_v2  ;;  %v1718_v36 = vsel %vm1699_vm4, %v1685_v29, %v8820_v39  ;;  %2200 = vrot.lane.b32.xlu0 %v6618_v53, %s4689_s8  ;;  %v8821_v55 = vld [vmem:[#allocation89_spill] sm:$0xff]  ;;  %v8824_v26 = vld [vmem:[#allocation154_spill] sm:$0xff]  ;;  %v8826_v14 = vld [vmem:[#allocation35_spill] sm:$0xff] }
 0x299   :  { %v1816_v48 = vsel %vm1798_vm7, %v1783_v45, %v1507_v59  ;;  %4465 = vmatprep.mubr.msk.f32.mxu0 %vm1831_vm8, %v1815_v51  ;;  %v8822_v35 = vld [vmem:[#allocation33_spill] sm:$0xff]  ;;  %v1719_v56 = vsel %vm1699_vm4, %v1686_v4, %v8823_v7  ;;  %v1751_v17 = vsel %vm1732_vm5, %v1718_v36, %v8824_v26  ;;  %v8825_v21 = vld [vmem:[#allocation90_spill] sm:$0xff]  ;;  %v8828_v9 = vld [vmem:[#allocation155_spill] sm:$0xff] }
 0x29a   :  { %v1621_v44 = vsel %vm1600_vm1, %v8822_v35, %v8821_v55  ;;  %2326 = vrot.lane.b32.xlu1 %v6629_v1, %s4690_s23  ;;  %v1622_v53 = vsel %vm1600_vm1, %v8826_v14, %v8825_v21  ;;  %v8827_v8 = vld [vmem:[#allocation113_spill] sm:$0xff]  ;;  %v1752_v54 = vsel %vm1732_vm5, %v1719_v56, %v8828_v9  ;;  %v8829_v34 = vld [vmem:[#allocation180_spill] sm:$0xff]  ;;  %v6773_v37 = vld [vmem:[#allocation2 + $0x210] sm:$0xff] }
 0x29b   :  { %4466 = vmatmul.mubr.msk.f32.gmra.mrb[16].mxu0 %vm1831_vm8, %v1816_v48  ;;  %v1654_v11 = vsel %vm1633_vm2, %v1621_v44, %v8827_v8  ;;  %v1784_v30 = vsel %vm1765_vm6, %v1751_v17, %v8829_v34  ;;  %v1509_v24 = vpop.permute.xlu0 %1508  ;;  %v8830_v32 = vld [vmem:[#allocation114_spill] sm:$0xff]  ;;  %v8832_v15 = vld [vmem:[#allocation181_spill] sm:$0xff]  ;;  %v4248_v42 = vld [vmem:[%s8398_s0 + $0x178] sm:$0xff] }
 0x29c   :  { %v1655_v1 = vsel %vm1633_vm2, %v1622_v53, %v8830_v32  ;;  %v8831_v58 = vld [vmem:[#allocation38_spill] sm:$0xff]  ;;  %v1785_v47 = vsel %vm1765_vm6, %v1752_v54, %v8832_v15  ;;  %v1817_v61 = vsel %vm1798_vm7, %v1784_v30, %v1509_v24  ;;  %v1511_v23 = vpop.permute.xlu1 %1510  ;;  %v8833_v19 = vld [vmem:[#allocation40_spill] sm:$0xff]  ;;  %v8834_v16 = vld [vmem:[#allocation131_spill] sm:$0xff]  ;;  %2708 = vrot.lane.b32.xlu0 %v6699_v28, %s4693_s26  ;;  %238 = vst.msk [vmem:[#allocation2 + $0x279] sm:$0xff] %vm15_vm0, %v4248_v42 }
 0x29d   :  { %v1687_v31 = vsel %vm1666_vm3, %v1654_v11, %v8831_v58  ;;  %v1688_v20 = vsel %vm1666_vm3, %v1655_v1, %v8833_v19  ;;  %v1818_v18 = vsel %vm1798_vm7, %v1785_v47, %v1511_v23  ;;  %4468 = vmatprep.mubr.msk.f32.mxu0 %vm1831_vm8, %v1817_v61  ;;  %v8835_v60 = vld [vmem:[#allocation91_spill] sm:$0xff]  ;;  %v8836_v33 = vld [vmem:[#allocation132_spill] sm:$0xff]  ;;  %v8840_v13 = vld [vmem:[#allocation157_spill] sm:$0xff] }
 0x29e   :  { %v1720_v41 = vsel %vm1699_vm4, %v1687_v31, %v8834_v16  ;;  %v1623_v40 = vsel %vm1600_vm1, %v6365_v52, %v8835_v60  ;;  %v1721_v43 = vsel %vm1699_vm4, %v1688_v20, %v8836_v33  ;;  %v8837_v27 = vld [vmem:[#allocation156_spill] sm:$0xff]  ;;  %2834 = vrot.lane.b32.xlu1 %v6773_v37, %s4694_s27  ;;  %v8839_v62 = vld [vmem:[#allocation115_spill] sm:$0xff]  ;;  %v8841_v63 = vld [vmem:[#allocation182_spill] sm:$0xff] }
 0x29f   :  { %v1753_v10 = vsel %vm1732_vm5, %v1720_v41, %v8837_v27  ;;  %4469 = vmatmul.mubr.msk.f32.gmra.mrb[18].mxu0 %vm1831_vm8, %v1818_v18  ;;  %v8838_v12 = vld [vmem:[#allocation92_spill] sm:$0xff]  ;;  %v1656_v6 = vsel %vm1633_vm2, %v1623_v40, %v8839_v62  ;;  %v1754_v52 = vsel %vm1732_vm5, %v1721_v43, %v8840_v13  ;;  %v1513_v22 = vpop.permute.xlu0 %1512  ;;  %v8843_v45 = vld [vmem:[#allocation42_spill] sm:$0xff]  ;;  %v8844_v59 = vld [vmem:[#allocation183_spill] sm:$0xff] }
 0x2a0   :  { %v1624_v5 = vsel %vm1600_vm1, %v6369_v50, %v8838_v12  ;;  %v1786_v25 = vsel %vm1765_vm6, %v1753_v10, %v8841_v63  ;;  %v8842_v29 = vld [vmem:[#allocation116_spill] sm:$0xff]  ;;  %v1689_v51 = vsel %vm1666_vm3, %v1656_v6, %v8843_v45  ;;  %v1787_v2 = vsel %vm1765_vm6, %v1754_v52, %v8844_v59  ;;  %v1515_v4 = vpop.permute.xlu1 %1514  ;;  %v8846_v48 = vld [vmem:[#allocation133_spill] sm:$0xff]  ;;  %2328 = vrot.lane.b32.xlu0 %v6699_v28, %s4690_s23  ;;  %v8848_v7 = vld [vmem:[#allocation39_spill] sm:$0xff] }
 0x2a1   :  { %v1657_v49 = vsel %vm1633_vm2, %v1624_v5, %v8842_v29  ;;  %v1819_v50 = vsel %vm1798_vm7, %v1786_v25, %v1513_v22  ;;  %v8845_v39 = vld [vmem:[#allocation44_spill] sm:$0xff]  ;;  %v1722_v55 = vsel %vm1699_vm4, %v1689_v51, %v8846_v48  ;;  %v1820_v35 = vsel %vm1798_vm7, %v1787_v2, %v1515_v4  ;;  %v8847_v44 = vld [vmem:[#allocation93_spill] sm:$0xff]  ;;  %v8849_v26 = vld [vmem:[#allocation134_spill] sm:$0xff] }
 0x2a2   :  { %v1690_v36 = vsel %vm1666_vm3, %v1657_v49, %v8845_v39  ;;  %4471 = vmatprep.mubr.msk.f32.mxu0 %vm1831_vm8, %v1819_v50  ;;  %v1625_v56 = vsel %vm1600_vm1, %v8848_v7, %v8847_v44  ;;  %v8850_v21 = vld [vmem:[#allocation158_spill] sm:$0xff]  ;;  %2454 = vrot.lane.b32.xlu1 %v6773_v37, %s4691_s24  ;;  %v6838_v53 = vld [vmem:[#allocation2 + $0x218] sm:$0xff]  ;;  %v8852_v11 = vld [vmem:[#allocation117_spill] sm:$0xff] }
 0x2a3   :  { %v1723_v17 = vsel %vm1699_vm4, %v1690_v36, %v8849_v26  ;;  %v1755_v14 = vsel %vm1732_vm5, %v1722_v55, %v8850_v21  ;;  %4472 = vmatmul.mubr.msk.f32.gmra.mrb[20].mxu0 %vm1831_vm8, %v1820_v35  ;;  %v8851_v28 = vld [vmem:[#allocation94_spill] sm:$0xff]  ;;  %v1658_v9 = vsel %vm1633_vm2, %v1625_v56, %v8852_v11  ;;  %v8853_v54 = vld [vmem:[#allocation159_spill] sm:$0xff]  ;;  %v8854_v30 = vld [vmem:[#allocation184_spill] sm:$0xff]  ;;  %v1517_v32 = vpop.permute.xlu0 %1516 }
 0x2a4   :  { %v1626_v8 = vsel %vm1600_vm1, %v6379_v57, %v8851_v28  ;;  %v1756_v34 = vsel %vm1732_vm5, %v1723_v17, %v8853_v54  ;;  %v1788_v24 = vsel %vm1765_vm6, %v1755_v14, %v8854_v30  ;;  %v6849_v1 = vld [vmem:[#allocation2 + $0x211] sm:$0xff]  ;;  %v8857_v61 = vld [vmem:[#allocation185_spill] sm:$0xff]  ;;  %v1519_v42 = vpop.permute.xlu1 %1518  ;;  %v8858_v19 = vld [vmem:[#allocation48_spill] sm:$0xff]  ;;  %2836 = vrot.lane.b32.xlu0 %v6838_v53, %s4694_s27 }
 0x2a5   :  { %v8855_v58 = vld [vmem:[#allocation118_spill] sm:$0xff]  ;;  %v1789_v57 = vsel %vm1765_vm6, %v1756_v34, %v8857_v61  ;;  %v1821_v23 = vsel %vm1798_vm7, %v1788_v24, %v1517_v32  ;;  %v8859_v16 = vld [vmem:[#allocation135_spill] sm:$0xff]  ;;  %v8861_v40 = vld [vmem:[#allocation41_spill] sm:$0xff] }
 0x2a6   :  { %v1659_v31 = vsel %vm1633_vm2, %v1626_v8, %v8855_v58  ;;  %v8856_v15 = vld [vmem:[#allocation46_spill] sm:$0xff]  ;;  %v1822_v18 = vsel %vm1798_vm7, %v1789_v57, %v1519_v42  ;;  %4474 = vmatprep.mubr.msk.f32.mxu0 %vm1831_vm8, %v1821_v23  ;;  %v8860_v60 = vld [vmem:[#allocation95_spill] sm:$0xff]  ;;  %v8862_v43 = vld [vmem:[#allocation136_spill] sm:$0xff]  ;;  %2962 = vrot.lane.b32.xlu1 %v6849_v1, %s4695_s7 }
 0x2a7   :  { %v1691_v47 = vsel %vm1666_vm3, %v1658_v9, %v8856_v15  ;;  %v1692_v20 = vsel %vm1666_vm3, %v1659_v31, %v8858_v19  ;;  %v1627_v33 = vsel %vm1600_vm1, %v8861_v40, %v8860_v60  ;;  %v8863_v10 = vld [vmem:[#allocation160_spill] sm:$0xff]  ;;  %4475 = vmatmul.mubr.msk.f32.gmra.mrb[22].mxu0 %vm1831_vm8, %v1822_v18  ;;  %v8865_v62 = vld [vmem:[#allocation43_spill] sm:$0xff]  ;;  %v8867_v63 = vld [vmem:[#allocation161_spill] sm:$0xff]  ;;  %v1521_v49 = vpop.permute.xlu0 %1520 }
 0x2a8   :  { %v1724_v41 = vsel %vm1699_vm4, %v1691_v47, %v8859_v16  ;;  %v1725_v27 = vsel %vm1699_vm4, %v1692_v20, %v8862_v43  ;;  %v8864_v5 = vld [vmem:[#allocation96_spill] sm:$0xff]  ;;  %v8866_v13 = vld [vmem:[#allocation119_spill] sm:$0xff]  ;;  %v8868_v22 = vld [vmem:[#allocation186_spill] sm:$0xff]  ;;  %v1523_v36 = vpop.permute.xlu1 %1522  ;;  %2456 = vrot.lane.b32.xlu0 %v6838_v53, %s4691_s24 }
 0x2a9   :  { %v1757_v12 = vsel %vm1732_vm5, %v1724_v41, %v8863_v10  ;;  %v1628_v6 = vsel %vm1600_vm1, %v8865_v62, %v8864_v5  ;;  %v1660_v52 = vsel %vm1633_vm2, %v1627_v33, %v8866_v13  ;;  %v1758_v25 = vsel %vm1732_vm5, %v1725_v27, %v8867_v63  ;;  %v8869_v45 = vld [vmem:[#allocation120_spill] sm:$0xff]  ;;  %v8870_v59 = vld [vmem:[#allocation50_spill] sm:$0xff]  ;;  %v8871_v50 = vld [vmem:[#allocation187_spill] sm:$0xff] }
 0x2aa   :  { %v1790_v29 = vsel %vm1765_vm6, %v1757_v12, %v8868_v22  ;;  %v1661_v51 = vsel %vm1633_vm2, %v1628_v6, %v8869_v45  ;;  %v1693_v2 = vsel %vm1666_vm3, %v1660_v52, %v8870_v59  ;;  %v1791_v4 = vsel %vm1765_vm6, %v1758_v25, %v8871_v50  ;;  %v8872_v48 = vld [vmem:[#allocation52_spill] sm:$0xff]  ;;  %v8873_v35 = vld [vmem:[#allocation137_spill] sm:$0xff]  ;;  %v8876_v21 = vld [vmem:[#allocation138_spill] sm:$0xff]  ;;  %2582 = vrot.lane.b32.xlu1 %v6849_v1, %s4692_s25 }
 0x2ab   :  { %v1823_v39 = vsel %vm1798_vm7, %v1790_v29, %v1521_v49  ;;  %v1694_v55 = vsel %vm1666_vm3, %v1661_v51, %v8872_v48  ;;  %v1726_v44 = vsel %vm1699_vm4, %v1693_v2, %v8873_v35  ;;  %v1824_v7 = vsel %vm1798_vm7, %v1791_v4, %v1523_v36  ;;  %v8874_v56 = vld [vmem:[#allocation97_spill] sm:$0xff]  ;;  %v8877_v28 = vld [vmem:[#allocation162_spill] sm:$0xff]  ;;  %v2095_v11 = vld [vmem:[#allocation2 + $0x219] sm:$0xff]  ;;  %v1525_v15 = vpop.permute.xlu0 %1524 }
 0x2ac   :  { %4477 = vmatprep.mubr.msk.f32.mxu0 %vm1831_vm8, %v1823_v39  ;;  %v8875_v26 = vld [vmem:[#allocation45_spill] sm:$0xff]  ;;  %v1727_v14 = vsel %vm1699_vm4, %v1694_v55, %v8876_v21  ;;  %v1759_v8 = vsel %vm1732_vm5, %v1726_v44, %v8877_v28  ;;  %v8878_v9 = vld [vmem:[#allocation98_spill] sm:$0xff]  ;;  %v8880_v24 = vld [vmem:[#allocation163_spill] sm:$0xff]  ;;  %v1527_v16 = vpop.permute.xlu1 %1526  ;;  %2964 = vrot.lane.b32.xlu0 %v2095_v11, %s4695_s7 }
 0x2ad   :  { %v1629_v17 = vsel %vm1600_vm1, %v8875_v26, %v8874_v56  ;;  %4478 = vmatmul.mubr.msk.f32.gmra.mrb[24].mxu0 %vm1831_vm8, %v1824_v7  ;;  %v1630_v54 = vsel %vm1600_vm1, %v6402_v38, %v8878_v9  ;;  %v8879_v34 = vld [vmem:[#allocation121_spill] sm:$0xff]  ;;  %v1760_v32 = vsel %vm1732_vm5, %v1727_v14, %v8880_v24  ;;  %v2126_v47 = vld [vmem:[#allocation2 + $0x212] sm:$0xff]  ;;  %v8885_v41 = vld [vmem:[#allocation56_spill] sm:$0xff] }
 0x2ae   :  { %v1662_v30 = vsel %vm1633_vm2, %v1629_v17, %v8879_v34  ;;  %v8881_v58 = vld [vmem:[#allocation9_spill] sm:$0xff]  ;;  %v8882_v61 = vld [vmem:[#allocation122_spill] sm:$0xff]  ;;  %v8884_v19 = vld [vmem:[#allocation11_spill] sm:$0xff]  ;;  %3090 = vrot.lane.b32.xlu1 %v2126_v47, %s4696_s4 }
 0x2af   :  { %v1792_v31 = vsel %vm1765_vm6, %v1759_v8, %v8881_v58  ;;  %v1663_v57 = vsel %vm1633_vm2, %v1630_v54, %v8882_v61  ;;  %v8883_v23 = vld [vmem:[#allocation54_spill] sm:$0xff]  ;;  %v1793_v38 = vsel %vm1765_vm6, %v1760_v32, %v8884_v19  ;;  %v8886_v60 = vld [vmem:[#allocation139_spill] sm:$0xff]  ;;  %v8888_v10 = vld [vmem:[#allocation140_spill] sm:$0xff]  ;;  %v1529_v49 = vpop.permute.xlu0 %1528 }
 0x2b0   :  { %v1695_v42 = vsel %vm1666_vm3, %v1662_v30, %v8883_v23  ;;  %v1825_v20 = vsel %vm1798_vm7, %v1792_v31, %v1525_v15  ;;  %v1696_v18 = vsel %vm1666_vm3, %v1663_v57, %v8885_v41  ;;  %v1826_v33 = vsel %vm1798_vm7, %v1793_v38, %v1527_v16  ;;  %v8887_v43 = vld [vmem:[#allocation99_spill] sm:$0xff]  ;;  %v8889_v5 = vld [vmem:[#allocation164_spill] sm:$0xff]  ;;  %v8892_v25 = vld [vmem:[#allocation165_spill] sm:$0xff]  ;;  %v1531_v39 = vpop.permute.xlu1 %1530  ;;  %2202 = vrot.lane.b32.xlu0 %v6849_v1, %s4689_s8 }
 0x2b1   :  { %v1728_v40 = vsel %vm1699_vm4, %v1695_v42, %v8886_v60  ;;  %4480 = vmatprep.mubr.msk.f32.mxu0 %vm1831_vm8, %v1825_v20  ;;  %v1631_v27 = vsel %vm1600_vm1, %v6415_v0, %v8887_v43  ;;  %v1729_v12 = vsel %vm1699_vm4, %v1696_v18, %v8888_v10  ;;  %v8890_v6 = vld [vmem:[#allocation100_spill] sm:$0xff]  ;;  %v8891_v52 = vld [vmem:[#allocation123_spill] sm:$0xff]  ;;  %v8895_v59 = vld [vmem:[#allocation58_spill] sm:$0xff] }
 0x2b2   :  { %v1761_v62 = vsel %vm1732_vm5, %v1728_v40, %v8889_v5  ;;  %4481 = vmatmul.mubr.msk.f32.gmra.mrb[26].mxu0 %vm1831_vm8, %v1826_v33  ;;  %v1632_v13 = vsel %vm1600_vm1, %v6425_v3, %v8890_v6  ;;  %v1664_v63 = vsel %vm1633_vm2, %v1631_v27, %v8891_v52  ;;  %v1762_v0 = vsel %vm1732_vm5, %v1729_v12, %v8892_v25  ;;  %v8893_v22 = vld [vmem:[#allocation31_spill] sm:$0xff]  ;;  %v8894_v45 = vld [vmem:[#allocation124_spill] sm:$0xff]  ;;  %v8896_v50 = vld [vmem:[#allocation37_spill] sm:$0xff] }
 0x2b3   :  { %v1794_v29 = vsel %vm1765_vm6, %v1761_v62, %v8893_v22  ;;  %v1665_v51 = vsel %vm1633_vm2, %v1632_v13, %v8894_v45  ;;  %v1697_v2 = vsel %vm1666_vm3, %v1664_v63, %v8895_v59  ;;  %v1795_v4 = vsel %vm1765_vm6, %v1762_v0, %v8896_v50  ;;  %v8897_v36 = vld [vmem:[#allocation60_spill] sm:$0xff]  ;;  %v8898_v55 = vld [vmem:[#allocation141_spill] sm:$0xff]  ;;  %v8899_v7 = vld [vmem:[#allocation142_spill] sm:$0xff]  ;;  %2584 = vrot.lane.b32.xlu1 %v2095_v11, %s4692_s25  ;;  %v1533_v9 = vpop.permute.xlu0 %1532 }
 0x2b4   :  { %v1827_v3 = vsel %vm1798_vm7, %v1794_v29, %v1529_v49  ;;  %v1698_v48 = vsel %vm1666_vm3, %v1665_v51, %v8897_v36  ;;  %v1730_v35 = vsel %vm1699_vm4, %v1697_v2, %v8898_v55  ;;  %v1828_v44 = vsel %vm1798_vm7, %v1795_v4, %v1531_v39  ;;  %v8900_v26 = vld [vmem:[#allocation166_spill] sm:$0xff]  ;;  %v8901_v21 = vld [vmem:[#allocation167_spill] sm:$0xff]  ;;  %v1535_v30 = vpop.permute.xlu1 %1534  ;;  %2710 = vrot.lane.b32.xlu0 %v2126_v47, %s4693_s26  ;;  %v4249_v32 = vld [vmem:[%s8398_s0 + $0x180] sm:$0xff] }
 0x2b5   :  { %4483 = vmatprep.mubr.msk.f32.mxu0 %vm1831_vm8, %v1827_v3  ;;  %v1731_v56 = vsel %vm1699_vm4, %v1698_v48, %v8899_v7  ;;  %v1763_v17 = vsel %vm1732_vm5, %v1730_v35, %v8900_v26  ;;  %v8902_v28 = vld [vmem:[#allocation47_spill] sm:$0xff]  ;;  %239 = vst.msk [vmem:[#allocation2 + $0x289] sm:$0xff] %vm15_vm0, %v4249_v32  ;;  %v6994_v15 = vld [vmem:[#allocation2 + $0x228] sm:$0xff]  ;;  %v7010_v23 = vld [vmem:[#allocation2 + $0x230] sm:$0xff] }
 0x2b6   :  { %4484 = vmatmul.mubr.msk.f32.gmra.mrb[28].mxu0 %vm1831_vm8, %v1828_v44  ;;  %v1764_v14 = vsel %vm1732_vm5, %v1731_v56, %v8901_v21  ;;  %v1796_v8 = vsel %vm1765_vm6, %v1763_v17, %v8902_v28  ;;  %v2127_v1 = vld [vmem:[#allocation2 + $0x21a] sm:$0xff]  ;;  %v4250_v57 = vld [vmem:[%s8398_s0 + $0x188] sm:$0xff]  ;;  %v2097_v41 = vld [vmem:[#allocation2 + $0x231] sm:$0xff] }
 0x2b7   :  { %v1797_v54 = vsel %vm1765_vm6, %v1764_v14, %v6421_v46  ;;  %v1829_v34 = vsel %vm1798_vm7, %v1796_v8, %v1533_v9  ;;  %3092 = vrot.lane.b32.xlu1 %v2127_v1, %s4696_s4  ;;  %v2187_v46 = vpop.permute.xlu0 %2186  ;;  %240 = vst.msk [vmem:[#allocation2 + $0x291] sm:$0xff] %vm15_vm0, %v4250_v57  ;;  %v2096_v19 = vld [vmem:[#allocation2 + $0x229] sm:$0xff]  ;;  %v2129_v10 = vld [vmem:[#allocation2 + $0x232] sm:$0xff]  ;;  %v7036_v63 = vld [vmem:[#allocation2 + $0x240] sm:$0xff] }
 0x2b8   :  { %v1830_v24 = vsel %vm1798_vm7, %v1797_v54, %v1535_v30  ;;  %4486 = vmatprep.mubr.msk.f32.mxu0 %vm1831_vm8, %v1829_v34  ;;  %v6988_v58 = vpop.permute.xlu1 %2188  ;;  %2204 = vrot.lane.b32.xlu0 %v2095_v11, %s4689_s8  ;;  %v2128_v60 = vld [vmem:[#allocation2 + $0x22a] sm:$0xff]  ;;  %v4252_v0 = vld [vmem:[%s8398_s0 + $0x198] sm:$0xff]  ;;  %v2098_v35 = vld [vmem:[#allocation2 + $0x241] sm:$0xff] }
 0x2b9   :  { %v4251_v5 = vld [vmem:[%s8398_s0 + $0x190] sm:$0xff]  ;;  %242 = vst.msk [vmem:[#allocation2 + $0x2a9] sm:$0xff] %vm15_vm0, %v4252_v0  ;;  %v1866_v49 = vld [vmem:[#allocation2 + $0x1b8] sm:$0xff]  ;;  %v7058_v39 = vld [vmem:[#allocation2 + $0x248] sm:$0xff] }
 0x2ba   :  { %4487 = vmatmul.mubr.msk.f32.gmra.mrb[30].mxu0 %vm1831_vm8, %v1830_v24  ;;  %241 = vst.msk [vmem:[#allocation2 + $0x2a1] sm:$0xff] %vm15_vm0, %v4251_v5  ;;  %v1865_v13 = vld [vmem:[#allocation2 + $0x1b0] sm:$0xff]  ;;  %v3179_v4 = vsel %vm15_vm0, %v1866_v49, %v6988_v58  ;;  %v2130_v34 = vld [vmem:[#allocation2 + $0x242] sm:$0xff]  ;;  %v2100_v49 = vld [vmem:[#allocation2 + $0x259] sm:$0xff] }
 0x2bb   :  { %2330 = vrot.lane.b32.xlu1 %v2126_v47, %s4690_s23  ;;  %v6992_v31 = vpop.permute.xlu0 %2190  ;;  %v3178_v22 = vsel %vm15_vm0, %v1865_v13, %v2187_v46  ;;  %v2131_v58 = vld [vmem:[#allocation2 + $0x24a] sm:$0xff]  ;;  %v7129_v0 = vld [vmem:[#allocation2 + $0x260] sm:$0xff] }
 0x2bc   :  { %v6996_v61 = vpop.permute.xlu1 %2192  ;;  %2712 = vrot.lane.b32.xlu0 %v2127_v1, %s4693_s26  ;;  %v4628_v13 = vld [vmem:[#allocation2 + $0x1d0] sm:$0xff] }
 0x2bf   :  { %2838 = vrot.lane.b32.xlu1 %v6994_v15, %s4694_s27  ;;  %v7005_v11 = vpop.permute.xlu0 %2194 }
 0x2c0   :  { %v2315_v47 = vpop.permute.xlu1 %2314  ;;  %2332 = vrot.lane.b32.xlu0 %v2127_v1, %s4690_s23  ;;  %v2099_v1 = vld [vmem:[#allocation2 + $0x249] sm:$0xff] }
 0x2c1   :  { %v3210_v29 = vsel %vm1600_vm1, %v3178_v22, %v2315_v47  ;;  %v4253_v47 = vld [vmem:[%s8398_s0 + $0x1a0] sm:$0xff] }
 0x2c2   :  { %243 = vst.msk [vmem:[#allocation2 + $0x2b9] sm:$0xff] %vm15_vm0, %v4253_v47 }
 0x2c3   :  { %2458 = vrot.lane.b32.xlu1 %v6994_v15, %s4691_s24  ;;  %v2317_v42 = vpop.permute.xlu0 %2316 }
 0x2c4   :  { %v2443_v38 = vpop.permute.xlu1 %2442  ;;  %2840 = vrot.lane.b32.xlu0 %v7010_v23, %s4694_s27  ;;  %v3211_v36 = vsel %vm1600_vm1, %v3179_v4, %v2317_v42 }
 0x2c5   :  { %v3242_v45 = vsel %vm1633_vm2, %v3210_v29, %v2443_v38  ;;  %v4627_v38 = vld [vmem:[#allocation2 + $0x1c8] sm:$0xff] }
 0x2c7   :  { %2966 = vrot.lane.b32.xlu1 %v2096_v19, %s4695_s7  ;;  %v2445_v20 = vpop.permute.xlu0 %2444 }
 0x2c8   :  { %v2571_v16 = vpop.permute.xlu1 %2570  ;;  %2460 = vrot.lane.b32.xlu0 %v7010_v23, %s4691_s24  ;;  %v3243_v44 = vsel %vm1633_vm2, %v3211_v36, %v2445_v20  ;;  %v3180_v20 = vsel %vm15_vm0, %v4627_v38, %v6992_v31 }
 0x2c9   :  { %v3274_v59 = vsel %vm1666_vm3, %v3242_v45, %v2571_v16 }
 0x2cb   :  { %2586 = vrot.lane.b32.xlu1 %v2096_v19, %s4692_s25  ;;  %v2573_v18 = vpop.permute.xlu0 %2572 }
 0x2cc   :  { %v2699_v40 = vpop.permute.xlu1 %2698  ;;  %2968 = vrot.lane.b32.xlu0 %v2097_v41, %s4695_s7  ;;  %v3275_v26 = vsel %vm1666_vm3, %v3243_v44, %v2573_v18  ;;  %v7105_v18 = vld [vmem:[#allocation2 + $0x258] sm:$0xff] }
 0x2cd   :  { %v3306_v50 = vsel %vm1699_vm4, %v3274_v59, %v2699_v40 }
 0x2cf   :  { %3094 = vrot.lane.b32.xlu1 %v2128_v60, %s4696_s4  ;;  %v7020_v33 = vpop.permute.xlu0 %2318 }
 0x2d0   :  { %v2701_v43 = vpop.permute.xlu1 %2700  ;;  %2206 = vrot.lane.b32.xlu0 %v2096_v19, %s4689_s8  ;;  %v3212_v16 = vsel %vm1600_vm1, %v3180_v20, %v7020_v33  ;;  %v4630_v20 = vld [vmem:[#allocation2 + $0x1e8] sm:$0xff] }
 0x2d1   :  { %v3307_v17 = vsel %vm1699_vm4, %v3275_v26, %v2701_v43  ;;  %v4254_v43 = vld [vmem:[%s8398_s0 + $0x1a8] sm:$0xff] }
 0x2d2   :  { %244 = vst.msk [vmem:[#allocation2 + $0x2c1] sm:$0xff] %vm15_vm0, %v4254_v43 }
 0x2d3   :  { %2588 = vrot.lane.b32.xlu1 %v2097_v41, %s4692_s25  ;;  %v2827_v27 = vpop.permute.xlu0 %2826 }
 0x2d4   :  { %v7024_v12 = vpop.permute.xlu1 %2320  ;;  %2714 = vrot.lane.b32.xlu0 %v2128_v60, %s4693_s26  ;;  %v3338_v3 = vsel %vm1732_vm5, %v3306_v50, %v2827_v27 }
 0x2d7   :  { %3096 = vrot.lane.b32.xlu1 %v2129_v10, %s4696_s4  ;;  %v7032_v62 = vpop.permute.xlu0 %2446 }
 0x2d8   :  { %v2829_v6 = vpop.permute.xlu1 %2828  ;;  %2208 = vrot.lane.b32.xlu0 %v2097_v41, %s4689_s8 }
 0x2d9   :  { %v3339_v21 = vsel %vm1732_vm5, %v3307_v17, %v2829_v6  ;;  %v4255_v17 = vld [vmem:[%s8398_s0 + $0x1b0] sm:$0xff] }
 0x2da   :  { %245 = vst.msk [vmem:[#allocation2 + $0x2d1] sm:$0xff] %vm15_vm0, %v4255_v17 }
 0x2db   :  { %2334 = vrot.lane.b32.xlu1 %v2128_v60, %s4690_s23  ;;  %v2955_v52 = vpop.permute.xlu0 %2954  ;;  %v3244_v60 = vsel %vm1633_vm2, %v3212_v16, %v7032_v62 }
 0x2dc   :  { %v7038_v25 = vpop.permute.xlu1 %2448  ;;  %2716 = vrot.lane.b32.xlu0 %v2129_v10, %s4693_s26  ;;  %v3370_v48 = vsel %vm1765_vm6, %v3338_v3, %v2955_v52  ;;  %v3181_v52 = vsel %vm15_vm0, %v4628_v13, %v6996_v61  ;;  %v2101_v3 = vld [vmem:[#allocation2 + $0x261] sm:$0xff]  ;;  %v2103_v13 = vld [vmem:[#allocation2 + $0x279] sm:$0xff] }
 0x2dd   :  { %v3213_v22 = vsel %vm1600_vm1, %v3181_v52, %v7024_v12 }
 0x2de   :  { %v3245_v45 = vsel %vm1633_vm2, %v3213_v22, %v7038_v25  ;;  %v2134_v22 = vld [vmem:[#allocation2 + $0x272] sm:$0xff] }
 0x2df   :  { %2842 = vrot.lane.b32.xlu1 %v7036_v63, %s4694_s27  ;;  %v2575_v51 = vpop.permute.xlu0 %2574 }
 0x2e0   :  { %v2957_v2 = vpop.permute.xlu1 %2956  ;;  %2336 = vrot.lane.b32.xlu0 %v2129_v10, %s4690_s23  ;;  %v3276_v31 = vsel %vm1666_vm3, %v3244_v60, %v2575_v51  ;;  %v7203_v60 = vld [vmem:[#allocation2 + $0x278] sm:$0xff] }
 0x2e1   :  { %v3371_v28 = vsel %vm1765_vm6, %v3339_v21, %v2957_v2 }
 0x2e3   :  { %2462 = vrot.lane.b32.xlu1 %v7036_v63, %s4691_s24  ;;  %v3083_v55 = vpop.permute.xlu0 %3082 }
 0x2e4   :  { %v7063_v7 = vpop.permute.xlu1 %2576  ;;  %v3402_v56 = vsel %vm1798_vm7, %v3370_v48, %v3083_v55  ;;  %2844 = vrot.lane.b32.xlu0 %v7058_v39, %s4694_s27  ;;  %v2132_v48 = vld [vmem:[#allocation2 + $0x25a] sm:$0xff] }
 0x2e5   :  { %4489 = vmatprep.mubr.msk.f32.mxu1 %vm1831_vm8, %v3402_v56  ;;  %v3277_v61 = vsel %vm1666_vm3, %v3245_v45, %v7063_v7  ;;  %v2133_v56 = vld [vmem:[#allocation2 + $0x262] sm:$0xff] }
 0x2e7   :  { %2970 = vrot.lane.b32.xlu1 %v2098_v35, %s4695_s7  ;;  %v2703_v14 = vpop.permute.xlu0 %2702 }
 0x2e8   :  { %v3085_v8 = vpop.permute.xlu1 %3084  ;;  %2464 = vrot.lane.b32.xlu0 %v7058_v39, %s4691_s24  ;;  %v3308_v33 = vsel %vm1699_vm4, %v3276_v31, %v2703_v14  ;;  %v2102_v31 = vld [vmem:[#allocation2 + $0x271] sm:$0xff] }
 0x2e9   :  { %v3403_v9 = vsel %vm1798_vm7, %v3371_v28, %v3085_v8  ;;  %v4629_v28 = vld [vmem:[#allocation2 + $0x1e0] sm:$0xff] }
 0x2ea   :  { %4490 = vmatmul.mubr.msk.f32.vlgmr.msra.gmra.mrb[0].mxu1 %vm1831_vm8, %v3403_v9  ;;  %v3182_v8 = vsel %vm15_vm0, %v4629_v28, %v7005_v11 }
 0x2eb   :  { %2590 = vrot.lane.b32.xlu1 %v2098_v35, %s4692_s25  ;;  %v7079_v54 = vpop.permute.xlu0 %2196 }
 0x2ec   :  { %v7081_v30 = vpop.permute.xlu1 %2322  ;;  %2972 = vrot.lane.b32.xlu0 %v2099_v1, %s4695_s7  ;;  %v3183_v16 = vsel %vm15_vm0, %v4630_v20, %v7079_v54 }
 0x2ed   :  { %v3214_v9 = vsel %vm1600_vm1, %v3182_v8, %v7081_v30 }
 0x2ef   :  { %3098 = vrot.lane.b32.xlu1 %v2130_v34, %s4696_s4  ;;  %v2705_v24 = vpop.permute.xlu0 %2704 }
 0x2f0   :  { %v2831_v32 = vpop.permute.xlu1 %2830  ;;  %2210 = vrot.lane.b32.xlu0 %v2098_v35, %s4689_s8  ;;  %v3309_v59 = vsel %vm1699_vm4, %v3277_v61, %v2705_v24 }
 0x2f1   :  { %v3340_v27 = vsel %vm1732_vm5, %v3308_v33, %v2831_v32 }
 0x2f3   :  { %2592 = vrot.lane.b32.xlu1 %v2099_v1, %s4692_s25  ;;  %v7087_v46 = vpop.permute.xlu0 %2324 }
 0x2f4   :  { %v7089_v57 = vpop.permute.xlu1 %2450  ;;  %2718 = vrot.lane.b32.xlu0 %v2130_v34, %s4693_s26 }
 0x2f5   :  { %v3246_v24 = vsel %vm1633_vm2, %v3214_v9, %v7089_v57 }
 0x2f7   :  { %3100 = vrot.lane.b32.xlu1 %v2131_v58, %s4696_s4  ;;  %v2833_v42 = vpop.permute.xlu0 %2832 }
 0x2f8   :  { %v2959_v19 = vpop.permute.xlu1 %2958  ;;  %2212 = vrot.lane.b32.xlu0 %v2099_v1, %s4689_s8  ;;  %v3341_v12 = vsel %vm1732_vm5, %v3309_v59, %v2833_v42  ;;  %v2135_v59 = vld [vmem:[#allocation2 + $0x27a] sm:$0xff] }
 0x2f9   :  { %v3372_v5 = vsel %vm1765_vm6, %v3340_v27, %v2959_v19 }
 0x2fb   :  { %2338 = vrot.lane.b32.xlu1 %v2130_v34, %s4690_s23  ;;  %v7103_v41 = vpop.permute.xlu0 %2452  ;;  %v7178_v34 = vld [vmem:[#allocation2 + $0x270] sm:$0xff] }
 0x2fc   :  { %v7109_v40 = vpop.permute.xlu1 %2578  ;;  %2720 = vrot.lane.b32.xlu0 %v2131_v58, %s4693_s26 }
 0x2fd   :  { %v3278_v11 = vsel %vm1666_vm3, %v3246_v24, %v7109_v40  ;;  %v3215_v40 = vsel %vm1600_vm1, %v3183_v16, %v7087_v46  ;;  %v4632_v24 = vld [vmem:[#allocation2 + $0x200] sm:$0xff] }
 0x2fe   :  { %v3247_v33 = vsel %vm1633_vm2, %v3215_v40, %v7103_v41  ;;  %v2105_v40 = vld [vmem:[#allocation2 + $0x291] sm:$0xff] }
 0x2ff   :  { %2846 = vrot.lane.b32.xlu1 %v7105_v18, %s4694_s27  ;;  %v2961_v10 = vpop.permute.xlu0 %2960 }
 0x300   :  { %v3087_v62 = vpop.permute.xlu1 %3086  ;;  %2340 = vrot.lane.b32.xlu0 %v2131_v58, %s4690_s23  ;;  %v3373_v50 = vsel %vm1765_vm6, %v3341_v12, %v2961_v10  ;;  %v4256_v58 = vld [vmem:[%s8398_s0 + $0x1b8] sm:$0xff] }
 0x301   :  { %v3404_v6 = vsel %vm1798_vm7, %v3372_v5, %v3087_v62  ;;  %246 = vst.msk [vmem:[#allocation2 + $0x2d9] sm:$0xff] %vm15_vm0, %v4256_v58  ;;  %v7277_v58 = vld [vmem:[#allocation2 + $0x290] sm:$0xff] }
 0x302   :  { %4492 = vmatprep.mubr.msk.f32.mxu1 %vm1831_vm8, %v3404_v6 }
 0x303   :  { %2466 = vrot.lane.b32.xlu1 %v7105_v18, %s4691_s24  ;;  %v7133_v29 = vpop.permute.xlu0 %2198 }
 0x304   :  { %v7137_v51 = vpop.permute.xlu1 %2580  ;;  %2848 = vrot.lane.b32.xlu0 %v7129_v0, %s4694_s27 }
 0x305   :  { %v3279_v54 = vsel %vm1666_vm3, %v3247_v33, %v7137_v51  ;;  %v2136_v33 = vld [vmem:[#allocation2 + $0x28a] sm:$0xff] }
 0x307   :  { %2974 = vrot.lane.b32.xlu1 %v2100_v49, %s4695_s7  ;;  %v2707_v2 = vpop.permute.xlu0 %2706 }
 0x308   :  { %v3089_v4 = vpop.permute.xlu1 %3088  ;;  %2468 = vrot.lane.b32.xlu0 %v7129_v0, %s4691_s24  ;;  %v3310_v30 = vsel %vm1699_vm4, %v3278_v11, %v2707_v2  ;;  %v4257_v2 = vld [vmem:[%s8398_s0 + $0x1c0] sm:$0xff] }
 0x309   :  { %v3405_v25 = vsel %vm1798_vm7, %v3373_v50, %v3089_v4  ;;  %247 = vst.msk [vmem:[#allocation2 + $0x2e9] sm:$0xff] %vm15_vm0, %v4257_v2 }
 0x30a   :  { %4493 = vmatmul.mubr.msk.f32.gmra.mrb[2].mxu1 %vm1831_vm8, %v3405_v25  ;;  %v4631_v25 = vld [vmem:[#allocation2 + $0x1f8] sm:$0xff] }
 0x30b   :  { %2594 = vrot.lane.b32.xlu1 %v2100_v49, %s4692_s25  ;;  %v7152_v36 = vpop.permute.xlu0 %2200 }
 0x30c   :  { %v7154_v55 = vpop.permute.xlu1 %2326  ;;  %2976 = vrot.lane.b32.xlu0 %v2101_v3, %s4695_s7 }
 0x30f   :  { %3102 = vrot.lane.b32.xlu1 %v2132_v48, %s4696_s4  ;;  %v2709_v35 = vpop.permute.xlu0 %2708 }
 0x310   :  { %v2835_v44 = vpop.permute.xlu1 %2834  ;;  %2214 = vrot.lane.b32.xlu0 %v2100_v49, %s4689_s8  ;;  %v3311_v10 = vsel %vm1699_vm4, %v3279_v54, %v2709_v35 }
 0x311   :  { %v3342_v57 = vsel %vm1732_vm5, %v3310_v30, %v2835_v44  ;;  %v7252_v44 = vld [vmem:[#allocation2 + $0x288] sm:$0xff] }
 0x313   :  { %2596 = vrot.lane.b32.xlu1 %v2101_v3, %s4692_s25  ;;  %v7160_v7 = vpop.permute.xlu0 %2328 }
 0x314   :  { %v7162_v26 = vpop.permute.xlu1 %2454  ;;  %2722 = vrot.lane.b32.xlu0 %v2132_v48, %s4693_s26 }
 0x317   :  { %3104 = vrot.lane.b32.xlu1 %v2133_v56, %s4696_s4  ;;  %v2837_v21 = vpop.permute.xlu0 %2836 }
 0x318   :  { %v2963_v14 = vpop.permute.xlu1 %2962  ;;  %2216 = vrot.lane.b32.xlu0 %v2101_v3, %s4689_s8  ;;  %v3343_v46 = vsel %vm1732_vm5, %v3311_v10, %v2837_v21  ;;  %v3184_v3 = vsel %vm15_vm0, %v4631_v25, %v7133_v29  ;;  %v4258_v21 = vld [vmem:[%s8398_s0 + $0x1c8] sm:$0xff] }
 0x319   :  { %v3374_v42 = vsel %vm1765_vm6, %v3342_v57, %v2963_v14  ;;  %248 = vst.msk [vmem:[#allocation2 + $0x2f1] sm:$0xff] %vm15_vm0, %v4258_v21  ;;  %v2104_v57 = vld [vmem:[#allocation2 + $0x289] sm:$0xff] }
 0x31b   :  { %2342 = vrot.lane.b32.xlu1 %v2132_v48, %s4690_s23  ;;  %v7176_v1 = vpop.permute.xlu0 %2456  ;;  %v3216_v48 = vsel %vm1600_vm1, %v3184_v3, %v7154_v55 }
 0x31c   :  { %v7182_v32 = vpop.permute.xlu1 %2582  ;;  %2724 = vrot.lane.b32.xlu0 %v2133_v56, %s4693_s26 }
 0x31f   :  { %2850 = vrot.lane.b32.xlu1 %v7178_v34, %s4694_s27  ;;  %v2965_v47 = vpop.permute.xlu0 %2964 }
 0x320   :  { %v3091_v19 = vpop.permute.xlu1 %3090  ;;  %2344 = vrot.lane.b32.xlu0 %v2133_v56, %s4690_s23  ;;  %v3375_v62 = vsel %vm1765_vm6, %v3343_v46, %v2965_v47  ;;  %v3248_v56 = vsel %vm1633_vm2, %v3216_v48, %v7162_v26 }
 0x321   :  { %v3406_v38 = vsel %vm1798_vm7, %v3374_v42, %v3091_v19  ;;  %v3280_v29 = vsel %vm1666_vm3, %v3248_v56, %v7182_v32  ;;  %v3185_v32 = vsel %vm15_vm0, %v4632_v24, %v7152_v36 }
 0x322   :  { %4495 = vmatprep.mubr.msk.f32.mxu1 %vm1831_vm8, %v3406_v38  ;;  %v3217_v11 = vsel %vm1600_vm1, %v3185_v32, %v7160_v7 }
 0x323   :  { %2470 = vrot.lane.b32.xlu1 %v7178_v34, %s4691_s24  ;;  %v7207_v43 = vpop.permute.xlu0 %2202  ;;  %v3249_v47 = vsel %vm1633_vm2, %v3217_v11, %v7176_v1 }
 0x324   :  { %2852 = vrot.lane.b32.xlu0 %v7203_v60, %s4694_s27 }
 0x325   :  { %v7211_v27 = vpop.permute.xlu1 %2584 }
 0x326   :  { %v3281_v36 = vsel %vm1666_vm3, %v3249_v47, %v7211_v27 }
 0x327   :  { %2978 = vrot.lane.b32.xlu1 %v2102_v31, %s4695_s7  ;;  %v2711_v5 = vpop.permute.xlu0 %2710 }
 0x328   :  { %2472 = vrot.lane.b32.xlu0 %v7203_v60, %s4691_s24  ;;  %v3312_v55 = vsel %vm1699_vm4, %v3280_v29, %v2711_v5  ;;  %v3186_v29 = vsel %vm15_vm0, %v6773_v37, %v7207_v43  ;;  %v4260_v37 = vld [vmem:[%s8398_s0 + $0x1d8] sm:$0xff] }
 0x329   :  { %v3093_v6 = vpop.permute.xlu1 %3092  ;;  %250 = vst.msk [vmem:[#allocation2 + $0x309] sm:$0xff] %vm15_vm0, %v4260_v37 }
 0x32a   :  { %v3407_v41 = vsel %vm1798_vm7, %v3375_v62, %v3093_v6 }
 0x32b   :  { %2598 = vrot.lane.b32.xlu1 %v2102_v31, %s4692_s25  ;;  %4496 = vmatmul.mubr.msk.f32.gmra.mrb[4].mxu1 %vm1831_vm8, %v3407_v41  ;;  %v7226_v52 = vpop.permute.xlu0 %2204 }
 0x32c   :  { %2980 = vrot.lane.b32.xlu0 %v2103_v13, %s4695_s7 }
 0x32d   :  { %v7228_v49 = vpop.permute.xlu1 %2330 }
 0x32f   :  { %3106 = vrot.lane.b32.xlu1 %v2134_v22, %s4696_s4  ;;  %v2713_v45 = vpop.permute.xlu0 %2712 }
 0x330   :  { %2218 = vrot.lane.b32.xlu0 %v2102_v31, %s4689_s8  ;;  %v3313_v19 = vsel %vm1699_vm4, %v3281_v36, %v2713_v45  ;;  %v2137_v45 = vld [vmem:[#allocation2 + $0x292] sm:$0xff] }
 0x331   :  { %v2839_v51 = vpop.permute.xlu1 %2838 }
 0x332   :  { %v3344_v26 = vsel %vm1732_vm5, %v3312_v55, %v2839_v51 }
 0x333   :  { %2600 = vrot.lane.b32.xlu1 %v2103_v13, %s4692_s25  ;;  %v7234_v61 = vpop.permute.xlu0 %2332 }
 0x334   :  { %2726 = vrot.lane.b32.xlu0 %v2134_v22, %s4693_s26 }
 0x335   :  { %v7236_v12 = vpop.permute.xlu1 %2458 }
 0x337   :  { %3108 = vrot.lane.b32.xlu1 %v2135_v59, %s4696_s4  ;;  %v2841_v50 = vpop.permute.xlu0 %2840 }
 0x338   :  { %2220 = vrot.lane.b32.xlu0 %v2103_v13, %s4689_s8  ;;  %v3345_v7 = vsel %vm1732_vm5, %v3313_v19, %v2841_v50  ;;  %v4259_v50 = vld [vmem:[%s8398_s0 + $0x1d0] sm:$0xff] }
 0x339   :  { %v2967_v4 = vpop.permute.xlu1 %2966  ;;  %249 = vst.msk [vmem:[#allocation2 + $0x301] sm:$0xff] %vm15_vm0, %v4259_v50 }
 0x33a   :  { %v3376_v28 = vsel %vm1765_vm6, %v3344_v26, %v2967_v4  ;;  %v3218_v26 = vsel %vm1600_vm1, %v3186_v29, %v7228_v49  ;;  %v2138_v29 = vld [vmem:[#allocation2 + $0x2a2] sm:$0xff] }
 0x33b   :  { %2346 = vrot.lane.b32.xlu1 %v2134_v22, %s4690_s23  ;;  %v7250_v35 = vpop.permute.xlu0 %2460 }
 0x33c   :  { %2728 = vrot.lane.b32.xlu0 %v2135_v59, %s4693_s26 }
 0x33d   :  { %v7256_v17 = vpop.permute.xlu1 %2586 }
 0x33f   :  { %2854 = vrot.lane.b32.xlu1 %v7252_v44, %s4694_s27  ;;  %v2969_v14 = vpop.permute.xlu0 %2968 }
 0x340   :  { %2348 = vrot.lane.b32.xlu0 %v2135_v59, %s4690_s23  ;;  %v3377_v20 = vsel %vm1765_vm6, %v3345_v7, %v2969_v14 }
 0x341   :  { %v3095_v8 = vpop.permute.xlu1 %3094 }
 0x342   :  { %v3408_v9 = vsel %vm1798_vm7, %v3376_v28, %v3095_v8  ;;  %v7334_v8 = vld [vmem:[#allocation2 + $0x2a0] sm:$0xff] }
 0x343   :  { %2474 = vrot.lane.b32.xlu1 %v7252_v44, %s4691_s24  ;;  %4498 = vmatprep.mubr.msk.f32.mxu1 %vm1831_vm8, %v3408_v9  ;;  %v7281_v30 = vpop.permute.xlu0 %2206  ;;  %v3250_v9 = vsel %vm1633_vm2, %v3218_v26, %v7236_v12 }
 0x344   :  { %2856 = vrot.lane.b32.xlu0 %v7277_v58, %s4694_s27  ;;  %v3282_v43 = vsel %vm1666_vm3, %v3250_v9, %v7256_v17 }
 0x345   :  { %v7285_v42 = vpop.permute.xlu1 %2588 }
 0x347   :  { %2982 = vrot.lane.b32.xlu1 %v2104_v57, %s4695_s7  ;;  %v7294_v38 = vpop.permute.xlu0 %2714 }
 0x348   :  { %2476 = vrot.lane.b32.xlu0 %v7277_v58, %s4691_s24  ;;  %v3314_v12 = vsel %vm1699_vm4, %v3282_v43, %v7294_v38 }
 0x349   :  { %v3097_v16 = vpop.permute.xlu1 %3096 }
 0x34a   :  { %v3409_v1 = vsel %vm1798_vm7, %v3377_v20, %v3097_v16  ;;  %v3187_v16 = vsel %vm15_vm0, %v6838_v53, %v7226_v52  ;;  %v2106_v53 = vld [vmem:[#allocation2 + $0x2a1] sm:$0xff] }
 0x34b   :  { %2602 = vrot.lane.b32.xlu1 %v2104_v57, %s4692_s25  ;;  %4499 = vmatmul.mubr.msk.f32.gmra.mrb[6].mxu1 %vm1831_vm8, %v3409_v1  ;;  %v7302_v31 = vpop.permute.xlu0 %2208 }
 0x34c   :  { %2984 = vrot.lane.b32.xlu0 %v2105_v40, %s4695_s7 }
 0x34d   :  { %v7304_v27 = vpop.permute.xlu1 %2334 }
 0x34e   :  { %v4443_v54 = vpop.f32.mrb[0].mxu0 }
 0x34f   :  { %3868 = vst [vmem:[#allocation3 + $0x8] sm:$0xff] %v4443_v54  ;;  %3110 = vrot.lane.b32.xlu1 %v2136_v33, %s4696_s4  ;;  %v3548_v10 = vpop.f32.mrb[1].mxu0  ;;  %v7308_v5 = vpop.permute.xlu0 %2716 }
 0x350   :  { %3867 = vst [vmem:[#allocation3] sm:$0xff] %v3548_v10  ;;  %v3931_v46 = vadd.f32 %v4443_v54, %v3548_v10  ;;  %2222 = vrot.lane.b32.xlu0 %v2104_v57, %s4689_s8 }
 0x351   :  { %v2843_v62 = vpop.permute.xlu1 %2842 }
 0x352   :  { %v4446_v6 = vpop.f32.mrb[2].mxu0  ;;  %v3346_v17 = vsel %vm1732_vm5, %v3314_v12, %v2843_v62 }
 0x353   :  { %3870 = vst [vmem:[#allocation3 + $0x18] sm:$0xff] %v4446_v6  ;;  %2604 = vrot.lane.b32.xlu1 %v2105_v40, %s4692_s25  ;;  %v3558_v41 = vpop.f32.mrb[3].mxu0  ;;  %v7312_v22 = vpop.permute.xlu0 %2336 }
 0x354   :  { %3869 = vst [vmem:[#allocation3 + $0x10] sm:$0xff] %v3558_v41  ;;  %v3932_v13 = vadd.f32 %v3931_v46, %v3558_v41  ;;  %2730 = vrot.lane.b32.xlu0 %v2136_v33, %s4693_s26 }
 0x355   :  { %v7314_v51 = vpop.permute.xlu1 %2462 }
 0x356   :  { %v4449_v59 = vpop.f32.mrb[4].mxu0  ;;  %v3933_v2 = vadd.f32 %v4446_v6, %v3932_v13 }
 0x357   :  { %3872 = vst [vmem:[#allocation3 + $0x28] sm:$0xff] %v4449_v59  ;;  %3112 = vrot.lane.b32.xlu1 %v2137_v45, %s4696_s4  ;;  %v3568_v4 = vpop.f32.mrb[5].mxu0  ;;  %v2845_v3 = vpop.permute.xlu0 %2844 }
 0x358   :  { %3871 = vst [vmem:[#allocation3 + $0x20] sm:$0xff] %v3568_v4  ;;  %v3934_v25 = vadd.f32 %v3933_v2, %v3568_v4  ;;  %2224 = vrot.lane.b32.xlu0 %v2105_v40, %s4689_s8  ;;  %v7375_v40 = vld [vmem:[#allocation2 + $0x2a8] sm:$0xff] }
 0x359   :  { %v2971_v48 = vpop.permute.xlu1 %2970 }
 0x35a   :  { %v7323_v56 = vpop.f32.mrb[6].mxu0  ;;  %v3935_v21 = vadd.f32 %v4449_v59, %v3934_v25  ;;  %v3378_v36 = vsel %vm1765_vm6, %v3346_v17, %v2971_v48 }
 0x35b   :  { %3874 = vst [vmem:[#allocation3 + $0x38] sm:$0xff] %v7323_v56  ;;  %2350 = vrot.lane.b32.xlu1 %v2136_v33, %s4690_s23  ;;  %v3578_v55 = vpop.f32.mrb[7].mxu0  ;;  %v7332_v28 = vpop.permute.xlu0 %2464  ;;  %v3219_v33 = vsel %vm1600_vm1, %v3187_v16, %v7234_v61 }
 0x35c   :  { %3873 = vst [vmem:[#allocation3 + $0x30] sm:$0xff] %v3578_v55  ;;  %v3936_v14 = vadd.f32 %v3935_v21, %v3578_v55  ;;  %2732 = vrot.lane.b32.xlu0 %v2137_v45, %s4693_s26  ;;  %v3251_v52 = vsel %vm1633_vm2, %v3219_v33, %v7250_v35  ;;  %v4261_v33 = vld [vmem:[%s8398_s0 + $0x1e0] sm:$0xff] }
 0x35d   :  { %v7338_v24 = vpop.permute.xlu1 %2590  ;;  %v3283_v62 = vsel %vm1666_vm3, %v3251_v52, %v7285_v42  ;;  %251 = vst.msk [vmem:[#allocation2 + $0x319] sm:$0xff] %vm15_vm0, %v4261_v33 }
 0x35e   :  { %v7346_v49 = vpop.f32.mrb[8].mxu0  ;;  %v3937_v32 = vadd.f32 %v7323_v56, %v3936_v14  ;;  %v3315_v41 = vsel %vm1699_vm4, %v3283_v62, %v7308_v5 }
 0x35f   :  { %3876 = vst [vmem:[#allocation3 + $0x48] sm:$0xff] %v7346_v49  ;;  %2858 = vrot.lane.b32.xlu1 %v7334_v8, %s4694_s27  ;;  %v7355_v11 = vpop.f32.mrb[9].mxu0  ;;  %v2973_v47 = vpop.permute.xlu0 %2972  ;;  %v3347_v13 = vsel %vm1732_vm5, %v3315_v41, %v2845_v3  ;;  %v2107_v3 = vld [vmem:[#allocation2 + $0x2a9] sm:$0xff] }
 0x360   :  { %3875 = vst [vmem:[#allocation3 + $0x40] sm:$0xff] %v7355_v11  ;;  %v3938_v57 = vadd.f32 %v3937_v32, %v7355_v11  ;;  %2352 = vrot.lane.b32.xlu0 %v2137_v45, %s4690_s23  ;;  %v3379_v59 = vsel %vm1765_vm6, %v3347_v13, %v2973_v47  ;;  %v3188_v13 = vsel %vm15_vm0, %v6994_v15, %v7281_v30 }
 0x361   :  { %v3099_v19 = vpop.permute.xlu1 %3098 }
 0x362   :  { %v3410_v7 = vsel %vm1798_vm7, %v3378_v36, %v3099_v19  ;;  %v7363_v38 = vpop.f32.mrb[10].mxu0  ;;  %v3939_v20 = vadd.f32 %v7346_v49, %v3938_v57  ;;  %v2139_v19 = vld [vmem:[#allocation2 + $0x2aa] sm:$0xff] }
 0x363   :  { %3878 = vst [vmem:[#allocation3 + $0x58] sm:$0xff] %v7363_v38  ;;  %2478 = vrot.lane.b32.xlu1 %v7334_v8, %s4691_s24  ;;  %v7372_v1 = vpop.f32.mrb[11].mxu0  ;;  %4501 = vmatprep.mubr.msk.f32.mxu1 %vm1831_vm8, %v3410_v7  ;;  %v7381_v10 = vpop.permute.xlu0 %2210 }
 0x364   :  { %3877 = vst [vmem:[#allocation3 + $0x50] sm:$0xff] %v7372_v1  ;;  %v3940_v54 = vadd.f32 %v3939_v20, %v7372_v1  ;;  %2860 = vrot.lane.b32.xlu0 %v7375_v40, %s4694_s27 }
 0x365   :  { %v7385_v46 = vpop.permute.xlu1 %2592 }
 0x366   :  { %v7391_v6 = vpop.f32.mrb[12].mxu0  ;;  %v3941_v61 = vadd.f32 %v7363_v38, %v3940_v54 }
 0x367   :  { %3880 = vst [vmem:[#allocation3 + $0x68] sm:$0xff] %v7391_v6  ;;  %2986 = vrot.lane.b32.xlu1 %v2106_v53, %s4695_s7  ;;  %v7398_v35 = vpop.f32.mrb[13].mxu0  ;;  %v7403_v45 = vpop.permute.xlu0 %2718 }
 0x368   :  { %3879 = vst [vmem:[#allocation3 + $0x60] sm:$0xff] %v7398_v35  ;;  %v3942_v42 = vadd.f32 %v3941_v61, %v7398_v35  ;;  %2480 = vrot.lane.b32.xlu0 %v7375_v40, %s4691_s24 }
 0x369   :  { %v3101_v2 = vpop.permute.xlu1 %3100 }
 0x36a   :  { %v3411_v50 = vsel %vm1798_vm7, %v3379_v59, %v3101_v2  ;;  %v7409_v5 = vpop.f32.mrb[14].mxu0  ;;  %v3943_v4 = vadd.f32 %v7391_v6, %v3942_v42  ;;  %v3220_v59 = vsel %vm1600_vm1, %v3188_v13, %v7304_v27 }
 0x36b   :  { %3882 = vst [vmem:[#allocation3 + $0x78] sm:$0xff] %v7409_v5  ;;  %2606 = vrot.lane.b32.xlu1 %v2106_v53, %s4692_s25  ;;  %v7414_v25 = vpop.f32.mrb[15].mxu0  ;;  %4502 = vmatmul.mubr.msk.f32.gmra.mrb[8].mxu1 %vm1831_vm8, %v3411_v50  ;;  %v7419_v21 = vpop.permute.xlu0 %2212  ;;  %v3252_v15 = vsel %vm1633_vm2, %v3220_v59, %v7314_v51 }
 0x36c   :  { %3881 = vst [vmem:[#allocation3 + $0x70] sm:$0xff] %v7414_v25  ;;  %v3944_v48 = vadd.f32 %v3943_v4, %v7414_v25  ;;  %2988 = vrot.lane.b32.xlu0 %v2107_v3, %s4695_s7  ;;  %v7480_v4 = vld [vmem:[#allocation2 + $0x2b8] sm:$0xff]  ;;  %v3284_v27 = vsel %vm1666_vm3, %v3252_v15, %v7338_v24 }
 0x36d   :  { %v7421_v55 = vpop.permute.xlu1 %2338  ;;  %v3316_v51 = vsel %vm1699_vm4, %v3284_v27, %v7403_v45 }
 0x36e   :  { %v7424_v26 = vpop.f32.mrb[16].mxu0  ;;  %v3945_v14 = vadd.f32 %v7409_v5, %v3944_v48 }
 0x36f   :  { %3884 = vst [vmem:[#allocation3 + $0x88] sm:$0xff] %v7424_v26  ;;  %3114 = vrot.lane.b32.xlu1 %v2138_v29, %s4696_s4  ;;  %v7429_v9 = vpop.f32.mrb[17].mxu0  ;;  %v7433_v43 = vpop.permute.xlu0 %2720 }
 0x370   :  { %3883 = vst [vmem:[#allocation3 + $0x80] sm:$0xff] %v7429_v9  ;;  %v3946_v37 = vadd.f32 %v3945_v14, %v7429_v9  ;;  %2226 = vrot.lane.b32.xlu0 %v2106_v53, %s4689_s8 }
 0x371   :  { %v2847_v32 = vpop.permute.xlu1 %2846 }
 0x372   :  { %v7436_v12 = vpop.f32.mrb[18].mxu0  ;;  %v3947_v17 = vadd.f32 %v7424_v26, %v3946_v37  ;;  %v3348_v24 = vsel %vm1732_vm5, %v3316_v51, %v2847_v32  ;;  %v3189_v32 = vsel %vm15_vm0, %v7010_v23, %v7302_v31  ;;  %v2108_v23 = vld [vmem:[#allocation2 + $0x2b9] sm:$0xff] }
 0x373   :  { %3886 = vst [vmem:[#allocation3 + $0x98] sm:$0xff] %v7436_v12  ;;  %2608 = vrot.lane.b32.xlu1 %v2107_v3, %s4692_s25  ;;  %v7441_v57 = vpop.f32.mrb[19].mxu0  ;;  %v7445_v36 = vpop.permute.xlu0 %2340 }
 0x374   :  { %3885 = vst [vmem:[#allocation3 + $0x90] sm:$0xff] %v7441_v57  ;;  %v3948_v47 = vadd.f32 %v3947_v17, %v7441_v57  ;;  %2734 = vrot.lane.b32.xlu0 %v2138_v29, %s4693_s26 }
 0x375   :  { %v7447_v7 = vpop.permute.xlu1 %2466 }
 0x376   :  { %v7450_v20 = vpop.f32.mrb[20].mxu0  ;;  %v3949_v16 = vadd.f32 %v7436_v12, %v3948_v47 }
 0x377   :  { %3888 = vst [vmem:[#allocation3 + $0xa8] sm:$0xff] %v7450_v20  ;;  %3116 = vrot.lane.b32.xlu1 %v2139_v19, %s4696_s4  ;;  %v7458_v54 = vpop.f32.mrb[21].mxu0  ;;  %v2849_v52 = vpop.permute.xlu0 %2848 }
 0x378   :  { %3887 = vst [vmem:[#allocation3 + $0xa0] sm:$0xff] %v7458_v54  ;;  %v3950_v53 = vadd.f32 %v3949_v16, %v7458_v54  ;;  %2228 = vrot.lane.b32.xlu0 %v2107_v3, %s4689_s8  ;;  %v4262_v3 = vld [vmem:[%s8398_s0 + $0x1e8] sm:$0xff] }
 0x379   :  { %v2975_v62 = vpop.permute.xlu1 %2974  ;;  %252 = vst.msk [vmem:[#allocation2 + $0x321] sm:$0xff] %vm15_vm0, %v4262_v3 }
 0x37a   :  { %v7464_v61 = vpop.f32.mrb[22].mxu0  ;;  %v3951_v41 = vadd.f32 %v7450_v20, %v3950_v53  ;;  %v3380_v47 = vsel %vm1765_vm6, %v3348_v24, %v2975_v62  ;;  %v7521_v62 = vld [vmem:[#allocation2 + $0x2c0] sm:$0xff] }
 0x37b   :  { %3890 = vst [vmem:[#allocation3 + $0xb8] sm:$0xff] %v7464_v61  ;;  %2354 = vrot.lane.b32.xlu1 %v2138_v29, %s4690_s23  ;;  %v7472_v42 = vpop.f32.mrb[23].mxu0  ;;  %v7478_v50 = vpop.permute.xlu0 %2468 }
 0x37c   :  { %3889 = vst [vmem:[#allocation3 + $0xb0] sm:$0xff] %v7472_v42  ;;  %v3952_v2 = vadd.f32 %v3951_v41, %v7472_v42  ;;  %2736 = vrot.lane.b32.xlu0 %v2139_v19, %s4693_s26 }
 0x37d   :  { %v7484_v30 = vpop.permute.xlu1 %2594 }
 0x37e   :  { %v3953_v29 = vadd.f32 %v7464_v61, %v3952_v2 }
 0x37f   :  { %2862 = vrot.lane.b32.xlu1 %v7480_v4, %s4694_s27  ;;  %v2977_v17 = vpop.permute.xlu0 %2976 }
 0x380   :  { %v7492_v48 = vpop.f32.mrb[24].mxu0  ;;  %2356 = vrot.lane.b32.xlu0 %v2139_v19, %s4690_s23  ;;  %v3221_v19 = vsel %vm1600_vm1, %v3189_v32, %v7312_v22  ;;  %v2140_v32 = vld [vmem:[#allocation2 + $0x2ba] sm:$0xff] }
 0x381   :  { %8903 = vst [vmem:[#allocation49_spill] sm:$0xff] %v7492_v48  ;;  %3892 = vst [vmem:[#allocation3 + $0xc8] sm:$0xff] %v7492_v48  ;;  %v7501_v14 = vpop.f32.mrb[25].mxu0  ;;  %v3103_v16 = vpop.permute.xlu1 %3102  ;;  %v3253_v31 = vsel %vm1633_vm2, %v3221_v19, %v7332_v28 }
 0x382   :  { %3891 = vst [vmem:[#allocation3 + $0xc0] sm:$0xff] %v7501_v14  ;;  %v3954_v37 = vadd.f32 %v3953_v29, %v7501_v14  ;;  %v3412_v33 = vsel %vm1798_vm7, %v3380_v47, %v3103_v16  ;;  %v3285_v15 = vsel %vm1666_vm3, %v3253_v31, %v7385_v46 }
 0x383   :  { %2482 = vrot.lane.b32.xlu1 %v7480_v4, %s4691_s24  ;;  %4504 = vmatprep.mubr.msk.f32.mxu1 %vm1831_vm8, %v3412_v33  ;;  %v7527_v59 = vpop.permute.xlu0 %2214  ;;  %v3317_v27 = vsel %vm1699_vm4, %v3285_v15, %v7433_v43  ;;  %v2109_v33 = vld [vmem:[#allocation2 + $0x2c1] sm:$0xff] }
 0x384   :  { %v3955_v53 = vadd.f32 %v7492_v48, %v3954_v37  ;;  %2864 = vrot.lane.b32.xlu0 %v7521_v62, %s4694_s27  ;;  %v3349_v29 = vsel %vm1732_vm5, %v3317_v27, %v2849_v52  ;;  %v2141_v27 = vld [vmem:[#allocation2 + $0x2c2] sm:$0xff] }
 0x385   :  { %v7509_v45 = vpop.f32.mrb[26].mxu0  ;;  %v7531_v2 = vpop.permute.xlu1 %2596  ;;  %v3381_v24 = vsel %vm1765_vm6, %v3349_v29, %v2977_v17 }
 0x386   :  { %8904 = vst [vmem:[#allocation51_spill] sm:$0xff] %v7509_v45  ;;  %3894 = vst [vmem:[#allocation3 + $0xd8] sm:$0xff] %v7509_v45  ;;  %v7518_v41 = vpop.f32.mrb[27].mxu0 }
 0x387   :  { %8905 = vst [vmem:[#allocation53_spill] sm:$0xff] %v7518_v41  ;;  %3893 = vst [vmem:[#allocation3 + $0xd0] sm:$0xff] %v7518_v41  ;;  %v3956_v13 = vadd.f32 %v3955_v53, %v7518_v41  ;;  %2990 = vrot.lane.b32.xlu1 %v2108_v23, %s4695_s7  ;;  %v2723_v51 = vpop.permute.xlu0 %2722 }
 0x388   :  { %2484 = vrot.lane.b32.xlu0 %v7521_v62, %s4691_s24 }
 0x389   :  { %v7537_v3 = vpop.f32.mrb[28].mxu0  ;;  %v3957_v22 = vadd.f32 %v7509_v45, %v3956_v13  ;;  %v3105_v37 = vpop.permute.xlu1 %3104 }
 0x38a   :  { %8906 = vst [vmem:[#allocation55_spill] sm:$0xff] %v7537_v3  ;;  %3896 = vst [vmem:[#allocation3 + $0xe8] sm:$0xff] %v7537_v3  ;;  %v7544_v28 = vpop.f32.mrb[29].mxu0  ;;  %v3413_v47 = vsel %vm1798_vm7, %v3381_v24, %v3105_v37 }
 0x38b   :  { %8907 = vst [vmem:[#allocation57_spill] sm:$0xff] %v7544_v28  ;;  %3895 = vst [vmem:[#allocation3 + $0xe0] sm:$0xff] %v7544_v28  ;;  %v3958_v46 = vadd.f32 %v3957_v22, %v7544_v28  ;;  %2610 = vrot.lane.b32.xlu1 %v2108_v23, %s4692_s25  ;;  %4505 = vmatmul.mubr.msk.f32.gmra.mrb[10].mxu1 %vm1831_vm8, %v3413_v47  ;;  %v7563_v53 = vpop.permute.xlu0 %2216 }
 0x38c   :  { %2992 = vrot.lane.b32.xlu0 %v2109_v33, %s4695_s7 }
 0x38d   :  { %v7553_v43 = vpop.f32.mrb[30].mxu0  ;;  %v3959_v16 = vadd.f32 %v7537_v3, %v3958_v46  ;;  %v7565_v19 = vpop.permute.xlu1 %2342  ;;  %v4263_v46 = vld [vmem:[%s8398_s0 + $0x1f0] sm:$0xff] }
 0x38e   :  { %8908 = vst [vmem:[#allocation59_spill] sm:$0xff] %v7553_v43  ;;  %3898 = vst [vmem:[#allocation3 + $0xf8] sm:$0xff] %v7553_v43  ;;  %v7558_v52 = vpop.f32.mrb[31].mxu0 }
 0x38f   :  { %8909 = vst [vmem:[#allocation61_spill] sm:$0xff] %v7558_v52  ;;  %3897 = vst [vmem:[#allocation3 + $0xf0] sm:$0xff] %v7558_v52  ;;  %v3960_v17 = vadd.f32 %v3959_v16, %v7558_v52  ;;  %3118 = vrot.lane.b32.xlu1 %v2140_v32, %s4696_s4  ;;  %v2725_v31 = vpop.permute.xlu0 %2724 }
 0x390   :  { %2230 = vrot.lane.b32.xlu0 %v2108_v23, %s4689_s8  ;;  %253 = vst.msk [vmem:[#allocation2 + $0x331] sm:$0xff] %vm15_vm0, %v4263_v46  ;;  %v3190_v23 = vsel %vm15_vm0, %v7036_v63, %v7381_v10 }
 0x391   :  { %v7568_v13 = vadd.f32 %v7553_v43, %v3960_v17  ;;  %v2851_v15 = vpop.permute.xlu1 %2850  ;;  %v3222_v47 = vsel %vm1600_vm1, %v3190_v23, %v7421_v55  ;;  %v7593_v17 = vld [vmem:[#allocation2 + $0x2d0] sm:$0xff] }
 0x392   :  { %v3254_v46 = vsel %vm1633_vm2, %v3222_v47, %v7447_v7 }
 0x393   :  { %2612 = vrot.lane.b32.xlu1 %v2109_v33, %s4692_s25  ;;  %v7574_v22 = vpop.permute.xlu0 %2344  ;;  %v3286_v63 = vsel %vm1666_vm3, %v3254_v46, %v7484_v30  ;;  %v3191_v30 = vsel %vm15_vm0, %v7058_v39, %v7419_v21  ;;  %v2110_v46 = vld [vmem:[#allocation2 + $0x2d1] sm:$0xff] }
 0x394   :  { %2738 = vrot.lane.b32.xlu0 %v2140_v32, %s4693_s26  ;;  %v3318_v10 = vsel %vm1699_vm4, %v3286_v63, %v2723_v51  ;;  %v7617_v51 = vld [vmem:[#allocation2 + $0x2d8] sm:$0xff] }
 0x395   :  { %v7576_v29 = vpop.permute.xlu1 %2470  ;;  %v3350_v55 = vsel %vm1732_vm5, %v3318_v10, %v2851_v15  ;;  %v3223_v15 = vsel %vm1600_vm1, %v3191_v30, %v7445_v36  ;;  %v2143_v30 = vld [vmem:[#allocation2 + $0x2da] sm:$0xff] }
 0x397   :  { %3120 = vrot.lane.b32.xlu1 %v2141_v27, %s4696_s4  ;;  %v2853_v24 = vpop.permute.xlu0 %2852 }
 0x398   :  { %2232 = vrot.lane.b32.xlu0 %v2109_v33, %s4689_s8  ;;  %v4264_v33 = vld [vmem:[%s8398_s0 + $0x1f8] sm:$0xff]  ;;  %s4697_s0 = smov [#allocation3]  }
 0x399   :  { %v2979_v37 = vpop.permute.xlu1 %2978  ;;  %254 = vst.msk [vmem:[#allocation2 + $0x339] sm:$0xff] %vm15_vm0, %v4264_v33 }
 0x39b   :  { %2358 = vrot.lane.b32.xlu1 %v2140_v32, %s4690_s23  ;;  %v7591_v16 = vpop.permute.xlu0 %2472  ;;  %v3382_v32 = vsel %vm1765_vm6, %v3350_v55, %v2979_v37 }
 0x39c   :  { %2740 = vrot.lane.b32.xlu0 %v2141_v27, %s4693_s26 }
 0x39d   :  { %v2599_v43 = vpop.permute.xlu1 %2598 }
 0x39f   :  { %2866 = vrot.lane.b32.xlu1 %v7593_v17, %s4694_s27  ;;  %v2981_v7 = vpop.permute.xlu0 %2980 }
 0x3a0   :  { %2360 = vrot.lane.b32.xlu0 %v2141_v27, %s4690_s23  ;;  %v3255_v27 = vsel %vm1633_vm2, %v3223_v15, %v7478_v50 }
 0x3a1   :  { %v3107_v23 = vpop.permute.xlu1 %3106  ;;  %v3287_v39 = vsel %vm1666_vm3, %v3255_v27, %v7531_v2  ;;  %v2111_v2 = vld [vmem:[#allocation2 + $0x2d9] sm:$0xff] }
 0x3a2   :  { %v3414_v47 = vsel %vm1798_vm7, %v3382_v32, %v3107_v23  ;;  %v3319_v21 = vsel %vm1699_vm4, %v3287_v39, %v2725_v31  ;;  %v2142_v31 = vld [vmem:[#allocation2 + $0x2d2] sm:$0xff] }
 0x3a3   :  { %2486 = vrot.lane.b32.xlu1 %v7593_v17, %s4691_s24  ;;  %4507 = vmatprep.mubr.msk.f32.mxu1 %vm1831_vm8, %v3414_v47  ;;  %v7621_v37 = vpop.permute.xlu0 %2218  ;;  %v3351_v36 = vsel %vm1732_vm5, %v3319_v21, %v2853_v24  ;;  %v3192_v21 = vsel %vm15_vm0, %v7105_v18, %v7527_v59 }
 0x3a4   :  { %2868 = vrot.lane.b32.xlu0 %v7617_v51, %s4694_s27  ;;  %v3383_v10 = vsel %vm1765_vm6, %v3351_v36, %v2981_v7 }
 0x3a5   :  { %v7625_v33 = vpop.permute.xlu1 %2600 }
 0x3a7   :  { %2994 = vrot.lane.b32.xlu1 %v2110_v46, %s4695_s7  ;;  %v2727_v63 = vpop.permute.xlu0 %2726 }
 0x3a8   :  { %2488 = vrot.lane.b32.xlu0 %v7617_v51, %s4691_s24 }
 0x3a9   :  { %v3109_v55 = vpop.permute.xlu1 %3108 }
 0x3aa   :  { %v3415_v50 = vsel %vm1798_vm7, %v3383_v10, %v3109_v55  ;;  %v7663_v10 = vld [vmem:[#allocation2 + $0x2e8] sm:$0xff] }
 0x3ab   :  { %2614 = vrot.lane.b32.xlu1 %v2110_v46, %s4692_s25  ;;  %4508 = vmatmul.mubr.msk.f32.gmra.mrb[12].mxu1 %vm1831_vm8, %v3415_v50  ;;  %v7640_v32 = vpop.permute.xlu0 %2220 }
 0x3ac   :  { %2996 = vrot.lane.b32.xlu0 %v2111_v2, %s4695_s7 }
 0x3ad   :  { %v7642_v23 = vpop.permute.xlu1 %2346 }
 0x3af   :  { %3122 = vrot.lane.b32.xlu1 %v2142_v31, %s4696_s4  ;;  %v2729_v24 = vpop.permute.xlu0 %2728 }
 0x3b0   :  { %2234 = vrot.lane.b32.xlu0 %v2110_v46, %s4689_s8  ;;  %v3224_v46 = vsel %vm1600_vm1, %v3192_v21, %v7565_v19 }
 0x3b1   :  { %v2855_v7 = vpop.permute.xlu1 %2854  ;;  %v3256_v55 = vsel %vm1633_vm2, %v3224_v46, %v7576_v29 }
 0x3b3   :  { %2616 = vrot.lane.b32.xlu1 %v2111_v2, %s4692_s25  ;;  %v7648_v47 = vpop.permute.xlu0 %2348 }
 0x3b4   :  { %2742 = vrot.lane.b32.xlu0 %v2142_v31, %s4693_s26 }
 0x3b5   :  { %v7650_v15 = vpop.permute.xlu1 %2474 }
 0x3b7   :  { %3124 = vrot.lane.b32.xlu1 %v2143_v30, %s4696_s4  ;;  %v2857_v27 = vpop.permute.xlu0 %2856 }
 0x3b8   :  { %2236 = vrot.lane.b32.xlu0 %v2111_v2, %s4689_s8  ;;  %v3288_v2 = vsel %vm1666_vm3, %v3256_v55, %v2599_v43  ;;  %v3193_v55 = vsel %vm15_vm0, %v7129_v0, %v7563_v53 }
 0x3b9   :  { %v2983_v39 = vpop.permute.xlu1 %2982  ;;  %v3320_v18 = vsel %vm1699_vm4, %v3288_v2, %v2727_v63  ;;  %v2112_v2 = vld [vmem:[#allocation2 + $0x2e9] sm:$0xff] }
 0x3ba   :  { %v3352_v19 = vsel %vm1732_vm5, %v3320_v18, %v2855_v7  ;;  %v3225_v7 = vsel %vm1600_vm1, %v3193_v55, %v7574_v22 }
 0x3bb   :  { %2362 = vrot.lane.b32.xlu1 %v2142_v31, %s4690_s23  ;;  %v7661_v36 = vpop.permute.xlu0 %2476  ;;  %v3384_v31 = vsel %vm1765_vm6, %v3352_v19, %v2983_v39 }
 0x3bc   :  { %2744 = vrot.lane.b32.xlu0 %v2143_v30, %s4693_s26 }
 0x3bd   :  { %v7667_v50 = vpop.permute.xlu1 %2602  ;;  %v7670_v52 = vpop.f32.mrb[0].mxu1 }
 0x3be   :  { %3900 = vst [vmem:[#allocation3 + $0x108] sm:$0xff] %v7670_v52  ;;  %v7677_v59 = vpop.f32.mrb[1].mxu1 }
 0x3bf   :  { %2870 = vrot.lane.b32.xlu1 %v7663_v10, %s4694_s27  ;;  %8910 = vst [vmem:[#allocation69_spill] sm:$0xff] %v7677_v59  ;;  %3899 = vst [vmem:[#allocation3 + $0x100] sm:$0xff] %v7677_v59  ;;  %v3962_v43 = vadd.f32 %v7568_v13, %v7677_v59  ;;  %v2985_v29 = vpop.permute.xlu0 %2984  ;;  %v7693_v13 = vld [vmem:[#allocation2 + $0x2f0] sm:$0xff] }
 0x3c0   :  { %2364 = vrot.lane.b32.xlu0 %v2143_v30, %s4690_s23  ;;  %v3257_v30 = vsel %vm1633_vm2, %v3225_v7, %v7591_v16  ;;  %v2145_v7 = vld [vmem:[#allocation2 + $0x2f2] sm:$0xff] }
 0x3c1   :  { %v3111_v21 = vpop.permute.xlu1 %3110  ;;  %v3963_v46 = vadd.f32 %v7670_v52, %v3962_v43  ;;  %v3289_v0 = vsel %vm1666_vm3, %v3257_v30, %v7625_v33  ;;  %v2113_v33 = vld [vmem:[#allocation2 + $0x2f1] sm:$0xff] }
 0x3c2   :  { %v3416_v63 = vsel %vm1798_vm7, %v3384_v31, %v3111_v21  ;;  %v3321_v53 = vsel %vm1699_vm4, %v3289_v0, %v2729_v24  ;;  %v2144_v24 = vld [vmem:[#allocation2 + $0x2ea] sm:$0xff] }
 0x3c3   :  { %2490 = vrot.lane.b32.xlu1 %v7663_v10, %s4691_s24  ;;  %4510 = vmatprep.mubr.msk.f32.mxu1 %vm1831_vm8, %v3416_v63  ;;  %v7697_v39 = vpop.permute.xlu0 %2222  ;;  %v3353_v22 = vsel %vm1732_vm5, %v3321_v53, %v2857_v27 }
 0x3c4   :  { %2872 = vrot.lane.b32.xlu0 %v7693_v13, %s4694_s27  ;;  %v3385_v43 = vsel %vm1765_vm6, %v3353_v22, %v2985_v29  ;;  %v3194_v22 = vsel %vm15_vm0, %v7178_v34, %v7621_v37 }
 0x3c5   :  { %v7701_v18 = vpop.permute.xlu1 %2604 }
 0x3c7   :  { %2998 = vrot.lane.b32.xlu1 %v2112_v2, %s4695_s7  ;;  %v2731_v19 = vpop.permute.xlu0 %2730 }
 0x3c8   :  { %2492 = vrot.lane.b32.xlu0 %v7693_v13, %s4691_s24 }
 0x3c9   :  { %v3113_v31 = vpop.permute.xlu1 %3112 }
 0x3ca   :  { %v3417_v16 = vsel %vm1798_vm7, %v3385_v43, %v3113_v31  ;;  %v7739_v31 = vld [vmem:[#allocation2 + $0x300] sm:$0xff] }
 0x3cb   :  { %2618 = vrot.lane.b32.xlu1 %v2112_v2, %s4692_s25  ;;  %4511 = vmatmul.mubr.msk.f32.gmra.mrb[14].mxu1 %vm1831_vm8, %v3417_v16  ;;  %v7716_v21 = vpop.permute.xlu0 %2224 }
 0x3cc   :  { %3000 = vrot.lane.b32.xlu0 %v2113_v33, %s4695_s7 }
 0x3cd   :  { %v7718_v63 = vpop.permute.xlu1 %2350 }
 0x3cf   :  { %3126 = vrot.lane.b32.xlu1 %v2144_v24, %s4696_s4  ;;  %v2733_v27 = vpop.permute.xlu0 %2732 }
 0x3d0   :  { %2238 = vrot.lane.b32.xlu0 %v2112_v2, %s4689_s8  ;;  %v3226_v2 = vsel %vm1600_vm1, %v3194_v22, %v7642_v23 }
 0x3d1   :  { %v2859_v29 = vpop.permute.xlu1 %2858  ;;  %v3258_v16 = vsel %vm1633_vm2, %v3226_v2, %v7650_v15 }
 0x3d3   :  { %2620 = vrot.lane.b32.xlu1 %v2113_v33, %s4692_s25  ;;  %v7724_v55 = vpop.permute.xlu0 %2352 }
 0x3d4   :  { %2746 = vrot.lane.b32.xlu0 %v2144_v24, %s4693_s26 }
 0x3d5   :  { %v7726_v30 = vpop.permute.xlu1 %2478 }
 0x3d7   :  { %3128 = vrot.lane.b32.xlu1 %v2145_v7, %s4696_s4  ;;  %v2861_v0 = vpop.permute.xlu0 %2860 }
 0x3d8   :  { %2240 = vrot.lane.b32.xlu0 %v2113_v33, %s4689_s8  ;;  %v3290_v33 = vsel %vm1666_vm3, %v3258_v16, %v7667_v50  ;;  %v3195_v16 = vsel %vm15_vm0, %v7203_v60, %v7640_v32 }
 0x3d9   :  { %v2987_v53 = vpop.permute.xlu1 %2986  ;;  %v3322_v34 = vsel %vm1699_vm4, %v3290_v33, %v2731_v19  ;;  %v2114_v33 = vld [vmem:[#allocation2 + $0x301] sm:$0xff] }
 0x3da   :  { %v3354_v23 = vsel %vm1732_vm5, %v3322_v34, %v2859_v29  ;;  %v3227_v29 = vsel %vm1600_vm1, %v3195_v16, %v7648_v47 }
 0x3db   :  { %2366 = vrot.lane.b32.xlu1 %v2144_v24, %s4690_s23  ;;  %v7737_v43 = vpop.permute.xlu0 %2480  ;;  %v3386_v24 = vsel %vm1765_vm6, %v3354_v23, %v2987_v53 }
 0x3dc   :  { %2748 = vrot.lane.b32.xlu0 %v2145_v7, %s4693_s26 }
 0x3dd   :  { %v7743_v59 = vpop.permute.xlu1 %2606  ;;  %v7747_v3 = vpop.f32.mrb[2].mxu1 }
 0x3de   :  { %3902 = vst [vmem:[#allocation3 + $0x118] sm:$0xff] %v7747_v3  ;;  %v7754_v37 = vpop.f32.mrb[3].mxu1 }
 0x3df   :  { %2874 = vrot.lane.b32.xlu1 %v7739_v31, %s4694_s27  ;;  %3901 = vst [vmem:[#allocation3 + $0x110] sm:$0xff] %v7754_v37  ;;  %v3964_v15 = vadd.f32 %v3963_v46, %v7754_v37  ;;  %v2989_v50 = vpop.permute.xlu0 %2988  ;;  %v7769_v46 = vld [vmem:[#allocation2 + $0x308] sm:$0xff] }
 0x3e0   :  { %2368 = vrot.lane.b32.xlu0 %v2145_v7, %s4690_s23  ;;  %v3259_v7 = vsel %vm1633_vm2, %v3227_v29, %v7661_v36  ;;  %v2147_v29 = vld [vmem:[#allocation2 + $0x30a] sm:$0xff] }
 0x3e1   :  { %v3115_v22 = vpop.permute.xlu1 %3114  ;;  %v3965_v19 = vadd.f32 %v7747_v3, %v3964_v15  ;;  %v3291_v60 = vsel %vm1666_vm3, %v3259_v7, %v7701_v18  ;;  %v2115_v18 = vld [vmem:[#allocation2 + $0x309] sm:$0xff] }
 0x3e2   :  { %v3418_v2 = vsel %vm1798_vm7, %v3386_v24, %v3115_v22  ;;  %v3323_v32 = vsel %vm1699_vm4, %v3291_v60, %v2733_v27  ;;  %v2146_v27 = vld [vmem:[#allocation2 + $0x302] sm:$0xff] }
 0x3e3   :  { %2494 = vrot.lane.b32.xlu1 %v7739_v31, %s4691_s24  ;;  %4513 = vmatprep.mubr.msk.f32.mxu1 %vm1831_vm8, %v3418_v2  ;;  %v7773_v53 = vpop.permute.xlu0 %2226  ;;  %v3355_v47 = vsel %vm1732_vm5, %v3323_v32, %v2861_v0 }
 0x3e4   :  { %2876 = vrot.lane.b32.xlu0 %v7769_v46, %s4694_s27  ;;  %v3387_v15 = vsel %vm1765_vm6, %v3355_v47, %v2989_v50  ;;  %v3196_v47 = vsel %vm15_vm0, %v7252_v44, %v7697_v39 }
 0x3e5   :  { %v7777_v34 = vpop.permute.xlu1 %2608 }
 0x3e7   :  { %3002 = vrot.lane.b32.xlu1 %v2114_v33, %s4695_s7  ;;  %v2735_v23 = vpop.permute.xlu0 %2734 }
 0x3e8   :  { %2496 = vrot.lane.b32.xlu0 %v7769_v46, %s4691_s24 }
 0x3e9   :  { %v3117_v24 = vpop.permute.xlu1 %3116 }
 0x3ea   :  { %v3419_v36 = vsel %vm1798_vm7, %v3387_v15, %v3117_v24  ;;  %v7815_v24 = vld [vmem:[#allocation2 + $0x318] sm:$0xff] }
 0x3eb   :  { %2622 = vrot.lane.b32.xlu1 %v2114_v33, %s4692_s25  ;;  %4514 = vmatmul.mubr.msk.f32.gmra.mrb[16].mxu1 %vm1831_vm8, %v3419_v36  ;;  %v7792_v22 = vpop.permute.xlu0 %2228 }
 0x3ec   :  { %3004 = vrot.lane.b32.xlu0 %v2115_v18, %s4695_s7 }
 0x3ed   :  { %v7794_v2 = vpop.permute.xlu1 %2354 }
 0x3ef   :  { %3130 = vrot.lane.b32.xlu1 %v2146_v27, %s4696_s4  ;;  %v2737_v0 = vpop.permute.xlu0 %2736 }
 0x3f0   :  { %2242 = vrot.lane.b32.xlu0 %v2114_v33, %s4689_s8  ;;  %v3228_v33 = vsel %vm1600_vm1, %v3196_v47, %v7718_v63 }
 0x3f1   :  { %v2863_v50 = vpop.permute.xlu1 %2862  ;;  %v3260_v36 = vsel %vm1633_vm2, %v3228_v33, %v7726_v30 }
 0x3f3   :  { %2624 = vrot.lane.b32.xlu1 %v2115_v18, %s4692_s25  ;;  %v7800_v16 = vpop.permute.xlu0 %2356 }
 0x3f4   :  { %2750 = vrot.lane.b32.xlu0 %v2146_v27, %s4693_s26 }
 0x3f5   :  { %v7802_v7 = vpop.permute.xlu1 %2482 }
 0x3f7   :  { %3132 = vrot.lane.b32.xlu1 %v2147_v29, %s4696_s4  ;;  %v2865_v60 = vpop.permute.xlu0 %2864 }
 0x3f8   :  { %2244 = vrot.lane.b32.xlu0 %v2115_v18, %s4689_s8  ;;  %v3292_v18 = vsel %vm1666_vm3, %v3260_v36, %v7743_v59  ;;  %v3197_v36 = vsel %vm15_vm0, %v7277_v58, %v7716_v21 }
 0x3f9   :  { %v2991_v32 = vpop.permute.xlu1 %2990  ;;  %v3324_v44 = vsel %vm1699_vm4, %v3292_v18, %v2735_v23  ;;  %v2116_v18 = vld [vmem:[#allocation2 + $0x319] sm:$0xff] }
 0x3fa   :  { %v3356_v63 = vsel %vm1732_vm5, %v3324_v44, %v2863_v50  ;;  %v3229_v50 = vsel %vm1600_vm1, %v3197_v36, %v7724_v55 }
 0x3fb   :  { %2370 = vrot.lane.b32.xlu1 %v2146_v27, %s4690_s23  ;;  %v7813_v15 = vpop.permute.xlu0 %2484  ;;  %v3388_v27 = vsel %vm1765_vm6, %v3356_v63, %v2991_v32 }
 0x3fc   :  { %2752 = vrot.lane.b32.xlu0 %v2147_v29, %s4693_s26 }
 0x3fd   :  { %v7819_v28 = vpop.permute.xlu1 %2610 }
 0x3fe   :  { %v7823_v45 = vpop.f32.mrb[4].mxu1 }
 0x3ff   :  { %3904 = vst [vmem:[#allocation3 + $0x128] sm:$0xff] %v7823_v45  ;;  %2878 = vrot.lane.b32.xlu1 %v7815_v24, %s4694_s27  ;;  %v7830_v39 = vpop.f32.mrb[5].mxu1  ;;  %v2993_v59 = vpop.permute.xlu0 %2992 }
 0x400   :  { %3903 = vst [vmem:[#allocation3 + $0x120] sm:$0xff] %v7830_v39  ;;  %v3966_v30 = vadd.f32 %v3965_v19, %v7830_v39  ;;  %2372 = vrot.lane.b32.xlu0 %v2147_v29, %s4690_s23  ;;  %v7845_v19 = vld [vmem:[#allocation2 + $0x320] sm:$0xff]  ;;  %v3261_v29 = vsel %vm1633_vm2, %v3229_v50, %v7737_v43 }
 0x401   :  { %v3119_v47 = vpop.permute.xlu1 %3118  ;;  %v3293_v58 = vsel %vm1666_vm3, %v3261_v29, %v7777_v34  ;;  %v2117_v34 = vld [vmem:[#allocation2 + $0x321] sm:$0xff] }
 0x402   :  { %v3420_v33 = vsel %vm1798_vm7, %v3388_v27, %v3119_v47  ;;  %v3967_v23 = vadd.f32 %v7823_v45, %v3966_v30  ;;  %v3325_v21 = vsel %vm1699_vm4, %v3293_v58, %v2737_v0  ;;  %v2148_v0 = vld [vmem:[#allocation2 + $0x31a] sm:$0xff]  ;;  %v2149_v50 = vld [vmem:[#allocation2 + $0x322] sm:$0xff] }
 0x403   :  { %2498 = vrot.lane.b32.xlu1 %v7815_v24, %s4691_s24  ;;  %4516 = vmatprep.mubr.msk.f32.mxu1 %vm1831_vm8, %v3420_v33  ;;  %v7849_v32 = vpop.permute.xlu0 %2230  ;;  %v3357_v55 = vsel %vm1732_vm5, %v3325_v21, %v2865_v60 }
 0x404   :  { %2880 = vrot.lane.b32.xlu0 %v7845_v19, %s4694_s27  ;;  %v3389_v30 = vsel %vm1765_vm6, %v3357_v55, %v2993_v59  ;;  %v3198_v55 = vsel %vm15_vm0, %v7334_v8, %v7773_v53 }
 0x405   :  { %v7853_v44 = vpop.permute.xlu1 %2612 }
 0x407   :  { %3006 = vrot.lane.b32.xlu1 %v2116_v18, %s4695_s7  ;;  %v2739_v63 = vpop.permute.xlu0 %2738 }
 0x408   :  { %2500 = vrot.lane.b32.xlu0 %v7845_v19, %s4691_s24 }
 0x409   :  { %v3121_v27 = vpop.permute.xlu1 %3120 }
 0x40a   :  { %v3421_v43 = vsel %vm1798_vm7, %v3389_v30, %v3121_v27  ;;  %v2086_v27 = vld [vmem:[#allocation2 + $0x330] sm:$0xff] }
 0x40b   :  { %2626 = vrot.lane.b32.xlu1 %v2116_v18, %s4692_s25  ;;  %4517 = vmatmul.mubr.msk.f32.gmra.mrb[18].mxu1 %vm1831_vm8, %v3421_v43  ;;  %v7868_v47 = vpop.permute.xlu0 %2232 }
 0x40c   :  { %3008 = vrot.lane.b32.xlu0 %v2117_v34, %s4695_s7 }
 0x40d   :  { %v7870_v33 = vpop.permute.xlu1 %2358 }
 0x40f   :  { %3134 = vrot.lane.b32.xlu1 %v2148_v0, %s4696_s4  ;;  %v2741_v60 = vpop.permute.xlu0 %2740 }
 0x410   :  { %2246 = vrot.lane.b32.xlu0 %v2116_v18, %s4689_s8  ;;  %v3230_v18 = vsel %vm1600_vm1, %v3198_v55, %v7794_v2 }
 0x411   :  { %v2867_v59 = vpop.permute.xlu1 %2866  ;;  %v3262_v43 = vsel %vm1633_vm2, %v3230_v18, %v7802_v7 }
 0x413   :  { %2628 = vrot.lane.b32.xlu1 %v2117_v34, %s4692_s25  ;;  %v7876_v36 = vpop.permute.xlu0 %2360 }
 0x414   :  { %2754 = vrot.lane.b32.xlu0 %v2148_v0, %s4693_s26 }
 0x415   :  { %v7878_v29 = vpop.permute.xlu1 %2486 }
 0x417   :  { %3136 = vrot.lane.b32.xlu1 %v2149_v50, %s4696_s4  ;;  %v2869_v58 = vpop.permute.xlu0 %2868 }
 0x418   :  { %2248 = vrot.lane.b32.xlu0 %v2117_v34, %s4689_s8  ;;  %v3294_v34 = vsel %vm1666_vm3, %v3262_v43, %v7819_v28  ;;  %v3199_v43 = vsel %vm15_vm0, %v7375_v40, %v7792_v22 }
 0x419   :  { %v2995_v21 = vpop.permute.xlu1 %2994  ;;  %v3326_v8 = vsel %vm1699_vm4, %v3294_v34, %v2739_v63  ;;  %v2118_v34 = vld [vmem:[#allocation2 + $0x331] sm:$0xff] }
 0x41a   :  { %v3358_v2 = vsel %vm1732_vm5, %v3326_v8, %v2867_v59  ;;  %v2087_v59 = vld [vmem:[#allocation2 + $0x338] sm:$0xff] }
 0x41b   :  { %2374 = vrot.lane.b32.xlu1 %v2148_v0, %s4690_s23  ;;  %v7889_v30 = vpop.permute.xlu0 %2488  ;;  %v3390_v28 = vsel %vm1765_vm6, %v3358_v2, %v2995_v21 }
 0x41c   :  { %2756 = vrot.lane.b32.xlu0 %v2149_v50, %s4693_s26 }
 0x41d   :  { %v7893_v41 = vpop.permute.xlu1 %2614 }
 0x41e   :  { %v7897_v48 = vpop.f32.mrb[6].mxu1 }
 0x41f   :  { %3906 = vst [vmem:[#allocation3 + $0x138] sm:$0xff] %v7897_v48  ;;  %2882 = vrot.lane.b32.xlu1 %v2086_v27, %s4694_s27  ;;  %v7903_v53 = vpop.f32.mrb[7].mxu1  ;;  %v2997_v0 = vpop.permute.xlu0 %2996 }
 0x420   :  { %3905 = vst [vmem:[#allocation3 + $0x130] sm:$0xff] %v7903_v53  ;;  %v3968_v7 = vadd.f32 %v3967_v23, %v7903_v53  ;;  %2376 = vrot.lane.b32.xlu0 %v2149_v50, %s4690_s23  ;;  %v3231_v23 = vsel %vm1600_vm1, %v3199_v43, %v7800_v16  ;;  %s4208_s23 = sshll.u32 %s4697_s0, 4  ;;  %s4209_s23 = int_to_ptr.vmem [resolvable:$true] %s4208_s23 }
 0x421   :  { %v3123_v55 = vpop.permute.xlu1 %3122  ;;  %v3263_v50 = vsel %vm1633_vm2, %v3231_v23, %v7813_v15  ;;  %v2119_v15 = vld [vmem:[#allocation2 + $0x339] sm:$0xff]  ;;  %v2088_v23 = vld [vmem:[#allocation2 + $0x348] sm:$0xff]  ;;  %p4645_p1 = scmp.lt.s32.totalorder %s4209_s23, %s4209_s23 }
 0x422   :  { %v3422_v18 = vsel %vm1798_vm7, %v3390_v28, %v3123_v55  ;;  %v3969_v63 = vadd.f32 %v7897_v48, %v3968_v7  ;;  %v3295_v2 = vsel %vm1666_vm3, %v3263_v50, %v7853_v44  ;;  %v2089_v50 = vld [vmem:[#allocation2 + $0x350] sm:$0xff] }
 0x423   :  { %2502 = vrot.lane.b32.xlu1 %v2086_v27, %s4691_s24  ;;  %4519 = vmatprep.mubr.msk.f32.mxu1 %vm1831_vm8, %v3422_v18  ;;  %v7919_v21 = vpop.permute.xlu0 %2234  ;;  %v3327_v40 = vsel %vm1699_vm4, %v3295_v2, %v2741_v60  ;;  %v2150_v60 = vld [vmem:[#allocation2 + $0x332] sm:$0xff]  ;;  %v2151_v18 = vld [vmem:[#allocation2 + $0x33a] sm:$0xff] }
 0x424   :  { %2884 = vrot.lane.b32.xlu0 %v2087_v59, %s4694_s27  ;;  %v3359_v22 = vsel %vm1732_vm5, %v3327_v40, %v2869_v58  ;;  %v3200_v40 = vsel %vm15_vm0, %v7480_v4, %v7849_v32 }
 0x425   :  { %v7923_v8 = vpop.permute.xlu1 %2616  ;;  %v3391_v27 = vsel %vm1765_vm6, %v3359_v22, %v2997_v0  ;;  %v2120_v22 = vld [vmem:[#allocation2 + $0x349] sm:$0xff] }
 0x427   :  { %3010 = vrot.lane.b32.xlu1 %v2118_v34, %s4695_s7  ;;  %v2743_v16 = vpop.permute.xlu0 %2742 }
 0x428   :  { %2504 = vrot.lane.b32.xlu0 %v2087_v59, %s4691_s24  ;;  %s4640_s24 = scalar_lea.vmem %s4209_s23, 8192 }
 0x429   :  { %v3125_v7 = vpop.permute.xlu1 %3124  ;;  %p4641_p0 = scmp.ne.s32.totalorder %s4209_s23, %s4640_s24  ;;  %p4646_p2 = scmp.lt.s32.totalorder %s4640_s24, %s4640_s24 }
 0x42a   :  { %v3423_v28 = vsel %vm1798_vm7, %v3391_v27, %v3125_v7  ;;  %v3232_v27 = vsel %vm1600_vm1, %v3200_v40, %v7870_v33  ;;  %v2152_v33 = vld [vmem:[#allocation2 + $0x34a] sm:$0xff]  ;;  %v2153_v40 = vld [vmem:[#allocation2 + $0x352] sm:$0xff] }
 0x42b   :  { %2630 = vrot.lane.b32.xlu1 %v2118_v34, %s4692_s25  ;;  %4520 = vmatmul.mubr.msk.f32.gmra.mrb[20].mxu1 %vm1831_vm8, %v3423_v28  ;;  %v7936_v44 = vpop.permute.xlu0 %2236  ;;  %v2121_v28 = vld [vmem:[#allocation2 + $0x351] sm:$0xff]  ;;  %p4647_p3 = por %p4646_p2, %p4645_p1 }
 0x42c   :  { %3012 = vrot.lane.b32.xlu0 %v2119_v15, %s4695_s7 }
 0x42d   :  { %v7938_v55 = vpop.permute.xlu1 %2362  ;;  %p4648_p4 = pnand %p4647_p3, %p4641_p0 }
 0x42f   :  { %3138 = vrot.lane.b32.xlu1 %v2150_v60, %s4696_s4  ;;  %v2745_v58 = vpop.permute.xlu0 %2744 }
 0x430   :  { %2632 = vrot.lane.b32.xlu0 %v2119_v15, %s4692_s25  ;;  %v3264_v15 = vsel %vm1633_vm2, %v3232_v27, %v7878_v29 }
 0x431   :  { %v2871_v0 = vpop.permute.xlu1 %2870 }
 0x433   :  { %2758 = vrot.lane.b32.xlu1 %v2150_v60, %s4693_s26  ;;  %v7944_v43 = vpop.permute.xlu0 %2364 }
 0x434   :  { %3140 = vrot.lane.b32.xlu0 %v2151_v18, %s4696_s4 }
 0x435   :  { %v2491_v59 = vpop.permute.xlu1 %2490 }
 0x437   :  { %2760 = vrot.lane.b32.xlu1 %v2151_v18, %s4693_s26  ;;  %v2873_v34 = vpop.permute.xlu0 %2872  ;;  %v3296_v18 = vsel %vm1666_vm3, %v3264_v15, %v7893_v41  ;;  %v3201_v15 = vsel %vm15_vm0, %v7521_v62, %v7868_v47 }
 0x438   :  { %2886 = vrot.lane.b32.xlu0 %v2088_v23, %s4694_s27  ;;  %v3328_v4 = vsel %vm1699_vm4, %v3296_v18, %v2743_v16 }
 0x439   :  { %v2999_v2 = vpop.permute.xlu1 %2998 }
 0x43b   :  { %2888 = vrot.lane.b32.xlu1 %v2089_v50, %s4694_s27  ;;  %v7955_v7 = vpop.permute.xlu0 %2492  ;;  %v3360_v50 = vsel %vm1732_vm5, %v3328_v4, %v2871_v0 }
 0x43c   :  { %3014 = vrot.lane.b32.xlu0 %v2120_v22, %s4695_s7  ;;  %v3392_v27 = vsel %vm1765_vm6, %v3360_v50, %v2999_v2 }
 0x43d   :  { %v2619_v60 = vpop.permute.xlu1 %2618 }
 0x43e   :  { %v7961_v23 = vpop.f32.mrb[8].mxu1 }
 0x43f   :  { %3908 = vst [vmem:[#allocation3 + $0x148] sm:$0xff] %v7961_v23  ;;  %3016 = vrot.lane.b32.xlu1 %v2121_v28, %s4695_s7  ;;  %v7967_v32 = vpop.f32.mrb[9].mxu1  ;;  %v3001_v41 = vpop.permute.xlu0 %3000 }
 0x440   :  { %3907 = vst [vmem:[#allocation3 + $0x140] sm:$0xff] %v7967_v32  ;;  %v3970_v29 = vadd.f32 %v3969_v63, %v7967_v32  ;;  %3142 = vrot.lane.b32.xlu0 %v2152_v33, %s4696_s4  ;;  %v3233_v63 = vsel %vm1600_vm1, %v3201_v15, %v7876_v36 }
 0x441   :  { %v3127_v22 = vpop.permute.xlu1 %3126  ;;  %v3265_v2 = vsel %vm1633_vm2, %v3233_v63, %v7889_v30 }
 0x442   :  { %v3424_v16 = vsel %vm1798_vm7, %v3392_v27, %v3127_v22  ;;  %v3971_v28 = vadd.f32 %v7961_v23, %v3970_v29  ;;  %v3297_v4 = vsel %vm1666_vm3, %v3265_v2, %v7923_v8 }
 0x443   :  { %3144 = vrot.lane.b32.xlu1 %v2153_v40, %s4696_s4  ;;  %4522 = vmatprep.mubr.msk.f32.mxu1 %vm1831_vm8, %v3424_v16  ;;  %v2239_v0 = vpop.permute.xlu0 %2238  ;;  %v3329_v33 = vsel %vm1699_vm4, %v3297_v4, %v2745_v58 }
 0x444   :  { %v3361_v50 = vsel %vm1732_vm5, %v3329_v33, %v2873_v34  ;;  %v3202_v34 = vsel %vm15_vm0, %v7593_v17, %v7919_v21 }
 0x445   :  { %v2621_v18 = vpop.permute.xlu1 %2620  ;;  %v3393_v47 = vsel %vm1765_vm6, %v3361_v50, %v3001_v41  ;;  %v3234_v41 = vsel %vm1600_vm1, %v3202_v34, %v7938_v55 }
 0x446   :  { %v3266_v2 = vsel %vm1633_vm2, %v3234_v41, %v2491_v59 }
 0x447   :  { %v2747_v62 = vpop.permute.xlu0 %2746  ;;  %v3298_v33 = vsel %vm1666_vm3, %v3266_v2, %v2619_v60 }
 0x449   :  { %v3129_v29 = vpop.permute.xlu1 %3128 }
 0x44a   :  { %v3425_v40 = vsel %vm1798_vm7, %v3393_v47, %v3129_v29  ;;  %v3330_v47 = vsel %vm1699_vm4, %v3298_v33, %v2747_v62  ;;  %v3203_v62 = vsel %vm15_vm0, %v7617_v51, %v7936_v44 }
 0x44b   :  { %4523 = vmatmul.mubr.msk.f32.gmra.mrb[22].mxu1 %vm1831_vm8, %v3425_v40  ;;  %v7992_v36 = vpop.permute.xlu0 %2240 }
 0x44d   :  { %v2367_v27 = vpop.permute.xlu1 %2366 }
 0x44f   :  { %v2749_v30 = vpop.permute.xlu0 %2748 }
 0x451   :  { %v2875_v22 = vpop.permute.xlu1 %2874 }
 0x452   :  { %v3362_v40 = vsel %vm1732_vm5, %v3330_v47, %v2875_v22  ;;  %v3235_v22 = vsel %vm1600_vm1, %v3203_v62, %v7944_v43 }
 0x453   :  { %v7994_v16 = vpop.permute.xlu0 %2368 }
 0x455   :  { %v2495_v8 = vpop.permute.xlu1 %2494 }
 0x457   :  { %v2877_v15 = vpop.permute.xlu0 %2876 }
 0x459   :  { %v3003_v58 = vpop.permute.xlu1 %3002 }
 0x45a   :  { %v3394_v55 = vsel %vm1765_vm6, %v3362_v40, %v3003_v58 }
 0x45b   :  { %v2497_v63 = vpop.permute.xlu0 %2496 }
 0x45d   :  { %v2623_v4 = vpop.permute.xlu1 %2622 }
 0x45e   :  { %v8003_v50 = vpop.f32.mrb[10].mxu1 }
 0x45f   :  { %3910 = vst [vmem:[#allocation3 + $0x158] sm:$0xff] %v8003_v50  ;;  %v8007_v29 = vpop.f32.mrb[11].mxu1  ;;  %v3005_v21 = vpop.permute.xlu0 %3004 }
 0x460   :  { %3909 = vst [vmem:[#allocation3 + $0x150] sm:$0xff] %v8007_v29  ;;  %v3972_v17 = vadd.f32 %v3971_v28, %v8007_v29  ;;  %v3267_v28 = vsel %vm1633_vm2, %v3235_v22, %v7955_v7 }
 0x461   :  { %v3131_v59 = vpop.permute.xlu1 %3130  ;;  %v3299_v58 = vsel %vm1666_vm3, %v3267_v28, %v2621_v18 }
 0x462   :  { %v3426_v60 = vsel %vm1798_vm7, %v3394_v55, %v3131_v59  ;;  %v3973_v34 = vadd.f32 %v8003_v50, %v3972_v17  ;;  %v3331_v33 = vsel %vm1699_vm4, %v3299_v58, %v2749_v30 }
 0x463   :  { %4525 = vmatprep.mubr.msk.f32.mxu1 %vm1831_vm8, %v3426_v60  ;;  %v2243_v41 = vpop.permute.xlu0 %2242  ;;  %v3363_v47 = vsel %vm1732_vm5, %v3331_v33, %v2877_v15  ;;  %v3204_v15 = vsel %vm15_vm0, %v7663_v10, %v2239_v0 }
 0x464   :  { %v3395_v17 = vsel %vm1765_vm6, %v3363_v47, %v3005_v21  ;;  %v3236_v21 = vsel %vm1600_vm1, %v3204_v15, %v2367_v27 }
 0x465   :  { %v2625_v2 = vpop.permute.xlu1 %2624  ;;  %v3268_v28 = vsel %vm1633_vm2, %v3236_v21, %v2495_v8 }
 0x466   :  { %v3300_v33 = vsel %vm1666_vm3, %v3268_v28, %v2623_v4 }
 0x467   :  { %v2751_v40 = vpop.permute.xlu0 %2750 }
 0x469   :  { %v3133_v51 = vpop.permute.xlu1 %3132 }
 0x46a   :  { %v3427_v44 = vsel %vm1798_vm7, %v3395_v17, %v3133_v51  ;;  %v3332_v17 = vsel %vm1699_vm4, %v3300_v33, %v2751_v40  ;;  %v3205_v40 = vsel %vm15_vm0, %v7693_v13, %v7992_v36 }
 0x46b   :  { %4526 = vmatmul.mubr.msk.f32.gmra.mrb[24].mxu1 %vm1831_vm8, %v3427_v44  ;;  %v8029_v43 = vpop.permute.xlu0 %2244 }
 0x46d   :  { %v2371_v55 = vpop.permute.xlu1 %2370 }
 0x46f   :  { %v2753_v59 = vpop.permute.xlu0 %2752 }
 0x471   :  { %v2879_v7 = vpop.permute.xlu1 %2878 }
 0x472   :  { %v3364_v44 = vsel %vm1732_vm5, %v3332_v17, %v2879_v7  ;;  %v3237_v7 = vsel %vm1600_vm1, %v3205_v40, %v7994_v16 }
 0x473   :  { %v8031_v60 = vpop.permute.xlu0 %2372 }
 0x475   :  { %v2499_v18 = vpop.permute.xlu1 %2498 }
 0x477   :  { %v2881_v62 = vpop.permute.xlu0 %2880 }
 0x479   :  { %v3007_v30 = vpop.permute.xlu1 %3006 }
 0x47a   :  { %v3396_v27 = vsel %vm1765_vm6, %v3364_v44, %v3007_v30 }
 0x47b   :  { %v2501_v22 = vpop.permute.xlu0 %2500 }
 0x47d   :  { %v2627_v58 = vpop.permute.xlu1 %2626 }
 0x47e   :  { %v8038_v47 = vpop.f32.mrb[12].mxu1 }
 0x47f   :  { %3912 = vst [vmem:[#allocation3 + $0x168] sm:$0xff] %v8038_v47  ;;  %v8042_v51 = vpop.f32.mrb[13].mxu1  ;;  %v3009_v0 = vpop.permute.xlu0 %3008 }
 0x480   :  { %3911 = vst [vmem:[#allocation3 + $0x160] sm:$0xff] %v8042_v51  ;;  %v3974_v10 = vadd.f32 %v3973_v34, %v8042_v51  ;;  %v3269_v34 = vsel %vm1633_vm2, %v3237_v7, %v2497_v63 }
 0x481   :  { %v3135_v8 = vpop.permute.xlu1 %3134  ;;  %v3301_v30 = vsel %vm1666_vm3, %v3269_v34, %v2625_v2 }
 0x482   :  { %v3428_v4 = vsel %vm1798_vm7, %v3396_v27, %v3135_v8  ;;  %v3975_v15 = vadd.f32 %v8038_v47, %v3974_v10  ;;  %v3333_v33 = vsel %vm1699_vm4, %v3301_v30, %v2753_v59  ;;  %v3206_v59 = vsel %vm15_vm0, %v7739_v31, %v2243_v41 }
 0x483   :  { %4528 = vmatprep.mubr.msk.f32.mxu1 %vm1831_vm8, %v3428_v4  ;;  %v2247_v21 = vpop.permute.xlu0 %2246  ;;  %v3365_v17 = vsel %vm1732_vm5, %v3333_v33, %v2881_v62  ;;  %v3238_v62 = vsel %vm1600_vm1, %v3206_v59, %v2371_v55 }
 0x484   :  { %v3397_v10 = vsel %vm1765_vm6, %v3365_v17, %v3009_v0  ;;  %v3270_v0 = vsel %vm1633_vm2, %v3238_v62, %v2499_v18 }
 0x485   :  { %v2629_v28 = vpop.permute.xlu1 %2628  ;;  %v3302_v33 = vsel %vm1666_vm3, %v3270_v0, %v2627_v58  ;;  %v3207_v58 = vsel %vm15_vm0, %v7769_v46, %v8029_v43 }
 0x486   :  { %v3239_v62 = vsel %vm1600_vm1, %v3207_v58, %v8031_v60 }
 0x487   :  { %v2755_v44 = vpop.permute.xlu0 %2754 }
 0x489   :  { %v3137_v27 = vpop.permute.xlu1 %3136 }
 0x48a   :  { %v3429_v13 = vsel %vm1798_vm7, %v3397_v10, %v3137_v27  ;;  %v3334_v10 = vsel %vm1699_vm4, %v3302_v33, %v2755_v44 }
 0x48b   :  { %4529 = vmatmul.mubr.msk.f32.gmra.mrb[26].mxu1 %vm1831_vm8, %v3429_v13  ;;  %v2249_v36 = vpop.permute.xlu0 %2248 }
 0x48d   :  { %v2375_v16 = vpop.permute.xlu1 %2374 }
 0x48f   :  { %v2757_v8 = vpop.permute.xlu0 %2756 }
 0x491   :  { %v2883_v4 = vpop.permute.xlu1 %2882 }
 0x492   :  { %v3366_v13 = vsel %vm1732_vm5, %v3334_v10, %v2883_v4  ;;  %v3271_v4 = vsel %vm1633_vm2, %v3239_v62, %v2501_v22  ;;  %v3208_v22 = vsel %vm15_vm0, %v7815_v24, %v2247_v21 }
 0x493   :  { %v2377_v63 = vpop.permute.xlu0 %2376  ;;  %v3303_v0 = vsel %vm1666_vm3, %v3271_v4, %v2629_v28  ;;  %v3209_v28 = vsel %vm15_vm0, %v7845_v19, %v2249_v36 }
 0x494   :  { %v3335_v33 = vsel %vm1699_vm4, %v3303_v0, %v2757_v8  ;;  %v3240_v8 = vsel %vm1600_vm1, %v3208_v22, %v2375_v16 }
 0x495   :  { %v2503_v40 = vpop.permute.xlu1 %2502 }
 0x497   :  { %v2885_v7 = vpop.permute.xlu0 %2884 }
 0x498   :  { %v3367_v10 = vsel %vm1732_vm5, %v3335_v33, %v2885_v7  ;;  %v3241_v7 = vsel %vm1600_vm1, %v3209_v28, %v2377_v63 }
 0x499   :  { %v3011_v2 = vpop.permute.xlu1 %3010 }
 0x49a   :  { %v3398_v55 = vsel %vm1765_vm6, %v3366_v13, %v3011_v2 }
 0x49b   :  { %v2505_v34 = vpop.permute.xlu0 %2504 }
 0x49c   :  { %v3273_v58 = vsel %vm1633_vm2, %v3241_v7, %v2505_v34 }
 0x49d   :  { %v2631_v30 = vpop.permute.xlu1 %2630 }
 0x49e   :  { %v8068_v17 = vpop.f32.mrb[14].mxu1 }
 0x49f   :  { %3914 = vst [vmem:[#allocation3 + $0x178] sm:$0xff] %v8068_v17  ;;  %v8072_v27 = vpop.f32.mrb[15].mxu1  ;;  %v3013_v41 = vpop.permute.xlu0 %3012 }
 0x4a0   :  { %3913 = vst [vmem:[#allocation3 + $0x170] sm:$0xff] %v8072_v27  ;;  %v3976_v31 = vadd.f32 %v3975_v15, %v8072_v27  ;;  %v3399_v46 = vsel %vm1765_vm6, %v3367_v10, %v3013_v41  ;;  %v3272_v41 = vsel %vm1633_vm2, %v3240_v8, %v2503_v40 }
 0x4a1   :  { %v3139_v18 = vpop.permute.xlu1 %3138 }
 0x4a2   :  { %v3430_v44 = vsel %vm1798_vm7, %v3398_v55, %v3139_v18  ;;  %v3977_v59 = vadd.f32 %v8068_v17, %v3976_v31 }
 0x4a3   :  { %4531 = vmatprep.mubr.msk.f32.mxu1 %vm1831_vm8, %v3430_v44  ;;  %v2633_v15 = vpop.permute.xlu0 %2632  ;;  %v3304_v44 = vsel %vm1666_vm3, %v3272_v41, %v2631_v30 }
 0x4a4   :  { %v3305_v4 = vsel %vm1666_vm3, %v3273_v58, %v2633_v15 }
 0x4a5   :  { %v2759_v2 = vpop.permute.xlu1 %2758 }
 0x4a6   :  { %v3336_v0 = vsel %vm1699_vm4, %v3304_v44, %v2759_v2 }
 0x4a7   :  { %v3141_v43 = vpop.permute.xlu0 %3140 }
 0x4a8   :  { %v3431_v13 = vsel %vm1798_vm7, %v3399_v46, %v3141_v43 }
 0x4a9   :  { %v2761_v31 = vpop.permute.xlu1 %2760  ;;  %4532 = vmatmul.mubr.msk.f32.gmra.mrb[28].mxu1 %vm1831_vm8, %v3431_v13 }
 0x4aa   :  { %v3337_v24 = vsel %vm1699_vm4, %v3305_v4, %v2761_v31 }
 0x4ab   :  { %v2887_v60 = vpop.permute.xlu0 %2886 }
 0x4ac   :  { %v3368_v19 = vsel %vm1732_vm5, %v3336_v0, %v2887_v60 }
 0x4ad   :  { %v2889_v55 = vpop.permute.xlu1 %2888 }
 0x4ae   :  { %v3369_v21 = vsel %vm1732_vm5, %v3337_v24, %v2889_v55 }
 0x4af   :  { %v3015_v18 = vpop.permute.xlu0 %3014 }
 0x4b0   :  { %v3400_v36 = vsel %vm1765_vm6, %v3368_v19, %v3015_v18 }
 0x4b1   :  { %v3017_v62 = vpop.permute.xlu1 %3016 }
 0x4b2   :  { %v3401_v63 = vsel %vm1765_vm6, %v3369_v21, %v3017_v62 }
 0x4b3   :  { %v3143_v16 = vpop.permute.xlu0 %3142 }
 0x4b4   :  { %v3432_v40 = vsel %vm1798_vm7, %v3400_v36, %v3143_v16 }
 0x4b5   :  { %v3145_v34 = vpop.permute.xlu1 %3144  ;;  %4534 = vmatprep.mubr.msk.f32.mxu1 %vm1831_vm8, %v3432_v40 }
 0x4b6   :  { %v3433_v30 = vsel %vm1798_vm7, %v3401_v63, %v3145_v34 }
 0x4b7   :  { %4535 = vmatmul.mubr.msk.f32.gmra.mrb[30].mxu1 %vm1831_vm8, %v3433_v30 }
 0x4be   :  { %v8113_v15 = vpop.f32.mrb[16].mxu1 }
 0x4bf   :  { %3916 = vst [vmem:[#allocation3 + $0x188] sm:$0xff] %v8113_v15  ;;  %v8116_v2 = vpop.f32.mrb[17].mxu1 }
 0x4c0   :  { %3915 = vst [vmem:[#allocation3 + $0x180] sm:$0xff] %v8116_v2  ;;  %v3978_v33 = vadd.f32 %v3977_v59, %v8116_v2 }
 0x4c2   :  { %v3979_v10 = vadd.f32 %v8113_v15, %v3978_v33 }
 0x4de   :  { %v8121_v46 = vpop.f32.mrb[18].mxu1 }
 0x4df   :  { %3918 = vst [vmem:[#allocation3 + $0x198] sm:$0xff] %v8121_v46  ;;  %v8124_v43 = vpop.f32.mrb[19].mxu1 }
 0x4e0   :  { %3917 = vst [vmem:[#allocation3 + $0x190] sm:$0xff] %v8124_v43  ;;  %v3980_v13 = vadd.f32 %v3979_v10, %v8124_v43 }
 0x4e2   :  { %v3981_v31 = vadd.f32 %v8121_v46, %v3980_v13 }
 0x4fe   :  { %v8129_v60 = vpop.f32.mrb[20].mxu1 }
 0x4ff   :  { %3920 = vst [vmem:[#allocation3 + $0x1a8] sm:$0xff] %v8129_v60  ;;  %v3808_v55 = vpop.f32.mrb[21].mxu1 }
 0x500   :  { %3919 = vst [vmem:[#allocation3 + $0x1a0] sm:$0xff] %v3808_v55  ;;  %v3982_v59 = vadd.f32 %v3981_v31, %v3808_v55 }
 0x502   :  { %v3983_v22 = vadd.f32 %v8129_v60, %v3982_v59 }
 0x51e   :  { %v4524_v28 = vpop.f32.mrb[22].mxu1 }
 0x51f   :  { %3922 = vst [vmem:[#allocation3 + $0x1b8] sm:$0xff] %v4524_v28  ;;  %v3818_v8 = vpop.f32.mrb[23].mxu1 }
 0x520   :  { %3921 = vst [vmem:[#allocation3 + $0x1b0] sm:$0xff] %v3818_v8  ;;  %v3984_v7 = vadd.f32 %v3983_v22, %v3818_v8 }
 0x522   :  { %v3985_v41 = vadd.f32 %v4524_v28, %v3984_v7 }
 0x53e   :  { %v4527_v18 = vpop.f32.mrb[24].mxu1 }
 0x53f   :  { %3924 = vst [vmem:[#allocation3 + $0x1c8] sm:$0xff] %v4527_v18  ;;  %v3828_v58 = vpop.f32.mrb[25].mxu1 }
 0x540   :  { %3923 = vst [vmem:[#allocation3 + $0x1c0] sm:$0xff] %v3828_v58  ;;  %v3986_v44 = vadd.f32 %v3985_v41, %v3828_v58 }
 0x542   :  { %v3987_v62 = vadd.f32 %v4527_v18, %v3986_v44 }
 0x55e   :  { %v4530_v4 = vpop.f32.mrb[26].mxu1 }
 0x55f   :  { %3926 = vst [vmem:[#allocation3 + $0x1d8] sm:$0xff] %v4530_v4  ;;  %v3838_v0 = vpop.f32.mrb[27].mxu1 }
 0x560   :  { %3925 = vst [vmem:[#allocation3 + $0x1d0] sm:$0xff] %v3838_v0  ;;  %v3988_v24 = vadd.f32 %v3987_v62, %v3838_v0 }
 0x562   :  { %v3989_v19 = vadd.f32 %v4530_v4, %v3988_v24 }
 0x57c   :  { %v4533_v21 = vpop.f32.mrb[28].mxu1 }
 0x57d   :  { %3928 = vst [vmem:[#allocation3 + $0x1e8] sm:$0xff] %v4533_v21  ;;  %v3848_v36 = vpop.f32.mrb[29].mxu1 }
 0x57e   :  { %3927 = vst [vmem:[#allocation3 + $0x1e0] sm:$0xff] %v3848_v36  ;;  %v3990_v16 = vadd.f32 %v3989_v19, %v3848_v36 }
 0x580   :  { %v3991_v63 = vadd.f32 %v4533_v21, %v3990_v16 }
 0x58a   :  { %v4536_v40 = vpop.f32.mrb[30].mxu1 }
 0x58b   :  { %3930 = vst [vmem:[#allocation3 + $0x1f8] sm:$0xff] %v4536_v40  ;;  %v3858_v34 = vpop.f32.mrb[31].mxu1 }
 0x58c   :  { %3929 = vst [vmem:[#allocation3 + $0x1f0] sm:$0xff] %v3858_v34  ;;  %v3992_v30 = vadd.f32 %v3991_v63, %v3858_v34 }
 0x58e   :  { %v3993_v33 = vadd.f32 %v4536_v40, %v3992_v30 }
 0x590   :  { %v3994_v10 = vrot.slane %v3993_v33, 4 }
 0x592   :  { %v3995_v13 = vadd.f32 %v3994_v10, %v3993_v33 }
 0x594   :  { %v3996_v31 = vrot.slane %v3995_v13, 2 }
 0x596   :  { %v3997_v59 = vadd.f32 %v3996_v31, %v3995_v13 }
 0x598   :  { %v3998_v22 = vrot.slane %v3997_v59, 1 }
 0x59a   :  { %v8133_v7 = vadd.f32 %v3998_v22, %v3997_v59  ;;  %v4636_v59 = vld [vmem:[#allocation3 + $0x18] sm:$0xff]  ;;  %v4637_v22 = vld [vmem:[#allocation3 + $0x20] sm:$0xff] }
 0x59c   :  { %8911 = vst [vmem:[#allocation63_spill] sm:$0xff] %v8133_v7  ;;  %v8136_v41 = vmul.f32 0.001953125, %v8133_v7 }
 0x59e   :  { %v8140_v44 = vsub.f32 %v7670_v52, %v8136_v41  ;;  %v8144_v62 = vsub.f32 %v7754_v37, %v8136_v41  ;;  %v8148_v24 = vsub.f32 %v7747_v3, %v8136_v41  ;;  %v8152_v19 = vsub.f32 %v7830_v39, %v8136_v41 }
 0x59f   :  { %v8156_v16 = vsub.f32 %v7823_v45, %v8136_v41  ;;  %v8160_v52 = vsub.f32 %v7903_v53, %v8136_v41  ;;  %v8164_v37 = vsub.f32 %v7897_v48, %v8136_v41  ;;  %v8168_v3 = vsub.f32 %v7967_v32, %v8136_v41 }
 0x5a0   :  { %v8172_v39 = vsub.f32 %v7961_v23, %v8136_v41  ;;  %v8176_v45 = vsub.f32 %v8007_v29, %v8136_v41  ;;  %v8180_v53 = vsub.f32 %v8003_v50, %v8136_v41  ;;  %v8184_v48 = vsub.f32 %v8042_v51, %v8136_v41 }
 0x5a1   :  { %v8188_v32 = vsub.f32 %v8038_v47, %v8136_v41  ;;  %v8192_v23 = vsub.f32 %v8072_v27, %v8136_v41  ;;  %v8196_v29 = vsub.f32 %v8068_v17, %v8136_v41  ;;  %v8200_v50 = vsub.f32 %v8116_v2, %v8136_v41 }
 0x5a2   :  { %v8204_v51 = vsub.f32 %v8113_v15, %v8136_v41  ;;  %v8208_v47 = vsub.f32 %v8124_v43, %v8136_v41  ;;  %v8212_v27 = vsub.f32 %v8121_v46, %v8136_v41  ;;  %v8215_v63 = vsub.f32 %v3808_v55, %v8136_v41 }
 0x5a3   :  { %v8219_v17 = vsub.f32 %v8129_v60, %v8136_v41  ;;  %v8222_v2 = vsub.f32 %v3818_v8, %v8136_v41  ;;  %v8225_v15 = vsub.f32 %v4524_v28, %v8136_v41  ;;  %v8228_v43 = vsub.f32 %v3828_v58, %v8136_v41 }
 0x5a4   :  { %v8231_v30 = vsub.f32 %v4527_v18, %v8136_v41  ;;  %v8234_v46 = vsub.f32 %v3838_v0, %v8136_v41  ;;  %v8237_v55 = vsub.f32 %v4530_v4, %v8136_v41  ;;  %v8240_v60 = vsub.f32 %v3848_v36, %v8136_v41  ;;  %v4633_v18 = vld [vmem:[#allocation3] sm:$0xff]  ;;  %v4634_v0 = vld [vmem:[#allocation3 + $0x8] sm:$0xff]  ;;  %v4635_v4 = vld [vmem:[#allocation3 + $0x10] sm:$0xff] }
 0x5a5   :  { %v8243_v8 = vsub.f32 %v4533_v21, %v8136_v41  ;;  %v8246_v28 = vsub.f32 %v3858_v34, %v8136_v41  ;;  %v8249_v58 = vsub.f32 %v4536_v40, %v8136_v41  ;;  %v4001_v33 = vsub.f32 %v4633_v18, %v8136_v41 }
 0x5a6   :  { %v4002_v10 = vsub.f32 %v4634_v0, %v8136_v41  ;;  %v4003_v13 = vsub.f32 %v4635_v4, %v8136_v41  ;;  %v4004_v21 = vsub.f32 %v4636_v59, %v8136_v41  ;;  %v4005_v34 = vsub.f32 %v4637_v22, %v8136_v41  ;;  %v4639_v0 = vld [vmem:[#allocation3 + $0x30] sm:$0xff] }
 0x5a7   :  { %8912 = vst [vmem:[#allocation71_spill] sm:$0xff] %v8243_v8  ;;  %8913 = vst [vmem:[#allocation65_spill] sm:$0xff] %v8246_v28  ;;  %v4065_v36 = vmul.f32 %v4001_v33, %v4001_v33  ;;  %v4007_v4 = vsub.f32 %v4639_v0, %v8136_v41 }
 0x5a8   :  { %8914 = vst [vmem:[#allocation67_spill] sm:$0xff] %v8249_v58  ;;  %v4066_v31 = vmul.f32 %v4002_v10, %v4002_v10  ;;  %v4067_v7 = vmul.f32 %v4003_v13, %v4003_v13  ;;  %v4638_v58 = vld [vmem:[#allocation3 + $0x28] sm:$0xff]  ;;  %v4068_v18 = vmul.f32 %v4004_v21, %v4004_v21  ;;  %v4069_v33 = vmul.f32 %v4005_v34, %v4005_v34 }
 0x5a9   :  { %v4006_v28 = vsub.f32 %v4638_v58, %v8136_v41 }
 0x5aa   :  { %v4129_v40 = vadd.f32 %v4066_v31, %v4065_v36 }
 0x5ac   :  { %v4130_v8 = vadd.f32 %v4129_v40, %v4067_v7 }
 0x5ae   :  { %v4131_v10 = vadd.f32 %v4130_v8, %v4068_v18 }
 0x5af   :  { %4651 = shalt.err (!%p4648_p4)
}
 0x5b0   :  { %s4652_s27 = scalar_lea.hbm %s8400_s2, 8192 }
 0x5b1   :  { %p4653_p5 = scmp.ne.s32.totalorder %s8400_s2, %s4652_s27  ;;  %p4656_p6 = scmp.lt.u32.totalorder %s4652_s27, %s8400_s2 }
 0x5b3   :  { %p4658_p7 = pnand %p4656_p6, %p4653_p5 }
 0x5b5   :  { %4661 = shalt.err (!%p4658_p7)
}
 0x5b6   :  { %s4698_s21 = smov 128   ;;  %v4008_v7 = vsub.f32 %v7323_v56, %v8136_v41  ;;  %v4070_v8 = vmul.f32 %v4006_v28, %v4006_v28  ;;  %v4132_v58 = vadd.f32 %v4131_v10, %v4069_v33  ;;  %v4009_v13 = vsub.f32 %v7355_v11, %v8136_v41 }
 0x5b7   :  { %4214 = dma.vmem_to_hbm [thread:$0]  %s4209_s23, 8192, %s8400_s2, [#allocation4], %s4698_s21, %s4698_s21, %s4689_s8   ;;  %v4071_v36 = vmul.f32 %v4007_v4, %v4007_v4  ;;  %v4010_v59 = vsub.f32 %v7346_v49, %v8136_v41  ;;  %v4011_v34 = vsub.f32 %v7372_v1, %v8136_v41  ;;  %v4012_v56 = vsub.f32 %v7363_v38, %v8136_v41 }
 0x5b8   :  { %v4133_v31 = vadd.f32 %v4132_v58, %v4070_v8  ;;  %v4072_v21 = vmul.f32 %v4008_v7, %v4008_v7  ;;  %v4073_v40 = vmul.f32 %v4009_v13, %v4009_v13  ;;  %v4013_v11 = vsub.f32 %v7398_v35, %v8136_v41  ;;  %s4699_s2 = smov [#allocation5]  }
 0x5b9   :  { %v4074_v28 = vmul.f32 %v4010_v59, %v4010_v59  ;;  %v4075_v4 = vmul.f32 %v4011_v34, %v4011_v34  ;;  %v4014_v49 = vsub.f32 %v7391_v6, %v8136_v41  ;;  %v4076_v10 = vmul.f32 %v4012_v56, %v4012_v56  ;;  %s4221_s8 = sshll.u32 %s4699_s2, 4  ;;  %s4222_s8 = int_to_ptr.vmem [resolvable:$true] %s4221_s8 }
 0x5ba   :  { %v4134_v22 = vadd.f32 %v4133_v31, %v4071_v36  ;;  %v4015_v1 = vsub.f32 %v7414_v25, %v8136_v41  ;;  %v4077_v8 = vmul.f32 %v4013_v11, %v4013_v11  ;;  %v4016_v38 = vsub.f32 %v7409_v5, %v8136_v41  ;;  %s4662_s29 = scalar_lea.vmem %s4222_s8, 128  ;;  %p4667_p9 = scmp.lt.s32.totalorder %s4222_s8, %s4222_s8 }
 0x5bb   :  { %v4078_v13 = vmul.f32 %v4014_v49, %v4014_v49  ;;  %v4017_v35 = vsub.f32 %v7429_v9, %v8136_v41  ;;  %v4018_v6 = vsub.f32 %v7424_v26, %v8136_v41  ;;  %v4019_v25 = vsub.f32 %v7441_v57, %v8136_v41  ;;  %p4663_p8 = scmp.ne.s32.totalorder %s4222_s8, %s4662_s29  ;;  %p4668_p10 = scmp.lt.s32.totalorder %s4662_s29, %s4662_s29 }
 0x5bc   :  { %v4135_v18 = vadd.f32 %v4134_v22, %v4072_v21  ;;  %v4079_v31 = vmul.f32 %v4015_v1, %v4015_v1  ;;  %v4080_v21 = vmul.f32 %v4016_v38, %v4016_v38  ;;  %v4020_v5 = vsub.f32 %v7436_v12, %v8136_v41 }
 0x5bd   :  { %v4081_v34 = vmul.f32 %v4017_v35, %v4017_v35  ;;  %v4021_v9 = vsub.f32 %v7458_v54, %v8136_v41  ;;  %v4022_v26 = vsub.f32 %v7450_v20, %v8136_v41  ;;  %v4023_v57 = vsub.f32 %v7472_v42, %v8136_v41  ;;  %p4669_p11 = por %p4668_p10, %p4667_p9 }
 0x5be   :  { %v4136_v0 = vadd.f32 %v4135_v18, %v4073_v40  ;;  %v4082_v18 = vmul.f32 %v4018_v6, %v4018_v6  ;;  %v4084_v11 = vmul.f32 %v4020_v5, %v4020_v5  ;;  %v4024_v12 = vsub.f32 %v7464_v61, %v8136_v41 }
 0x5bf   :  { %v4025_v54 = vsub.f32 %v7501_v14, %v8136_v41  ;;  %v4087_v1 = vmul.f32 %v4023_v57, %v4023_v57  ;;  %vm4198_vm9 = vcmask 1040384   ;;  %vm4200_vm10 = vcmask 1041408   ;;  %p4670_p12 = pnand %p4669_p11, %p4663_p8 }
 0x5c0   :  { %v4137_v33 = vadd.f32 %v4136_v0, %v4074_v28  ;;  %v4083_v28 = vmul.f32 %v4019_v25, %v4019_v25  ;;  %v4088_v38 = vmul.f32 %v4024_v12, %v4024_v12 }
 0x5c1   :  { %v4089_v35 = vmul.f32 %v4025_v54, %v4025_v54 }
 0x5c2   :  { %v4138_v7 = vadd.f32 %v4137_v33, %v4075_v4  ;;  %v4085_v33 = vmul.f32 %v4021_v9, %v4021_v9  ;;  %v8920_v9 = vld [vmem:[#allocation61_spill] sm:$0xff] }
 0x5c4   :  { %v4139_v58 = vadd.f32 %v4138_v7, %v4076_v10  ;;  %v4086_v10 = vmul.f32 %v4022_v26, %v4022_v26 }
 0x5c6   :  { %v4140_v36 = vadd.f32 %v4139_v58, %v4077_v8  ;;  %v8915_v58 = vld [vmem:[#allocation49_spill] sm:$0xff] }
 0x5c7   :  { %v4026_v20 = vsub.f32 %v8915_v58, %v8136_v41 }
 0x5c8   :  { %v4141_v59 = vadd.f32 %v4140_v36, %v4078_v13  ;;  %v8916_v36 = vld [vmem:[#allocation53_spill] sm:$0xff] }
 0x5c9   :  { %v4027_v42 = vsub.f32 %v8916_v36, %v8136_v41  ;;  %v4090_v6 = vmul.f32 %v4026_v20, %v4026_v20  ;;  %v4098_v20 = vmul.f32 %v8140_v44, %v8140_v44  ;;  %v4103_v44 = vmul.f32 %v8160_v52, %v8160_v52 }
 0x5ca   :  { %v4142_v22 = vadd.f32 %v4141_v59, %v4079_v31  ;;  %v8917_v59 = vld [vmem:[#allocation51_spill] sm:$0xff]  ;;  %v4108_v52 = vmul.f32 %v8180_v53, %v8180_v53  ;;  %v4113_v53 = vmul.f32 %v8200_v50, %v8200_v50  ;;  %v4118_v50 = vmul.f32 %v8219_v17, %v8219_v17 }
 0x5cb   :  { %v4028_v61 = vsub.f32 %v8917_v59, %v8136_v41  ;;  %v4091_v25 = vmul.f32 %v4027_v42, %v4027_v42  ;;  %v4100_v42 = vmul.f32 %v8148_v24, %v8148_v24  ;;  %v4102_v59 = vmul.f32 %v8156_v16, %v8156_v16 }
 0x5cc   :  { %v4143_v40 = vadd.f32 %v4142_v22, %v4080_v21  ;;  %v8918_v22 = vld [vmem:[#allocation57_spill] sm:$0xff]  ;;  %v4105_v24 = vmul.f32 %v8168_v3, %v8168_v3  ;;  %v4107_v16 = vmul.f32 %v8176_v45, %v8176_v45  ;;  %v4110_v3 = vmul.f32 %v8188_v32, %v8188_v32 }
 0x5cd   :  { %v4029_v14 = vsub.f32 %v8918_v22, %v8136_v41  ;;  %v4112_v45 = vmul.f32 %v8196_v29, %v8196_v29  ;;  %v4115_v32 = vmul.f32 %v8208_v47, %v8208_v47  ;;  %v4117_v29 = vmul.f32 %v8215_v63, %v8215_v63 }
 0x5ce   :  { %v4144_v56 = vadd.f32 %v4143_v40, %v4081_v34  ;;  %v8919_v40 = vld [vmem:[#allocation55_spill] sm:$0xff]  ;;  %v4120_v47 = vmul.f32 %v8225_v15, %v8225_v15  ;;  %v4122_v63 = vmul.f32 %v8231_v30, %v8231_v30  ;;  %v4123_v17 = vmul.f32 %v8234_v46, %v8234_v46 }
 0x5cf   :  { %v4030_v5 = vsub.f32 %v8919_v40, %v8136_v41  ;;  %v4125_v15 = vmul.f32 %v8240_v60, %v8240_v60 }
 0x5d0   :  { %v4145_v0 = vadd.f32 %v4144_v56, %v4082_v18  ;;  %v4092_v18 = vmul.f32 %v4028_v61, %v4028_v61 }
 0x5d1   :  { %v4094_v57 = vmul.f32 %v4030_v5, %v4030_v5 }
 0x5d2   :  { %v4146_v4 = vadd.f32 %v4145_v0, %v4083_v28  ;;  %v4031_v28 = vsub.f32 %v8920_v9, %v8136_v41  ;;  %v4093_v0 = vmul.f32 %v4029_v14, %v4029_v14 }
 0x5d4   :  { %v4147_v49 = vadd.f32 %v4146_v4, %v4084_v11  ;;  %v8921_v11 = vld [vmem:[#allocation59_spill] sm:$0xff] }
 0x5d5   :  { %v4032_v4 = vsub.f32 %v8921_v11, %v8136_v41 }
 0x5d6   :  { %v4148_v7 = vadd.f32 %v4147_v49, %v4085_v33  ;;  %v8922_v49 = vld [vmem:[#allocation69_spill] sm:$0xff] }
 0x5d7   :  { %v4033_v12 = vsub.f32 %v8922_v49, %v8136_v41  ;;  %v4096_v54 = vmul.f32 %v4032_v4, %v4032_v4  ;;  %v4101_v41 = vmul.f32 %v8152_v19, %v8152_v19  ;;  %v4106_v19 = vmul.f32 %v8172_v39, %v8172_v39 }
 0x5d8   :  { %v4149_v8 = vadd.f32 %v4148_v7, %v4086_v10  ;;  %v4095_v10 = vmul.f32 %v4031_v28, %v4031_v28  ;;  %v4111_v39 = vmul.f32 %v8192_v23, %v8192_v23  ;;  %v4116_v23 = vmul.f32 %v8212_v27, %v8212_v27 }
 0x5d9   :  { %v4121_v27 = vmul.f32 %v8228_v43, %v8228_v43 }
 0x5da   :  { %v4150_v13 = vadd.f32 %v4149_v8, %v4087_v1  ;;  %v4097_v8 = vmul.f32 %v4033_v12, %v4033_v12 }
 0x5dc   :  { %v4151_v31 = vadd.f32 %v4150_v13, %v4088_v38  ;;  %v4099_v13 = vmul.f32 %v8144_v62, %v8144_v62  ;;  %v4104_v62 = vmul.f32 %v8164_v37, %v8164_v37  ;;  %v4109_v37 = vmul.f32 %v8184_v48, %v8184_v48 }
 0x5dd   :  { %v4114_v48 = vmul.f32 %v8204_v51, %v8204_v51  ;;  %v4119_v51 = vmul.f32 %v8222_v2, %v8222_v2  ;;  %v4124_v2 = vmul.f32 %v8237_v55, %v8237_v55 }
 0x5de   :  { %v4152_v21 = vadd.f32 %v4151_v31, %v4089_v35 }
 0x5e0   :  { %v4153_v34 = vadd.f32 %v4152_v21, %v4090_v6 }
 0x5e2   :  { %v4154_v56 = vadd.f32 %v4153_v34, %v4091_v25 }
 0x5e4   :  { %v4155_v26 = vadd.f32 %v4154_v56, %v4092_v18 }
 0x5e6   :  { %v4156_v33 = vadd.f32 %v4155_v26, %v4093_v0 }
 0x5e8   :  { %v4157_v7 = vadd.f32 %v4156_v33, %v4094_v57 }
 0x5ea   :  { %v4158_v1 = vadd.f32 %v4157_v7, %v4095_v10 }
 0x5ec   :  { %v4159_v58 = vadd.f32 %v4158_v1, %v4096_v54  ;;  %v8923_v1 = vld [vmem:[#allocation71_spill] sm:$0xff] }
 0x5ed   :  { %v4126_v43 = vmul.f32 %v8923_v1, %v8923_v1 }
 0x5ee   :  { %v4160_v38 = vadd.f32 %v4159_v58, %v4097_v8  ;;  %v8924_v58 = vld [vmem:[#allocation65_spill] sm:$0xff] }
 0x5ef   :  { %v4127_v30 = vmul.f32 %v8924_v58, %v8924_v58 }
 0x5f0   :  { %v4161_v36 = vadd.f32 %v4160_v38, %v4098_v20  ;;  %v8925_v38 = vld [vmem:[#allocation67_spill] sm:$0xff] }
 0x5f1   :  { %v4128_v46 = vmul.f32 %v8925_v38, %v8925_v38 }
 0x5f2   :  { %v4162_v35 = vadd.f32 %v4161_v36, %v4099_v13 }
 0x5f4   :  { %v4163_v31 = vadd.f32 %v4162_v35, %v4100_v42 }
 0x5f6   :  { %v4164_v61 = vadd.f32 %v4163_v31, %v4101_v41 }
 0x5f8   :  { %v4165_v6 = vadd.f32 %v4164_v61, %v4102_v59  ;;  %v8926_v59 = vld [vmem:[#allocation63_spill] sm:$0xff] }
 0x5fa   :  { %v4166_v21 = vadd.f32 %v4165_v6, %v4103_v44 }
 0x5fc   :  { %v4167_v22 = vadd.f32 %v4166_v21, %v4104_v62 }
 0x5fe   :  { %v4168_v14 = vadd.f32 %v4167_v22, %v4105_v24 }
 0x600   :  { %v4169_v25 = vadd.f32 %v4168_v14, %v4106_v19 }
 0x602   :  { %v4170_v34 = vadd.f32 %v4169_v25, %v4107_v16 }
 0x604   :  { %v4171_v40 = vadd.f32 %v4170_v34, %v4108_v52 }
 0x606   :  { %v4172_v5 = vadd.f32 %v4171_v40, %v4109_v37 }
 0x608   :  { %v4173_v18 = vadd.f32 %v4172_v5, %v4110_v3 }
 0x60a   :  { %v4174_v56 = vadd.f32 %v4173_v18, %v4111_v39 }
 0x60c   :  { %v4175_v9 = vadd.f32 %v4174_v56, %v4112_v45 }
 0x60e   :  { %v4176_v28 = vadd.f32 %v4175_v9, %v4113_v53 }
 0x610   :  { %v4177_v0 = vadd.f32 %v4176_v28, %v4114_v48 }
 0x612   :  { %v4178_v26 = vadd.f32 %v4177_v0, %v4115_v32 }
 0x614   :  { %v4179_v11 = vadd.f32 %v4178_v26, %v4116_v23 }
 0x616   :  { %v4180_v4 = vadd.f32 %v4179_v11, %v4117_v29 }
 0x618   :  { %v4181_v57 = vadd.f32 %v4180_v4, %v4118_v50 }
 0x61a   :  { %v4182_v33 = vadd.f32 %v4181_v57, %v4119_v51 }
 0x61c   :  { %v4183_v49 = vadd.f32 %v4182_v33, %v4120_v47 }
 0x61e   :  { %v4184_v12 = vadd.f32 %v4183_v49, %v4121_v27 }
 0x620   :  { %v4185_v10 = vadd.f32 %v4184_v12, %v4122_v63 }
 0x622   :  { %v4186_v7 = vadd.f32 %v4185_v10, %v4123_v17 }
 0x624   :  { %v4187_v54 = vadd.f32 %v4186_v7, %v4124_v2 }
 0x626   :  { %v4188_v8 = vadd.f32 %v4187_v54, %v4125_v15 }
 0x628   :  { %v4189_v20 = vadd.f32 %v4188_v8, %v4126_v43 }
 0x62a   :  { %v4190_v13 = vadd.f32 %v4189_v20, %v4127_v30 }
 0x62c   :  { %v4191_v36 = vadd.f32 %v4190_v13, %v4128_v46 }
 0x62e   :  { %v4192_v42 = vrot.slane %v4191_v36, 4 }
 0x630   :  { %v4193_v55 = vadd.f32 %v4192_v42, %v4191_v36 }
 0x632   :  { %v4194_v35 = vrot.slane %v4193_v55, 2 }
 0x634   :  { %v4195_v41 = vadd.f32 %v4194_v35, %v4193_v55 }
 0x636   :  { %v4196_v31 = vrot.slane %v4195_v41, 1 }
 0x638   :  { %v4197_v60 = vadd.f32 %v4196_v31, %v4195_v41 }
 0x63a   :  { %v4199_v61 = vsel %vm4198_vm9, %v8926_v59, %v4197_v60 }
 0x63b   :  { %v4201_v44 = vsel %vm4200_vm10, %v4199_v61, 0.0 }
 0x63c   :  { %4202 = vst [vmem:[#allocation5] sm:$0xff] %v4201_v44 }
 0x63d   :  { %4673 = shalt.err (!%p4670_p12)
}
 0x63e   :  { %s4674_s5 = scalar_lea.hbm %s8401_s3, 128 }
 0x63f   :  { %p4675_p13 = scmp.ne.s32.totalorder %s8401_s3, %s4674_s5  ;;  %p4678_p0 = scmp.lt.u32.totalorder %s4674_s5, %s8401_s3 }
 0x641   :  { %p4680_p1 = pnand %p4678_p0, %p4675_p13 }
 0x643   :  { %4683 = shalt.err (!%p4680_p1)
}
 0x644   :  { %4224 = dma.vmem_to_hbm [thread:$0]  %s4222_s8, 128, %s8401_s3, [#allocation6]  }
 0x645   :  { %4684 = dma.done.wait [#allocation4], 8192  }
 0x646   :  { %4685 = vsyncadd [#allocation4], 4294959104 }
 0x647   :  { %4686 = dma.done.wait [#allocation6], 128  }
 0x648   :  { %4687 = vsyncadd [#allocation6], 4294967168 }
 0x649   :  { %4231 = vsyncpa [#allocation4], 1 }
 0x64a   :  { %4232 = vsyncpa [#allocation6], 1 }

</bundles_post_ra>
